<compile_context>
chip_gen: v7x
topology: tpu7x:2x2x1
jax: 0.10.0
libtpu: 0.0.40
codegen_flags: <defaults>
</compile_context>

<pallas_src>
import functools

import jax
import jax.numpy as jnp
from jax.experimental import pallas as pl
from jax.experimental.pallas import tpu as pltpu

EPS = 1e-12  # matches torch F.normalize eps


# ----------------------------------------------------------------------------
# Fused forward kernel (single invocation, everything VMEM-resident)
# ----------------------------------------------------------------------------
def fused_gsage_kernel(adj1_ref, adj2n_ref, gc1w_ref,
                       wlr_all_ref, b_all_ref,
                       wlr_last_ref, b_last_ref,
                       w1_ref, b1_ref, w2_ref, b2_ref, w3_ref, b3_ref,
                       out_ref, *, num_layers):
    f32 = jnp.float32

    def mm(a, b):
        return jnp.dot(a, b, preferred_element_type=f32)

    def l2norm_rows(h):
        # torch F.normalize(p=2, dim=1, eps=1e-12):  h / max(||h||, eps)
        ss = jnp.sum(h * h, axis=1, keepdims=True)
        return h * jax.lax.rsqrt(jnp.maximum(ss, EPS * EPS))

    adj2n = adj2n_ref[...]                         # (N, N), rows pre-scaled by 1/deg

    # ---- gc1: x2_1 = normalize(relu(adj1 @ W)) ----
    x21 = l2norm_rows(jnp.maximum(mm(adj1_ref[...], gc1w_ref[...]), 0.0))

    # ---- shared mean aggregation of x2_1 (branch inputs + chain step 0) ----
    agg0 = mm(adj2n, x21)                          # (N, H)
    lane0 = jnp.concatenate([agg0, x21], axis=1)   # (N, 2H) fused [agg | root]

    # ---- the 6 score branches: layer l applied to x2_1 (fused Wl/Wr, K=2H) ----
    branches = []
    for l in range(num_layers):                    # unrolled; static weight index
        h = jnp.maximum(mm(lane0, wlr_all_ref[l]) + b_all_ref[l], 0.0)
        branches.append(l2norm_rows(h))

    # ---- chained intermediate layers (branch 0 == chain step 0) + gc_last ----
    x = branches[0]
    for l in range(1, num_layers):
        agg = mm(adj2n, x)
        h = mm(jnp.concatenate([agg, x], axis=1), wlr_all_ref[l]) + b_all_ref[l]
        x = l2norm_rows(jnp.maximum(h, 0.0))
    agg = mm(adj2n, x)
    x_last = jnp.maximum(
        mm(jnp.concatenate([agg, x], axis=1), wlr_last_ref[...]) + b_last_ref[...],
        0.0)

    # ---- shared score MLP: one row-stacked pass over all (2 + L) inputs ----
    n = x21.shape[0]
    xs = jnp.concatenate([x21, x_last] + branches, axis=0)    # ((2+L)*N, H)
    g1 = jnp.maximum(mm(xs, w1_ref[...]) + b1_ref[...], 0.0)
    g2 = jnp.maximum(mm(g1, w2_ref[...]) + b2_ref[...], 0.0)
    s = mm(g2, w3_ref[...]) + b3_ref[...]                      # ((2+L)*N, 1)

    # branch sum = a few static sublane-slice adds on the score column
    out = s[0:n] + s[n:2 * n]
    for l in range(num_layers):
        out = out + s[(2 + l) * n:(3 + l) * n]
    out_ref[...] = out


# ----------------------------------------------------------------------------
# One-time parameter packing (hoisted out of the per-call path)
# ----------------------------------------------------------------------------
def prepare_params(params):
    wlr_all = jnp.stack([jnp.concatenate([wl, wr], axis=0)       # (L, 2H, H)
                         for (wl, wr, _) in params["intermediate"]])
    b_all = jnp.stack([b for (_, _, b) in params["intermediate"]])  # (L, 1, H)
    wl_last, wr_last, b_last = params["gc_last"]
    wlr_last = jnp.concatenate([wl_last, wr_last], axis=0)          # (2H, H)
    w1, b1, w2, b2, w3, b3 = params["mlp"]
    return {
        "gc1_w": params["gc1_w"],
        "wlr_all": wlr_all, "b_all": b_all,
        "wlr_last": wlr_last, "b_last": b_last,
        "w1": w1, "b1": b1, "w2": w2, "b2": b2, "w3": w3, "b3": b3,
    }


# ----------------------------------------------------------------------------
# Wrapper: row-normalizes adj2 once and issues ONE pallas_call
# ----------------------------------------------------------------------------
def gsage_close_forward(packed, adj1, adj2):
    n = adj1.shape[0]
    num_layers = packed["wlr_all"].shape[0]

    # mean aggregation folded into the adjacency: adj2n @ x == (adj2 @ x) / deg
    adj2n = adj2 / jnp.maximum(jnp.sum(adj2, axis=1, keepdims=True), 1.0)

    args = (adj1, adj2n, packed["gc1_w"],
            packed["wlr_all"], packed["b_all"],
            packed["wlr_last"], packed["b_last"],
            packed["w1"], packed["b1"], packed["w2"], packed["b2"],
            packed["w3"], packed["b3"])

    kern = functools.partial(fused_gsage_kernel, num_layers=num_layers)
    return pl.pallas_call(
        kern,
        out_shape=jax.ShapeDtypeStruct((n, 1), jnp.float32),
        in_specs=[pl.BlockSpec(memory_space=pltpu.MemorySpace.VMEM)] * len(args),
        out_specs=pl.BlockSpec(memory_space=pltpu.MemorySpace.VMEM),
    )(*args)


# ----------------------------------------------------------------------------
# Parameter init (deterministic, synthetic)
# ----------------------------------------------------------------------------
def init_params(key, ninput, nhid, num_intermediate_layers):
    def dense(k, shape, scale=0.1):
        return scale * jax.random.normal(k, shape, dtype=jnp.float32)

    keys = jax.random.split(key, 3 + 3 * (num_intermediate_layers + 1) + 6)
    it = iter(keys)
    params = {
        "gc1_w": dense(next(it), (ninput, nhid)),
        "intermediate": [],
    }
    for _ in range(num_intermediate_layers):
        params["intermediate"].append((
            dense(next(it), (nhid, nhid)),          # Wl (neighbor lin, with bias)
            dense(next(it), (nhid, nhid)),          # Wr (root lin, no bias)
            dense(next(it), (1, nhid)),             # bias
        ))
    params["gc_last"] = (
        dense(next(it), (nhid, nhid)),
        dense(next(it), (nhid, nhid)),
        dense(next(it), (1, nhid)),
    )
    params["mlp"] = (
        dense(next(it), (nhid, 2 * nhid)), dense(next(it), (1, 2 * nhid)),
        dense(next(it), (2 * nhid, 2 * nhid)), dense(next(it), (1, 2 * nhid)),
        dense(next(it), (2 * nhid, 1)), dense(next(it), (1, 1)),
    )
    return params


# ----------------------------------------------------------------------------
# Pure-JAX reference (mirrors the torch module) for a tolerance check
# ----------------------------------------------------------------------------
def reference_forward(params, adj1, adj2):
    def norm(x):
        nrm = jnp.sqrt(jnp.sum(x * x, axis=1, keepdims=True))
        return x / jnp.maximum(nrm, EPS)

    deg = jnp.maximum(jnp.sum(adj2, axis=1, keepdims=True), 1.0)

    def sage(x, wl, wr, b):
        agg = (adj2 @ x) / deg
        return agg @ wl + x @ wr + b

    w1, b1, w2, b2, w3, b3 = params["mlp"]

    def mlp(x):
        h = jax.nn.relu(x @ w1 + b1)
        h = jax.nn.relu(h @ w2 + b2)
        return h @ w3 + b3

    x21 = norm(jax.nn.relu(adj1 @ params["gc1_w"]))
    x = x21
    for (wl, wr, b) in params["intermediate"]:
        x = norm(jax.nn.relu(sage(x, wl, wr, b)))
    x_last = jax.nn.relu(sage(x, *params["gc_last"]))

    score = mlp(x21)
    for (wl, wr, b) in params["intermediate"]:
        score = score + mlp(norm(jax.nn.relu(sage(x21, wl, wr, b))))
    score = score + mlp(x_last)
    return score


if __name__ == "__main__":
    # Small deterministic problem: N = ninput = 64 nodes, nhid = 32.
    N = 64
    NHID = 32
    NUM_INTERMEDIATE = 6

    key = jax.random.PRNGKey(0)
    k_adj1, k_adj2, k_params = jax.random.split(key, 3)

    # Random symmetric binary adjacency matrices (float32).
    a1 = (jax.random.uniform(k_adj1, (N, N)) < 0.2).astype(jnp.float32)
    adj1 = jnp.maximum(a1, a1.T)
    a2 = (jax.random.uniform(k_adj2, (N, N)) < 0.2).astype(jnp.float32)
    adj2 = jnp.maximum(a2, a2.T)

    params = init_params(k_params, ninput=N, nhid=NHID,
                         num_intermediate_layers=NUM_INTERMEDIATE)

    # one-time weight packing (hoisted out of the per-call path)
    packed = jax.tree_util.tree_map(jnp.asarray, prepare_params(params))

    fwd = jax.jit(gsage_close_forward)
    score = fwd(packed, adj1, adj2)
    jax.block_until_ready(score)

    ref = reference_forward(params, adj1, adj2)
    assert score.shape == (N, 1)
    assert jnp.all(jnp.isfinite(score))
    assert jnp.allclose(score, ref, rtol=1e-4, atol=1e-4), (
        "max abs diff vs reference: "
        + str(float(jnp.max(jnp.abs(score - ref)))))
    print("KERNEL_OK")
</pallas_src>

<mosaic_0001>
module attributes {stable_mosaic.version = 11 : i64} {
  func.func @fused_gsage_kernel(%arg0: memref<64x64xf32, #tpu.memory_space<vmem>>, %arg1: memref<64x64xf32, #tpu.memory_space<vmem>>, %arg2: memref<64x32xf32, #tpu.memory_space<vmem>>, %arg3: memref<6x64x32xf32, #tpu.memory_space<vmem>>, %arg4: memref<6x1x32xf32, #tpu.memory_space<vmem>>, %arg5: memref<64x32xf32, #tpu.memory_space<vmem>>, %arg6: memref<1x32xf32, #tpu.memory_space<vmem>>, %arg7: memref<32x64xf32, #tpu.memory_space<vmem>>, %arg8: memref<1x64xf32, #tpu.memory_space<vmem>>, %arg9: memref<64x64xf32, #tpu.memory_space<vmem>>, %arg10: memref<1x64xf32, #tpu.memory_space<vmem>>, %arg11: memref<64x1xf32, #tpu.memory_space<vmem>>, %arg12: memref<1x1xf32, #tpu.memory_space<vmem>>, %arg13: memref<64x1xf32, #tpu.memory_space<vmem>>) attributes {dimension_semantics = [], scalar_prefetch = 0 : i64, scratch_operands = 0 : i64, tpu.core_type = #tpu.core_type<tc>} {
    %c0 = arith.constant 0 : index
    %c0_0 = arith.constant 0 : index
    %0 = vector.load %arg1[%c0, %c0_0] : memref<64x64xf32, #tpu.memory_space<vmem>>, vector<64x64xf32>
    %c0_1 = arith.constant 0 : index
    %c0_2 = arith.constant 0 : index
    %1 = vector.load %arg0[%c0_1, %c0_2] : memref<64x64xf32, #tpu.memory_space<vmem>>, vector<64x64xf32>
    %c0_3 = arith.constant 0 : index
    %c0_4 = arith.constant 0 : index
    %2 = vector.load %arg2[%c0_3, %c0_4] : memref<64x32xf32, #tpu.memory_space<vmem>>, vector<64x32xf32>
    %cst = arith.constant dense<0.000000e+00> : vector<64x32xf32>
    %3 = tpu.matmul %1, %2, %cst {dimension_numbers = #tpu.dot_dimension_numbers<[1], [0], [0], [1], [0, 0, 1, 1], [], []>} : vector<64x64xf32>, vector<64x32xf32>, vector<64x32xf32> -> vector<64x32xf32>
    %cst_5 = arith.constant 0.000000e+00 : f32
    %4 = vector.broadcast %cst_5 : f32 to vector<64x32xf32>
    %5 = arith.maximumf %3, %4 : vector<64x32xf32>
    %6 = arith.mulf %5, %5 : vector<64x32xf32>
    %cst_6 = arith.constant dense<0.000000e+00> : vector<64xf32>
    %7 = vector.multi_reduction <add>, %6, %cst_6 [1] : vector<64x32xf32> to vector<64xf32>
    %8 = vector.shape_cast %7 : vector<64xf32> to vector<64x1xf32>
    %cst_7 = arith.constant 1.000000e-24 : f32
    %9 = vector.broadcast %cst_7 : f32 to vector<64x1xf32>
    %10 = arith.maximumf %8, %9 : vector<64x1xf32>
    %11 = math.rsqrt %10 : vector<64x1xf32>
    %12 = vector.broadcast %11 : vector<64x1xf32> to vector<64x32xf32>
    %13 = arith.mulf %5, %12 : vector<64x32xf32>
    %cst_8 = arith.constant dense<0.000000e+00> : vector<64x32xf32>
    %14 = tpu.matmul %0, %13, %cst_8 {dimension_numbers = #tpu.dot_dimension_numbers<[1], [0], [0], [1], [0, 0, 1, 1], [], []>} : vector<64x64xf32>, vector<64x32xf32>, vector<64x32xf32> -> vector<64x32xf32>
    %15 = tpu.concatenate %14, %13 in 1 : vector<64x32xf32>, vector<64x32xf32> -> vector<64x64xf32>
    %c0_9 = arith.constant 0 : index
    %c0_10 = arith.constant 0 : index
    %c0_11 = arith.constant 0 : index
    %16 = vector.load %arg3[%c0_9, %c0_10, %c0_11] : memref<6x64x32xf32, #tpu.memory_space<vmem>>, vector<1x64x32xf32>
    %17 = vector.shape_cast %16 : vector<1x64x32xf32> to vector<64x32xf32>
    %cst_12 = arith.constant dense<0.000000e+00> : vector<64x32xf32>
    %18 = tpu.matmul %15, %17, %cst_12 {dimension_numbers = #tpu.dot_dimension_numbers<[1], [0], [0], [1], [0, 0, 1, 1], [], []>} : vector<64x64xf32>, vector<64x32xf32>, vector<64x32xf32> -> vector<64x32xf32>
    %c0_13 = arith.constant 0 : index
    %c0_14 = arith.constant 0 : index
    %c0_15 = arith.constant 0 : index
    %19 = vector.load %arg4[%c0_13, %c0_14, %c0_15] : memref<6x1x32xf32, #tpu.memory_space<vmem>>, vector<1x1x32xf32>
    %20 = vector.shape_cast %19 : vector<1x1x32xf32> to vector<1x32xf32>
    %21 = vector.broadcast %20 : vector<1x32xf32> to vector<64x32xf32>
    %22 = arith.addf %18, %21 : vector<64x32xf32>
    %cst_16 = arith.constant 0.000000e+00 : f32
    %23 = vector.broadcast %cst_16 : f32 to vector<64x32xf32>
    %24 = arith.maximumf %22, %23 : vector<64x32xf32>
    %25 = arith.mulf %24, %24 : vector<64x32xf32>
    %cst_17 = arith.constant dense<0.000000e+00> : vector<64xf32>
    %26 = vector.multi_reduction <add>, %25, %cst_17 [1] : vector<64x32xf32> to vector<64xf32>
    %27 = vector.shape_cast %26 : vector<64xf32> to vector<64x1xf32>
    %cst_18 = arith.constant 1.000000e-24 : f32
    %28 = vector.broadcast %cst_18 : f32 to vector<64x1xf32>
    %29 = arith.maximumf %27, %28 : vector<64x1xf32>
    %30 = math.rsqrt %29 : vector<64x1xf32>
    %31 = vector.broadcast %30 : vector<64x1xf32> to vector<64x32xf32>
    %32 = arith.mulf %24, %31 : vector<64x32xf32>
    %c1 = arith.constant 1 : index
    %c0_19 = arith.constant 0 : index
    %c0_20 = arith.constant 0 : index
    %33 = vector.load %arg3[%c1, %c0_19, %c0_20] : memref<6x64x32xf32, #tpu.memory_space<vmem>>, vector<1x64x32xf32>
    %34 = vector.shape_cast %33 : vector<1x64x32xf32> to vector<64x32xf32>
    %cst_21 = arith.constant dense<0.000000e+00> : vector<64x32xf32>
    %35 = tpu.matmul %15, %34, %cst_21 {dimension_numbers = #tpu.dot_dimension_numbers<[1], [0], [0], [1], [0, 0, 1, 1], [], []>} : vector<64x64xf32>, vector<64x32xf32>, vector<64x32xf32> -> vector<64x32xf32>
    %c1_22 = arith.constant 1 : index
    %c0_23 = arith.constant 0 : index
    %c0_24 = arith.constant 0 : index
    %36 = vector.load %arg4[%c1_22, %c0_23, %c0_24] : memref<6x1x32xf32, #tpu.memory_space<vmem>>, vector<1x1x32xf32>
    %37 = vector.shape_cast %36 : vector<1x1x32xf32> to vector<1x32xf32>
    %38 = vector.broadcast %37 : vector<1x32xf32> to vector<64x32xf32>
    %39 = arith.addf %35, %38 : vector<64x32xf32>
    %cst_25 = arith.constant 0.000000e+00 : f32
    %40 = vector.broadcast %cst_25 : f32 to vector<64x32xf32>
    %41 = arith.maximumf %39, %40 : vector<64x32xf32>
    %42 = arith.mulf %41, %41 : vector<64x32xf32>
    %cst_26 = arith.constant dense<0.000000e+00> : vector<64xf32>
    %43 = vector.multi_reduction <add>, %42, %cst_26 [1] : vector<64x32xf32> to vector<64xf32>
    %44 = vector.shape_cast %43 : vector<64xf32> to vector<64x1xf32>
    %cst_27 = arith.constant 1.000000e-24 : f32
    %45 = vector.broadcast %cst_27 : f32 to vector<64x1xf32>
    %46 = arith.maximumf %44, %45 : vector<64x1xf32>
    %47 = math.rsqrt %46 : vector<64x1xf32>
    %48 = vector.broadcast %47 : vector<64x1xf32> to vector<64x32xf32>
    %49 = arith.mulf %41, %48 : vector<64x32xf32>
    %c2 = arith.constant 2 : index
    %c0_28 = arith.constant 0 : index
    %c0_29 = arith.constant 0 : index
    %50 = vector.load %arg3[%c2, %c0_28, %c0_29] : memref<6x64x32xf32, #tpu.memory_space<vmem>>, vector<1x64x32xf32>
    %51 = vector.shape_cast %50 : vector<1x64x32xf32> to vector<64x32xf32>
    %cst_30 = arith.constant dense<0.000000e+00> : vector<64x32xf32>
    %52 = tpu.matmul %15, %51, %cst_30 {dimension_numbers = #tpu.dot_dimension_numbers<[1], [0], [0], [1], [0, 0, 1, 1], [], []>} : vector<64x64xf32>, vector<64x32xf32>, vector<64x32xf32> -> vector<64x32xf32>
    %c2_31 = arith.constant 2 : index
    %c0_32 = arith.constant 0 : index
    %c0_33 = arith.constant 0 : index
    %53 = vector.load %arg4[%c2_31, %c0_32, %c0_33] : memref<6x1x32xf32, #tpu.memory_space<vmem>>, vector<1x1x32xf32>
    %54 = vector.shape_cast %53 : vector<1x1x32xf32> to vector<1x32xf32>
    %55 = vector.broadcast %54 : vector<1x32xf32> to vector<64x32xf32>
    %56 = arith.addf %52, %55 : vector<64x32xf32>
    %cst_34 = arith.constant 0.000000e+00 : f32
    %57 = vector.broadcast %cst_34 : f32 to vector<64x32xf32>
    %58 = arith.maximumf %56, %57 : vector<64x32xf32>
    %59 = arith.mulf %58, %58 : vector<64x32xf32>
    %cst_35 = arith.constant dense<0.000000e+00> : vector<64xf32>
    %60 = vector.multi_reduction <add>, %59, %cst_35 [1] : vector<64x32xf32> to vector<64xf32>
    %61 = vector.shape_cast %60 : vector<64xf32> to vector<64x1xf32>
    %cst_36 = arith.constant 1.000000e-24 : f32
    %62 = vector.broadcast %cst_36 : f32 to vector<64x1xf32>
    %63 = arith.maximumf %61, %62 : vector<64x1xf32>
    %64 = math.rsqrt %63 : vector<64x1xf32>
    %65 = vector.broadcast %64 : vector<64x1xf32> to vector<64x32xf32>
    %66 = arith.mulf %58, %65 : vector<64x32xf32>
    %c3 = arith.constant 3 : index
    %c0_37 = arith.constant 0 : index
    %c0_38 = arith.constant 0 : index
    %67 = vector.load %arg3[%c3, %c0_37, %c0_38] : memref<6x64x32xf32, #tpu.memory_space<vmem>>, vector<1x64x32xf32>
    %68 = vector.shape_cast %67 : vector<1x64x32xf32> to vector<64x32xf32>
    %cst_39 = arith.constant dense<0.000000e+00> : vector<64x32xf32>
    %69 = tpu.matmul %15, %68, %cst_39 {dimension_numbers = #tpu.dot_dimension_numbers<[1], [0], [0], [1], [0, 0, 1, 1], [], []>} : vector<64x64xf32>, vector<64x32xf32>, vector<64x32xf32> -> vector<64x32xf32>
    %c3_40 = arith.constant 3 : index
    %c0_41 = arith.constant 0 : index
    %c0_42 = arith.constant 0 : index
    %70 = vector.load %arg4[%c3_40, %c0_41, %c0_42] : memref<6x1x32xf32, #tpu.memory_space<vmem>>, vector<1x1x32xf32>
    %71 = vector.shape_cast %70 : vector<1x1x32xf32> to vector<1x32xf32>
    %72 = vector.broadcast %71 : vector<1x32xf32> to vector<64x32xf32>
    %73 = arith.addf %69, %72 : vector<64x32xf32>
    %cst_43 = arith.constant 0.000000e+00 : f32
    %74 = vector.broadcast %cst_43 : f32 to vector<64x32xf32>
    %75 = arith.maximumf %73, %74 : vector<64x32xf32>
    %76 = arith.mulf %75, %75 : vector<64x32xf32>
    %cst_44 = arith.constant dense<0.000000e+00> : vector<64xf32>
    %77 = vector.multi_reduction <add>, %76, %cst_44 [1] : vector<64x32xf32> to vector<64xf32>
    %78 = vector.shape_cast %77 : vector<64xf32> to vector<64x1xf32>
    %cst_45 = arith.constant 1.000000e-24 : f32
    %79 = vector.broadcast %cst_45 : f32 to vector<64x1xf32>
    %80 = arith.maximumf %78, %79 : vector<64x1xf32>
    %81 = math.rsqrt %80 : vector<64x1xf32>
    %82 = vector.broadcast %81 : vector<64x1xf32> to vector<64x32xf32>
    %83 = arith.mulf %75, %82 : vector<64x32xf32>
    %c4 = arith.constant 4 : index
    %c0_46 = arith.constant 0 : index
    %c0_47 = arith.constant 0 : index
    %84 = vector.load %arg3[%c4, %c0_46, %c0_47] : memref<6x64x32xf32, #tpu.memory_space<vmem>>, vector<1x64x32xf32>
    %85 = vector.shape_cast %84 : vector<1x64x32xf32> to vector<64x32xf32>
    %cst_48 = arith.constant dense<0.000000e+00> : vector<64x32xf32>
    %86 = tpu.matmul %15, %85, %cst_48 {dimension_numbers = #tpu.dot_dimension_numbers<[1], [0], [0], [1], [0, 0, 1, 1], [], []>} : vector<64x64xf32>, vector<64x32xf32>, vector<64x32xf32> -> vector<64x32xf32>
    %c4_49 = arith.constant 4 : index
    %c0_50 = arith.constant 0 : index
    %c0_51 = arith.constant 0 : index
    %87 = vector.load %arg4[%c4_49, %c0_50, %c0_51] : memref<6x1x32xf32, #tpu.memory_space<vmem>>, vector<1x1x32xf32>
    %88 = vector.shape_cast %87 : vector<1x1x32xf32> to vector<1x32xf32>
    %89 = vector.broadcast %88 : vector<1x32xf32> to vector<64x32xf32>
    %90 = arith.addf %86, %89 : vector<64x32xf32>
    %cst_52 = arith.constant 0.000000e+00 : f32
    %91 = vector.broadcast %cst_52 : f32 to vector<64x32xf32>
    %92 = arith.maximumf %90, %91 : vector<64x32xf32>
    %93 = arith.mulf %92, %92 : vector<64x32xf32>
    %cst_53 = arith.constant dense<0.000000e+00> : vector<64xf32>
    %94 = vector.multi_reduction <add>, %93, %cst_53 [1] : vector<64x32xf32> to vector<64xf32>
    %95 = vector.shape_cast %94 : vector<64xf32> to vector<64x1xf32>
    %cst_54 = arith.constant 1.000000e-24 : f32
    %96 = vector.broadcast %cst_54 : f32 to vector<64x1xf32>
    %97 = arith.maximumf %95, %96 : vector<64x1xf32>
    %98 = math.rsqrt %97 : vector<64x1xf32>
    %99 = vector.broadcast %98 : vector<64x1xf32> to vector<64x32xf32>
    %100 = arith.mulf %92, %99 : vector<64x32xf32>
    %c5 = arith.constant 5 : index
    %c0_55 = arith.constant 0 : index
    %c0_56 = arith.constant 0 : index
    %101 = vector.load %arg3[%c5, %c0_55, %c0_56] : memref<6x64x32xf32, #tpu.memory_space<vmem>>, vector<1x64x32xf32>
    %102 = vector.shape_cast %101 : vector<1x64x32xf32> to vector<64x32xf32>
    %cst_57 = arith.constant dense<0.000000e+00> : vector<64x32xf32>
    %103 = tpu.matmul %15, %102, %cst_57 {dimension_numbers = #tpu.dot_dimension_numbers<[1], [0], [0], [1], [0, 0, 1, 1], [], []>} : vector<64x64xf32>, vector<64x32xf32>, vector<64x32xf32> -> vector<64x32xf32>
    %c5_58 = arith.constant 5 : index
    %c0_59 = arith.constant 0 : index
    %c0_60 = arith.constant 0 : index
    %104 = vector.load %arg4[%c5_58, %c0_59, %c0_60] : memref<6x1x32xf32, #tpu.memory_space<vmem>>, vector<1x1x32xf32>
    %105 = vector.shape_cast %104 : vector<1x1x32xf32> to vector<1x32xf32>
    %106 = vector.broadcast %105 : vector<1x32xf32> to vector<64x32xf32>
    %107 = arith.addf %103, %106 : vector<64x32xf32>
    %cst_61 = arith.constant 0.000000e+00 : f32
    %108 = vector.broadcast %cst_61 : f32 to vector<64x32xf32>
    %109 = arith.maximumf %107, %108 : vector<64x32xf32>
    %110 = arith.mulf %109, %109 : vector<64x32xf32>
    %cst_62 = arith.constant dense<0.000000e+00> : vector<64xf32>
    %111 = vector.multi_reduction <add>, %110, %cst_62 [1] : vector<64x32xf32> to vector<64xf32>
    %112 = vector.shape_cast %111 : vector<64xf32> to vector<64x1xf32>
    %cst_63 = arith.constant 1.000000e-24 : f32
    %113 = vector.broadcast %cst_63 : f32 to vector<64x1xf32>
    %114 = arith.maximumf %112, %113 : vector<64x1xf32>
    %115 = math.rsqrt %114 : vector<64x1xf32>
    %116 = vector.broadcast %115 : vector<64x1xf32> to vector<64x32xf32>
    %117 = arith.mulf %109, %116 : vector<64x32xf32>
    %cst_64 = arith.constant dense<0.000000e+00> : vector<64x32xf32>
    %118 = tpu.matmul %0, %32, %cst_64 {dimension_numbers = #tpu.dot_dimension_numbers<[1], [0], [0], [1], [0, 0, 1, 1], [], []>} : vector<64x64xf32>, vector<64x32xf32>, vector<64x32xf32> -> vector<64x32xf32>
    %119 = tpu.concatenate %118, %32 in 1 : vector<64x32xf32>, vector<64x32xf32> -> vector<64x64xf32>
    %c1_65 = arith.constant 1 : index
    %c0_66 = arith.constant 0 : index
    %c0_67 = arith.constant 0 : index
    %120 = vector.load %arg3[%c1_65, %c0_66, %c0_67] : memref<6x64x32xf32, #tpu.memory_space<vmem>>, vector<1x64x32xf32>
    %121 = vector.shape_cast %120 : vector<1x64x32xf32> to vector<64x32xf32>
    %cst_68 = arith.constant dense<0.000000e+00> : vector<64x32xf32>
    %122 = tpu.matmul %119, %121, %cst_68 {dimension_numbers = #tpu.dot_dimension_numbers<[1], [0], [0], [1], [0, 0, 1, 1], [], []>} : vector<64x64xf32>, vector<64x32xf32>, vector<64x32xf32> -> vector<64x32xf32>
    %c1_69 = arith.constant 1 : index
    %c0_70 = arith.constant 0 : index
    %c0_71 = arith.constant 0 : index
    %123 = vector.load %arg4[%c1_69, %c0_70, %c0_71] : memref<6x1x32xf32, #tpu.memory_space<vmem>>, vector<1x1x32xf32>
    %124 = vector.shape_cast %123 : vector<1x1x32xf32> to vector<1x32xf32>
    %125 = vector.broadcast %124 : vector<1x32xf32> to vector<64x32xf32>
    %126 = arith.addf %122, %125 : vector<64x32xf32>
    %cst_72 = arith.constant 0.000000e+00 : f32
    %127 = vector.broadcast %cst_72 : f32 to vector<64x32xf32>
    %128 = arith.maximumf %126, %127 : vector<64x32xf32>
    %129 = arith.mulf %128, %128 : vector<64x32xf32>
    %cst_73 = arith.constant dense<0.000000e+00> : vector<64xf32>
    %130 = vector.multi_reduction <add>, %129, %cst_73 [1] : vector<64x32xf32> to vector<64xf32>
    %131 = vector.shape_cast %130 : vector<64xf32> to vector<64x1xf32>
    %cst_74 = arith.constant 1.000000e-24 : f32
    %132 = vector.broadcast %cst_74 : f32 to vector<64x1xf32>
    %133 = arith.maximumf %131, %132 : vector<64x1xf32>
    %134 = math.rsqrt %133 : vector<64x1xf32>
    %135 = vector.broadcast %134 : vector<64x1xf32> to vector<64x32xf32>
    %136 = arith.mulf %128, %135 : vector<64x32xf32>
    %cst_75 = arith.constant dense<0.000000e+00> : vector<64x32xf32>
    %137 = tpu.matmul %0, %136, %cst_75 {dimension_numbers = #tpu.dot_dimension_numbers<[1], [0], [0], [1], [0, 0, 1, 1], [], []>} : vector<64x64xf32>, vector<64x32xf32>, vector<64x32xf32> -> vector<64x32xf32>
    %138 = tpu.concatenate %137, %136 in 1 : vector<64x32xf32>, vector<64x32xf32> -> vector<64x64xf32>
    %c2_76 = arith.constant 2 : index
    %c0_77 = arith.constant 0 : index
    %c0_78 = arith.constant 0 : index
    %139 = vector.load %arg3[%c2_76, %c0_77, %c0_78] : memref<6x64x32xf32, #tpu.memory_space<vmem>>, vector<1x64x32xf32>
    %140 = vector.shape_cast %139 : vector<1x64x32xf32> to vector<64x32xf32>
    %cst_79 = arith.constant dense<0.000000e+00> : vector<64x32xf32>
    %141 = tpu.matmul %138, %140, %cst_79 {dimension_numbers = #tpu.dot_dimension_numbers<[1], [0], [0], [1], [0, 0, 1, 1], [], []>} : vector<64x64xf32>, vector<64x32xf32>, vector<64x32xf32> -> vector<64x32xf32>
    %c2_80 = arith.constant 2 : index
    %c0_81 = arith.constant 0 : index
    %c0_82 = arith.constant 0 : index
    %142 = vector.load %arg4[%c2_80, %c0_81, %c0_82] : memref<6x1x32xf32, #tpu.memory_space<vmem>>, vector<1x1x32xf32>
    %143 = vector.shape_cast %142 : vector<1x1x32xf32> to vector<1x32xf32>
    %144 = vector.broadcast %143 : vector<1x32xf32> to vector<64x32xf32>
    %145 = arith.addf %141, %144 : vector<64x32xf32>
    %cst_83 = arith.constant 0.000000e+00 : f32
    %146 = vector.broadcast %cst_83 : f32 to vector<64x32xf32>
    %147 = arith.maximumf %145, %146 : vector<64x32xf32>
    %148 = arith.mulf %147, %147 : vector<64x32xf32>
    %cst_84 = arith.constant dense<0.000000e+00> : vector<64xf32>
    %149 = vector.multi_reduction <add>, %148, %cst_84 [1] : vector<64x32xf32> to vector<64xf32>
    %150 = vector.shape_cast %149 : vector<64xf32> to vector<64x1xf32>
    %cst_85 = arith.constant 1.000000e-24 : f32
    %151 = vector.broadcast %cst_85 : f32 to vector<64x1xf32>
    %152 = arith.maximumf %150, %151 : vector<64x1xf32>
    %153 = math.rsqrt %152 : vector<64x1xf32>
    %154 = vector.broadcast %153 : vector<64x1xf32> to vector<64x32xf32>
    %155 = arith.mulf %147, %154 : vector<64x32xf32>
    %cst_86 = arith.constant dense<0.000000e+00> : vector<64x32xf32>
    %156 = tpu.matmul %0, %155, %cst_86 {dimension_numbers = #tpu.dot_dimension_numbers<[1], [0], [0], [1], [0, 0, 1, 1], [], []>} : vector<64x64xf32>, vector<64x32xf32>, vector<64x32xf32> -> vector<64x32xf32>
    %157 = tpu.concatenate %156, %155 in 1 : vector<64x32xf32>, vector<64x32xf32> -> vector<64x64xf32>
    %c3_87 = arith.constant 3 : index
    %c0_88 = arith.constant 0 : index
    %c0_89 = arith.constant 0 : index
    %158 = vector.load %arg3[%c3_87, %c0_88, %c0_89] : memref<6x64x32xf32, #tpu.memory_space<vmem>>, vector<1x64x32xf32>
    %159 = vector.shape_cast %158 : vector<1x64x32xf32> to vector<64x32xf32>
    %cst_90 = arith.constant dense<0.000000e+00> : vector<64x32xf32>
    %160 = tpu.matmul %157, %159, %cst_90 {dimension_numbers = #tpu.dot_dimension_numbers<[1], [0], [0], [1], [0, 0, 1, 1], [], []>} : vector<64x64xf32>, vector<64x32xf32>, vector<64x32xf32> -> vector<64x32xf32>
    %c3_91 = arith.constant 3 : index
    %c0_92 = arith.constant 0 : index
    %c0_93 = arith.constant 0 : index
    %161 = vector.load %arg4[%c3_91, %c0_92, %c0_93] : memref<6x1x32xf32, #tpu.memory_space<vmem>>, vector<1x1x32xf32>
    %162 = vector.shape_cast %161 : vector<1x1x32xf32> to vector<1x32xf32>
    %163 = vector.broadcast %162 : vector<1x32xf32> to vector<64x32xf32>
    %164 = arith.addf %160, %163 : vector<64x32xf32>
    %cst_94 = arith.constant 0.000000e+00 : f32
    %165 = vector.broadcast %cst_94 : f32 to vector<64x32xf32>
    %166 = arith.maximumf %164, %165 : vector<64x32xf32>
    %167 = arith.mulf %166, %166 : vector<64x32xf32>
    %cst_95 = arith.constant dense<0.000000e+00> : vector<64xf32>
    %168 = vector.multi_reduction <add>, %167, %cst_95 [1] : vector<64x32xf32> to vector<64xf32>
    %169 = vector.shape_cast %168 : vector<64xf32> to vector<64x1xf32>
    %cst_96 = arith.constant 1.000000e-24 : f32
    %170 = vector.broadcast %cst_96 : f32 to vector<64x1xf32>
    %171 = arith.maximumf %169, %170 : vector<64x1xf32>
    %172 = math.rsqrt %171 : vector<64x1xf32>
    %173 = vector.broadcast %172 : vector<64x1xf32> to vector<64x32xf32>
    %174 = arith.mulf %166, %173 : vector<64x32xf32>
    %cst_97 = arith.constant dense<0.000000e+00> : vector<64x32xf32>
    %175 = tpu.matmul %0, %174, %cst_97 {dimension_numbers = #tpu.dot_dimension_numbers<[1], [0], [0], [1], [0, 0, 1, 1], [], []>} : vector<64x64xf32>, vector<64x32xf32>, vector<64x32xf32> -> vector<64x32xf32>
    %176 = tpu.concatenate %175, %174 in 1 : vector<64x32xf32>, vector<64x32xf32> -> vector<64x64xf32>
    %c4_98 = arith.constant 4 : index
    %c0_99 = arith.constant 0 : index
    %c0_100 = arith.constant 0 : index
    %177 = vector.load %arg3[%c4_98, %c0_99, %c0_100] : memref<6x64x32xf32, #tpu.memory_space<vmem>>, vector<1x64x32xf32>
    %178 = vector.shape_cast %177 : vector<1x64x32xf32> to vector<64x32xf32>
    %cst_101 = arith.constant dense<0.000000e+00> : vector<64x32xf32>
    %179 = tpu.matmul %176, %178, %cst_101 {dimension_numbers = #tpu.dot_dimension_numbers<[1], [0], [0], [1], [0, 0, 1, 1], [], []>} : vector<64x64xf32>, vector<64x32xf32>, vector<64x32xf32> -> vector<64x32xf32>
    %c4_102 = arith.constant 4 : index
    %c0_103 = arith.constant 0 : index
    %c0_104 = arith.constant 0 : index
    %180 = vector.load %arg4[%c4_102, %c0_103, %c0_104] : memref<6x1x32xf32, #tpu.memory_space<vmem>>, vector<1x1x32xf32>
    %181 = vector.shape_cast %180 : vector<1x1x32xf32> to vector<1x32xf32>
    %182 = vector.broadcast %181 : vector<1x32xf32> to vector<64x32xf32>
    %183 = arith.addf %179, %182 : vector<64x32xf32>
    %cst_105 = arith.constant 0.000000e+00 : f32
    %184 = vector.broadcast %cst_105 : f32 to vector<64x32xf32>
    %185 = arith.maximumf %183, %184 : vector<64x32xf32>
    %186 = arith.mulf %185, %185 : vector<64x32xf32>
    %cst_106 = arith.constant dense<0.000000e+00> : vector<64xf32>
    %187 = vector.multi_reduction <add>, %186, %cst_106 [1] : vector<64x32xf32> to vector<64xf32>
    %188 = vector.shape_cast %187 : vector<64xf32> to vector<64x1xf32>
    %cst_107 = arith.constant 1.000000e-24 : f32
    %189 = vector.broadcast %cst_107 : f32 to vector<64x1xf32>
    %190 = arith.maximumf %188, %189 : vector<64x1xf32>
    %191 = math.rsqrt %190 : vector<64x1xf32>
    %192 = vector.broadcast %191 : vector<64x1xf32> to vector<64x32xf32>
    %193 = arith.mulf %185, %192 : vector<64x32xf32>
    %cst_108 = arith.constant dense<0.000000e+00> : vector<64x32xf32>
    %194 = tpu.matmul %0, %193, %cst_108 {dimension_numbers = #tpu.dot_dimension_numbers<[1], [0], [0], [1], [0, 0, 1, 1], [], []>} : vector<64x64xf32>, vector<64x32xf32>, vector<64x32xf32> -> vector<64x32xf32>
    %195 = tpu.concatenate %194, %193 in 1 : vector<64x32xf32>, vector<64x32xf32> -> vector<64x64xf32>
    %c5_109 = arith.constant 5 : index
    %c0_110 = arith.constant 0 : index
    %c0_111 = arith.constant 0 : index
    %196 = vector.load %arg3[%c5_109, %c0_110, %c0_111] : memref<6x64x32xf32, #tpu.memory_space<vmem>>, vector<1x64x32xf32>
    %197 = vector.shape_cast %196 : vector<1x64x32xf32> to vector<64x32xf32>
    %cst_112 = arith.constant dense<0.000000e+00> : vector<64x32xf32>
    %198 = tpu.matmul %195, %197, %cst_112 {dimension_numbers = #tpu.dot_dimension_numbers<[1], [0], [0], [1], [0, 0, 1, 1], [], []>} : vector<64x64xf32>, vector<64x32xf32>, vector<64x32xf32> -> vector<64x32xf32>
    %c5_113 = arith.constant 5 : index
    %c0_114 = arith.constant 0 : index
    %c0_115 = arith.constant 0 : index
    %199 = vector.load %arg4[%c5_113, %c0_114, %c0_115] : memref<6x1x32xf32, #tpu.memory_space<vmem>>, vector<1x1x32xf32>
    %200 = vector.shape_cast %199 : vector<1x1x32xf32> to vector<1x32xf32>
    %201 = vector.broadcast %200 : vector<1x32xf32> to vector<64x32xf32>
    %202 = arith.addf %198, %201 : vector<64x32xf32>
    %cst_116 = arith.constant 0.000000e+00 : f32
    %203 = vector.broadcast %cst_116 : f32 to vector<64x32xf32>
    %204 = arith.maximumf %202, %203 : vector<64x32xf32>
    %205 = arith.mulf %204, %204 : vector<64x32xf32>
    %cst_117 = arith.constant dense<0.000000e+00> : vector<64xf32>
    %206 = vector.multi_reduction <add>, %205, %cst_117 [1] : vector<64x32xf32> to vector<64xf32>
    %207 = vector.shape_cast %206 : vector<64xf32> to vector<64x1xf32>
    %cst_118 = arith.constant 1.000000e-24 : f32
    %208 = vector.broadcast %cst_118 : f32 to vector<64x1xf32>
    %209 = arith.maximumf %207, %208 : vector<64x1xf32>
    %210 = math.rsqrt %209 : vector<64x1xf32>
    %211 = vector.broadcast %210 : vector<64x1xf32> to vector<64x32xf32>
    %212 = arith.mulf %204, %211 : vector<64x32xf32>
    %cst_119 = arith.constant dense<0.000000e+00> : vector<64x32xf32>
    %213 = tpu.matmul %0, %212, %cst_119 {dimension_numbers = #tpu.dot_dimension_numbers<[1], [0], [0], [1], [0, 0, 1, 1], [], []>} : vector<64x64xf32>, vector<64x32xf32>, vector<64x32xf32> -> vector<64x32xf32>
    %214 = tpu.concatenate %213, %212 in 1 : vector<64x32xf32>, vector<64x32xf32> -> vector<64x64xf32>
    %c0_120 = arith.constant 0 : index
    %c0_121 = arith.constant 0 : index
    %215 = vector.load %arg5[%c0_120, %c0_121] : memref<64x32xf32, #tpu.memory_space<vmem>>, vector<64x32xf32>
    %cst_122 = arith.constant dense<0.000000e+00> : vector<64x32xf32>
    %216 = tpu.matmul %214, %215, %cst_122 {dimension_numbers = #tpu.dot_dimension_numbers<[1], [0], [0], [1], [0, 0, 1, 1], [], []>} : vector<64x64xf32>, vector<64x32xf32>, vector<64x32xf32> -> vector<64x32xf32>
    %c0_123 = arith.constant 0 : index
    %c0_124 = arith.constant 0 : index
    %217 = vector.load %arg6[%c0_123, %c0_124] : memref<1x32xf32, #tpu.memory_space<vmem>>, vector<1x32xf32>
    %218 = vector.broadcast %217 : vector<1x32xf32> to vector<64x32xf32>
    %219 = arith.addf %216, %218 : vector<64x32xf32>
    %cst_125 = arith.constant 0.000000e+00 : f32
    %220 = vector.broadcast %cst_125 : f32 to vector<64x32xf32>
    %221 = arith.maximumf %219, %220 : vector<64x32xf32>
    %222 = tpu.concatenate %13, %221, %32, %49, %66, %83, %100, %117 in 0 : vector<64x32xf32>, vector<64x32xf32>, vector<64x32xf32>, vector<64x32xf32>, vector<64x32xf32>, vector<64x32xf32>, vector<64x32xf32>, vector<64x32xf32> -> vector<512x32xf32>
    %c0_126 = arith.constant 0 : index
    %c0_127 = arith.constant 0 : index
    %223 = vector.load %arg7[%c0_126, %c0_127] : memref<32x64xf32, #tpu.memory_space<vmem>>, vector<32x64xf32>
    %cst_128 = arith.constant dense<0.000000e+00> : vector<512x64xf32>
    %224 = tpu.matmul %222, %223, %cst_128 {dimension_numbers = #tpu.dot_dimension_numbers<[1], [0], [0], [1], [0, 0, 1, 1], [], []>} : vector<512x32xf32>, vector<32x64xf32>, vector<512x64xf32> -> vector<512x64xf32>
    %c0_129 = arith.constant 0 : index
    %c0_130 = arith.constant 0 : index
    %225 = vector.load %arg8[%c0_129, %c0_130] : memref<1x64xf32, #tpu.memory_space<vmem>>, vector<1x64xf32>
    %226 = vector.broadcast %225 : vector<1x64xf32> to vector<512x64xf32>
    %227 = arith.addf %224, %226 : vector<512x64xf32>
    %cst_131 = arith.constant 0.000000e+00 : f32
    %228 = vector.broadcast %cst_131 : f32 to vector<512x64xf32>
    %229 = arith.maximumf %227, %228 : vector<512x64xf32>
    %c0_132 = arith.constant 0 : index
    %c0_133 = arith.constant 0 : index
    %230 = vector.load %arg9[%c0_132, %c0_133] : memref<64x64xf32, #tpu.memory_space<vmem>>, vector<64x64xf32>
    %cst_134 = arith.constant dense<0.000000e+00> : vector<512x64xf32>
    %231 = tpu.matmul %229, %230, %cst_134 {dimension_numbers = #tpu.dot_dimension_numbers<[1], [0], [0], [1], [0, 0, 1, 1], [], []>} : vector<512x64xf32>, vector<64x64xf32>, vector<512x64xf32> -> vector<512x64xf32>
    %c0_135 = arith.constant 0 : index
    %c0_136 = arith.constant 0 : index
    %232 = vector.load %arg10[%c0_135, %c0_136] : memref<1x64xf32, #tpu.memory_space<vmem>>, vector<1x64xf32>
    %233 = vector.broadcast %232 : vector<1x64xf32> to vector<512x64xf32>
    %234 = arith.addf %231, %233 : vector<512x64xf32>
    %cst_137 = arith.constant 0.000000e+00 : f32
    %235 = vector.broadcast %cst_137 : f32 to vector<512x64xf32>
    %236 = arith.maximumf %234, %235 : vector<512x64xf32>
    %c0_138 = arith.constant 0 : index
    %c0_139 = arith.constant 0 : index
    %237 = vector.load %arg11[%c0_138, %c0_139] : memref<64x1xf32, #tpu.memory_space<vmem>>, vector<64x1xf32>
    %cst_140 = arith.constant dense<0.000000e+00> : vector<512x1xf32>
    %238 = tpu.matmul %236, %237, %cst_140 {dimension_numbers = #tpu.dot_dimension_numbers<[1], [0], [0], [1], [0, 0, 1, 1], [], []>} : vector<512x64xf32>, vector<64x1xf32>, vector<512x1xf32> -> vector<512x1xf32>
    %c0_141 = arith.constant 0 : index
    %c0_142 = arith.constant 0 : index
    %239 = vector.load %arg12[%c0_141, %c0_142] : memref<1x1xf32, #tpu.memory_space<vmem>>, vector<1x1xf32>
    %240 = vector.broadcast %239 : vector<1x1xf32> to vector<512x1xf32>
    %241 = arith.addf %238, %240 : vector<512x1xf32>
    %242 = vector.extract_strided_slice %241 {offsets = [0, 0], sizes = [64, 1], strides = [1, 1]} : vector<512x1xf32> to vector<64x1xf32>
    %243 = vector.extract_strided_slice %241 {offsets = [64, 0], sizes = [64, 1], strides = [1, 1]} : vector<512x1xf32> to vector<64x1xf32>
    %244 = arith.addf %242, %243 : vector<64x1xf32>
    %245 = vector.extract_strided_slice %241 {offsets = [128, 0], sizes = [64, 1], strides = [1, 1]} : vector<512x1xf32> to vector<64x1xf32>
    %246 = arith.addf %244, %245 : vector<64x1xf32>
    %247 = vector.extract_strided_slice %241 {offsets = [192, 0], sizes = [64, 1], strides = [1, 1]} : vector<512x1xf32> to vector<64x1xf32>
    %248 = arith.addf %246, %247 : vector<64x1xf32>
    %249 = vector.extract_strided_slice %241 {offsets = [256, 0], sizes = [64, 1], strides = [1, 1]} : vector<512x1xf32> to vector<64x1xf32>
    %250 = arith.addf %248, %249 : vector<64x1xf32>
    %251 = vector.extract_strided_slice %241 {offsets = [320, 0], sizes = [64, 1], strides = [1, 1]} : vector<512x1xf32> to vector<64x1xf32>
    %252 = arith.addf %250, %251 : vector<64x1xf32>
    %253 = vector.extract_strided_slice %241 {offsets = [384, 0], sizes = [64, 1], strides = [1, 1]} : vector<512x1xf32> to vector<64x1xf32>
    %254 = arith.addf %252, %253 : vector<64x1xf32>
    %255 = vector.extract_strided_slice %241 {offsets = [448, 0], sizes = [64, 1], strides = [1, 1]} : vector<512x1xf32> to vector<64x1xf32>
    %256 = arith.addf %254, %255 : vector<64x1xf32>
    %c0_143 = arith.constant 0 : index
    %c0_144 = arith.constant 0 : index
    %257 = vector.load %arg13[%c0_143, %c0_144] : memref<64x1xf32, #tpu.memory_space<vmem>>, vector<64x1xf32>
    tpu.vector_store %arg13[%c0_143, %c0_144], %256 {strides = array<i32>} : memref<64x1xf32, #tpu.memory_space<vmem>>, vector<64x1xf32>,
    return
  }
}

</mosaic_0001>

<bundles_post_ra>
// kernel: gsage_close_forward.1
= control target key start
LH: loop header
LB: loop body
LE: loop exit
PB: predicated region body
PF: predicated region fallthrough
CT: control target
= control target key end

     0   :  { %vm70_vm0 = vcmask 523264   ;;  %vm216_vm1 = vcmask 261120   ;;  %s8027_s23 = smov 32   ;;  %vm5499_vm2 = vcmask 7168   ;;  %s10384_s2 = inlined_call_operand.vmem [shape: f32[64,32], index: 2, kind: input, shape index: {}]   ;;  %s10385_s0 = inlined_call_operand.vmem [shape: f32[64,64], index: 0, kind: input, shape index: {}]   ;;  %s10386_s1 = inlined_call_operand.vmem [shape: f32[64,64], index: 1, kind: input, shape index: {}]   ;;  %s10387_s3 = inlined_call_operand.vmem [shape: f32[6,64,32], index: 3, kind: input, shape index: {}]   ;;  %s10388_s4 = inlined_call_operand.vmem [shape: f32[6,1,32], index: 4, kind: input, shape index: {}]   ;;  %s10389_s7 = inlined_call_operand.vmem [shape: f32[32,64], index: 7, kind: input, shape index: {}]   ;;  %s10390_s5 = inlined_call_operand.vmem [shape: f32[64,32], index: 5, kind: input, shape index: {}]   ;;  %s10391_s9 = inlined_call_operand.vmem [shape: f32[64,64], index: 9, kind: input, shape index: {}]   ;;  %s10392_s8 = inlined_call_operand.vmem [shape: f32[1,64], index: 8, kind: input, shape index: {}]   ;;  %s10393_s11 = inlined_call_operand.vmem [shape: f32[64,1], index: 11, kind: input, shape index: {}]   ;;  %s10394_s6 = inlined_call_operand.vmem [shape: f32[1,32], index: 6, kind: input, shape index: {}]   ;;  %s10395_s10 = inlined_call_operand.vmem [shape: f32[1,64], index: 10, kind: input, shape index: {}]   ;;  %s10396_s12 = inlined_call_operand.<no memory space> [shape: f32[1,1], index: 12, kind: input, shape index: {}]   ;;  %s10397_s13 = inlined_call_operand.vmem [shape: f32[64,1], index: 13, kind: output, shape index: {}]  }
   0x1   :  { %v62_v0 = vld [vmem:[%s10384_s2] sm:$0xff]  ;;  %v63_v1 = vld [vmem:[%s10384_s2 + $0x8] sm:$0xff]  ;;  %v64_v2 = vld [vmem:[%s10384_s2 + $0x10] sm:$0xff] }
   0x2   :  { %v7339_v3 = vpack.c.bf16 %v63_v1, %v62_v0  ;;  %v65_v4 = vld [vmem:[%s10384_s2 + $0x18] sm:$0xff]  ;;  %v66_v6 = vld [vmem:[%s10384_s2 + $0x20] sm:$0xff]  ;;  %v67_v7 = vld [vmem:[%s10384_s2 + $0x28] sm:$0xff] }
   0x3   :  { %v7343_v5 = vpack.c.bf16 %v65_v4, %v64_v2  ;;  %v54_v8 = vld [vmem:[%s10385_s0] sm:$0xff]  ;;  %v7347_v9 = vpack.c.bf16 %v67_v7, %v66_v6  ;;  %v68_v10 = vld [vmem:[%s10384_s2 + $0x30] sm:$0xff]  ;;  %v69_v11 = vld [vmem:[%s10384_s2 + $0x38] sm:$0xff] }
   0x4   :  { %7340 = vmatprep.subr.bf16.mxu0 %v7339_v3  ;;  %6467 = vmatprep.mubr.msk.f32.mxu0 %vm70_vm0, %v54_v8  ;;  %v7351_v12 = vpack.c.bf16 %v69_v11, %v68_v10  ;;  %v55_v13 = vld [vmem:[%s10385_s0 + $0x8] sm:$0xff]  ;;  %v56_v14 = vld [vmem:[%s10385_s0 + $0x10] sm:$0xff]  ;;  %v57_v15 = vld [vmem:[%s10385_s0 + $0x18] sm:$0xff] }
   0x5   :  { %7342 = vmatpush3.bf16.msra.mxu0 %v7339_v3  ;;  %v58_v16 = vld [vmem:[%s10385_s0 + $0x20] sm:$0xff]  ;;  %v59_v17 = vld [vmem:[%s10385_s0 + $0x28] sm:$0xff]  ;;  %v60_v18 = vld [vmem:[%s10385_s0 + $0x30] sm:$0xff] }
   0x6   :  { %7344 = vmatprep.subr.bf16.mxu0 %v7343_v5  ;;  %v61_v19 = vld [vmem:[%s10385_s0 + $0x38] sm:$0xff]  ;;  %v8193_v52 = vld [vmem:[%s10386_s1] sm:$0xff] }
   0x7   :  { %6495 = vmatprep.mubr.msk.f32.mxu1 %vm70_vm0, %v8193_v52 }
   0x9   :  { %7346 = vmatpush3.bf16.msra.mxu0 %v7343_v5 }
   0xa   :  { %7348 = vmatprep.subr.bf16.mxu0 %v7347_v9 }
   0xd   :  { %7350 = vmatpush3.bf16.msra.mxu0 %v7347_v9 }
   0xe   :  { %7352 = vmatprep.subr.bf16.mxu0 %v7351_v12 }
  0x11   :  { %7354 = vmatpush3.bf16.msra.mxu0 %v7351_v12 }
  0x14   :  { %6468 = vmatmul.mubr.msk.f32.vlgmr.msra.gmra.mrb[0].mxu0 %vm70_vm0, %v55_v13 }
  0x15   :  { %6470 = vmatprep.mubr.msk.f32.mxu0 %vm70_vm0, %v56_v14 }
  0x18   :  { %6471 = vmatmul.mubr.msk.f32.gmra.mrb[2].mxu0 %vm70_vm0, %v57_v15 }
  0x19   :  { %6473 = vmatprep.mubr.msk.f32.mxu0 %vm70_vm0, %v58_v16 }
  0x1c   :  { %6474 = vmatmul.mubr.msk.f32.gmra.mrb[4].mxu0 %vm70_vm0, %v59_v17  ;;  %v434_v17 = vld [vmem:[%s10387_s3] sm:$0xff] }
  0x1d   :  { %6476 = vmatprep.mubr.msk.f32.mxu0 %vm70_vm0, %v60_v18  ;;  %v435_v18 = vld [vmem:[%s10387_s3 + $0x8] sm:$0xff] }
  0x20   :  { %6477 = vmatmul.mubr.msk.f32.gmra.mrb[6].mxu0 %vm70_vm0, %v61_v19 }
  0xe7   :  { %v6469_v20 = vpop.f32.mrb[0].mxu0 }
  0xe8   :  { %v161_v21 = vpop.f32.mrb[1].mxu0  ;;  %v8154_v22 = vmax.f32 %v6469_v20, 0.0  ;;  %v7371_v20 = vpack.c.bf16 %v435_v18, %v434_v17  ;;  %v5559_v17 = vld [vmem:[%s10387_s3 + $0xa0] sm:$0xff] }
  0xe9   :  { %v200_v23 = vmax.f32 %v161_v21, 0.0  ;;  %v436_v21 = vld [vmem:[%s10387_s3 + $0x10] sm:$0xff] }
  0xea   :  { %v209_v30 = vmul.f32 %v8154_v22, %v8154_v22  ;;  %7372 = vmatprep.subr.bf16.mxu0 %v7371_v20 }
  0xeb   :  { %v6472_v24 = vpop.f32.mrb[2].mxu0  ;;  %v208_v25 = vmul.f32 %v200_v23, %v200_v23  ;;  %7374 = vmatpush3.bf16.msra.mxu0 %v7371_v20  ;;  %v5577_v20 = vld [vmem:[%s10387_s3 + $0xe0] sm:$0xff] }
  0xec   :  { %v8156_v26 = vmax.f32 %v6472_v24, 0.0  ;;  %v171_v27 = vpop.f32.mrb[3].mxu0  ;;  %v220_v38 = vsel %vm216_vm1, %v209_v30, 0.0  ;;  %v437_v24 = vld [vmem:[%s10387_s3 + $0x18] sm:$0xff] }
  0xed   :  { %v8158_v28 = vmax.f32 %v171_v27, 0.0  ;;  %v217_v29 = vsel %vm216_vm1, %v208_v25, 0.0  ;;  %v438_v27 = vld [vmem:[%s10387_s3 + $0x20] sm:$0xff] }
  0xee   :  { %218 = vadd.xlane.f32.xlu0 %v217_v29  ;;  %v211_v31 = vmul.f32 %v8156_v26, %v8156_v26 }
  0xef   :  { %v6475_v32 = vpop.f32.mrb[4].mxu0  ;;  %v210_v36 = vmul.f32 %v8158_v28, %v8158_v28 }
  0xf0   :  { %v8165_v33 = vmax.f32 %v6475_v32, 0.0  ;;  %v181_v34 = vpop.f32.mrb[5].mxu0  ;;  %v226_v35 = vsel %vm216_vm1, %v211_v31, 0.0 }
  0xf1   :  { %v8170_v37 = vmax.f32 %v181_v34, 0.0  ;;  %227 = vadd.xlane.f32.xlu1 %v226_v35  ;;  %v223_v44 = vsel %vm216_vm1, %v210_v36, 0.0  ;;  %v5538_v34 = vld [vmem:[%s10387_s3 + $0x48] sm:$0xff] }
  0xf2   :  { %221 = vadd.xlane.f32.xlu0 %v220_v38  ;;  %v213_v39 = vmul.f32 %v8165_v33, %v8165_v33  ;;  %v5540_v38 = vld [vmem:[%s10387_s3 + $0x58] sm:$0xff] }
  0xf3   :  { %v6478_v40 = vpop.f32.mrb[6].mxu0  ;;  %v212_v41 = vmul.f32 %v8170_v37, %v8170_v37 }
  0xf4   :  { %v8177_v42 = vmax.f32 %v6478_v40, 0.0  ;;  %v191_v43 = vpop.f32.mrb[7].mxu0  ;;  %v232_v47 = vsel %vm216_vm1, %v213_v39, 0.0  ;;  %v8277_v39 = vld [vmem:[%s10386_s1 + $0x8] sm:$0xff]  ;;  %v8284_v40 = vld [vmem:[%s10386_s1 + $0x10] sm:$0xff] }
  0xf5   :  { %v8180_v45 = vmax.f32 %v191_v43, 0.0  ;;  %224 = vadd.xlane.f32.xlu1 %v223_v44  ;;  %v229_v46 = vsel %vm216_vm1, %v212_v41, 0.0  ;;  %v5542_v43 = vld [vmem:[%s10387_s3 + $0x68] sm:$0xff]  ;;  %v8302_v44 = vld [vmem:[%s10386_s1 + $0x18] sm:$0xff] }
  0xf6   :  { %230 = vadd.xlane.f32.xlu0 %v229_v46  ;;  %v215_v48 = vmul.f32 %v8177_v42, %v8177_v42 }
  0xf7   :  { %v214_v49 = vmul.f32 %v8180_v45, %v8180_v45 }
  0xf8   :  { %v238_v51 = vsel %vm216_vm1, %v215_v48, 0.0  ;;  %v8326_v48 = vld [vmem:[%s10386_s1 + $0x30] sm:$0xff] }
  0xf9   :  { %233 = vadd.xlane.f32.xlu1 %v232_v47  ;;  %v235_v50 = vsel %vm216_vm1, %v214_v49, 0.0  ;;  %v8320_v47 = vld [vmem:[%s10386_s1 + $0x28] sm:$0xff]  ;;  %v8336_v49 = vld [vmem:[%s10386_s1 + $0x38] sm:$0xff] }
  0xfa   :  { %236 = vadd.xlane.f32.xlu0 %v235_v50  ;;  %v440_v50 = vld [vmem:[%s10387_s3 + $0x30] sm:$0xff] }
  0xfd   :  { %239 = vadd.xlane.f32.xlu1 %v238_v51  ;;  %v441_v51 = vld [vmem:[%s10387_s3 + $0x38] sm:$0xff] }
 0x17b   :  { %v219_v53 = vpop.xlane.xlu0 %218 }
 0x17c   :  { %v241_v54 = vmax.f32 %v219_v53, 1e-24  ;;  %v5543_v53 = vld [vmem:[%s10387_s3 + $0x70] sm:$0xff] }
 0x17e   :  { %7824 = vrsqrt.f32 %v241_v54  ;;  %v228_v55 = vpop.xlane.xlu1 %227  ;;  %v7383_v54 = vpack.c.bf16 %v441_v51, %v440_v50 }
 0x17f   :  { %v244_v56 = vmax.f32 %v228_v55, 1e-24  ;;  %v222_v57 = vpop.xlane.xlu0 %221  ;;  %v5544_v55 = vld [vmem:[%s10387_s3 + $0x78] sm:$0xff] }
 0x180   :  { %v242_v58 = vmax.f32 %v222_v57, 1e-24  ;;  %v5555_v57 = vld [vmem:[%s10387_s3 + $0x80] sm:$0xff] }
 0x182   :  { %7826 = vrsqrt.f32 %v242_v58  ;;  %v225_v59 = vpop.xlane.xlu1 %224  ;;  %v5556_v58 = vld [vmem:[%s10387_s3 + $0x88] sm:$0xff] }
 0x183   :  { %7828 = vrsqrt.f32 %v244_v56  ;;  %v243_v60 = vmax.f32 %v225_v59, 1e-24  ;;  %v231_v61 = vpop.xlane.xlu0 %230  ;;  %v8353_v56 = vpack.c.bf16 %v5544_v55, %v5543_v53  ;;  %v5573_v59 = vld [vmem:[%s10387_s3 + $0xc0] sm:$0xff] }
 0x184   :  { %v245_v62 = vmax.f32 %v231_v61, 1e-24  ;;  %v5574_v61 = vld [vmem:[%s10387_s3 + $0xc8] sm:$0xff] }
 0x185   :  { %7830 = vrsqrt.f32 %v243_v60  ;;  %v8366_v60 = vpack.c.bf16 %v5556_v58, %v5555_v57  ;;  %v5592_v57 = vld [vmem:[%s10387_s3 + $0x108] sm:$0xff]  ;;  %v5609_v58 = vld [vmem:[%s10387_s3 + $0x140] sm:$0xff] }
 0x186   :  { %7832 = vrsqrt.f32 %v245_v62  ;;  %v234_v63 = vpop.xlane.xlu1 %233  ;;  %v8371_v62 = vpack.c.bf16 %v5574_v61, %v5573_v59  ;;  %v5610_v59 = vld [vmem:[%s10387_s3 + $0x148] sm:$0xff] }
 0x187   :  { %v246_v0 = vmax.f32 %v234_v63, 1e-24  ;;  %v237_v1 = vpop.xlane.xlu0 %236 }
 0x188   :  { %v7825_v2 = vpop.eup %7824  ;;  %v247_v3 = vmax.f32 %v237_v1, 1e-24  ;;  %v5557_v1 = vld [vmem:[%s10387_s3 + $0x90] sm:$0xff] }
 0x189   :  { %7834 = vrsqrt.f32 %v246_v0  ;;  %v8197_v4 = vmul.f32 %v7825_v2, %v200_v23  ;;  %v5558_v2 = vld [vmem:[%s10387_s3 + $0x98] sm:$0xff] }
 0x18a   :  { %7836 = vrsqrt.f32 %v247_v3  ;;  %v240_v5 = vpop.xlane.xlu1 %239  ;;  %v5575_v3 = vld [vmem:[%s10387_s3 + $0xd0] sm:$0xff] }
 0x18b   :  { %v248_v6 = vmax.f32 %v240_v5, 1e-24  ;;  %402 = vrot.lane.b32.xlu0 %v8197_v4, %s8027_s23  ;;  %v5576_v5 = vld [vmem:[%s10387_s3 + $0xd8] sm:$0xff] }
 0x18c   :  { %v7827_v7 = vpop.eup %7826 }
 0x18d   :  { %v7829_v8 = vpop.eup %7828  ;;  %7838 = vrsqrt.f32 %v248_v6  ;;  %v8202_v9 = vmul.f32 %v7827_v7, %v8154_v22 }
 0x18e   :  { %v8212_v14 = vmul.f32 %v7829_v8, %v8156_v26  ;;  %v7375_v26 = vpack.c.bf16 %v437_v24, %v436_v21  ;;  %v5578_v21 = vld [vmem:[%s10387_s3 + $0xe8] sm:$0xff] }
 0x18f   :  { %v7831_v10 = vpop.eup %7830  ;;  %404 = vrot.lane.b32.xlu1 %v8202_v9, %s8027_s23  ;;  %v7355_v11 = vpack.c.bf16 %v8202_v9, %v8197_v4 }
 0x190   :  { %v7833_v12 = vpop.eup %7832  ;;  %v8209_v13 = vmul.f32 %v7831_v10, %v8158_v28  ;;  %v439_v28 = vld [vmem:[%s10387_s3 + $0x28] sm:$0xff]  ;;  %7376 = vmatprep.subr.bf16.mxu0 %v7375_v26 }
 0x191   :  { %7356 = vmatprep.subr.bf16.mxu1 %v7355_v11  ;;  %v8215_v15 = vmul.f32 %v7833_v12, %v8170_v37  ;;  %v7379_v31 = vpack.c.bf16 %v439_v28, %v438_v27  ;;  %7378 = vmatpush3.bf16.msra.mxu0 %v7375_v26  ;;  %v5539_v37 = vld [vmem:[%s10387_s3 + $0x50] sm:$0xff]  ;;  %v8390_v12 = vpack.c.bf16 %v5558_v2, %v5557_v1 }
 0x192   :  { %7358 = vmatpush3.bf16.msra.mxu1 %v7355_v11  ;;  %v7359_v16 = vpack.c.bf16 %v8212_v14, %v8209_v13  ;;  %v8287_v41 = vpack.c.bf16 %v5540_v38, %v5539_v37  ;;  %v8426_v28 = vpack.c.bf16 %v5578_v21, %v5577_v20  ;;  %v5595_v20 = vld [vmem:[%s10387_s3 + $0x120] sm:$0xff]  ;;  %v5596_v21 = vld [vmem:[%s10387_s3 + $0x128] sm:$0xff] }
 0x193   :  { %v7835_v19 = vpop.eup %7834  ;;  %406 = vrot.lane.b32.xlu1 %v8209_v13, %s8027_s23  ;;  %410 = vrot.lane.b32.xlu0 %v8215_v15, %s8027_s23 }
 0x194   :  { %v7837_v22 = vpop.eup %7836  ;;  %7360 = vmatprep.subr.bf16.mxu1 %v7359_v16  ;;  %v8233_v23 = vmul.f32 %v7835_v19, %v8165_v33  ;;  %v5537_v33 = vld [vmem:[%s10387_s3 + $0x40] sm:$0xff]  ;;  %7380 = vmatprep.subr.bf16.mxu0 %v7379_v31  ;;  %v5560_v19 = vld [vmem:[%s10387_s3 + $0xa8] sm:$0xff] }
 0x195   :  { %v8239_v25 = vmul.f32 %v7837_v22, %v8180_v45  ;;  %v8266_v36 = vpack.c.bf16 %v5538_v34, %v5537_v33  ;;  %7382 = vmatpush3.bf16.msra.mxu0 %v7379_v31  ;;  %v8308_v45 = vld [vmem:[%s10386_s1 + $0x20] sm:$0xff]  ;;  %v8424_v27 = vpack.c.bf16 %v5560_v19, %v5559_v17  ;;  %v5562_v33 = vld [vmem:[%s10387_s3 + $0xb8] sm:$0xff]  ;;  %v5579_v34 = vld [vmem:[%s10387_s3 + $0xf0] sm:$0xff] }
 0x196   :  { %7362 = vmatpush3.bf16.msra.mxu1 %v7359_v16  ;;  %v7363_v29 = vpack.c.bf16 %v8233_v23, %v8215_v15  ;;  %7384 = vmatprep.subr.bf16.mxu0 %v7383_v54  ;;  %v8392_v16 = vpack.c.bf16 %v5576_v5, %v5575_v3  ;;  %v8501_v5 = vpack.c.bf16 %v5610_v59, %v5609_v58 }
 0x197   :  { %v7839_v30 = vpop.eup %7838  ;;  %408 = vrot.lane.b32.xlu1 %v8212_v14, %s8027_s23  ;;  %414 = vrot.lane.b32.xlu0 %v8239_v25, %s8027_s23 }
 0x198   :  { %7364 = vmatprep.subr.bf16.mxu1 %v7363_v29  ;;  %v8254_v32 = vmul.f32 %v7839_v30, %v8177_v42  ;;  %v5541_v42 = vld [vmem:[%s10387_s3 + $0x60] sm:$0xff] }
 0x199   :  { %v8311_v46 = vpack.c.bf16 %v5542_v43, %v5541_v42  ;;  %7386 = vmatpush3.bf16.msra.mxu0 %v7383_v54  ;;  %v5591_v54 = vld [vmem:[%s10387_s3 + $0x100] sm:$0xff] }
 0x19a   :  { %7366 = vmatpush3.bf16.msra.mxu1 %v7363_v29  ;;  %v7367_v35 = vpack.c.bf16 %v8254_v32, %v8239_v25  ;;  %7404 = vmatprep.subr.bf16.mxu0 %v8366_v60  ;;  %v5561_v29 = vld [vmem:[%s10387_s3 + $0xb0] sm:$0xff]  ;;  %v8499_v3 = vpack.c.bf16 %v5592_v57, %v5591_v54 }
 0x19b   :  { %412 = vrot.lane.b32.xlu1 %v8233_v23, %s8027_s23  ;;  %v8458_v50 = vpack.c.bf16 %v5562_v33, %v5561_v29  ;;  %v8554_v29 = vpack.c.bf16 %v5596_v21, %v5595_v20  ;;  %v5597_v33 = vld [vmem:[%s10387_s3 + $0x130] sm:$0xff] }
 0x19c   :  { %7368 = vmatprep.subr.bf16.mxu1 %v7367_v35 }
 0x19e   :  { %7370 = vmatpush3.bf16.msra.mxu1 %v7367_v35  ;;  %v5580_v35 = vld [vmem:[%s10387_s3 + $0xf8] sm:$0xff] }
 0x19f   :  { %416 = vrot.lane.b32.xlu1 %v8254_v32, %s8027_s23  ;;  %7388 = vmatprep.subr.bf16.mxu1 %v8266_v36  ;;  %v8460_v51 = vpack.c.bf16 %v5580_v35, %v5579_v34  ;;  %v5598_v34 = vld [vmem:[%s10387_s3 + $0x138] sm:$0xff]  ;;  %v5615_v35 = vld [vmem:[%s10387_s3 + $0x170] sm:$0xff] }
 0x1a1   :  { %6496 = vmatmul.mubr.msk.f32.vlgmr.msra.gmra.mrb[0].mxu1 %vm70_vm0, %v8277_v39 }
 0x1a2   :  { %6498 = vmatprep.mubr.msk.f32.mxu1 %vm70_vm0, %v8284_v40  ;;  %7390 = vmatpush3.bf16.msra.mxu1 %v8266_v36 }
 0x1a3   :  { %7392 = vmatprep.subr.bf16.mxu1 %v8287_v41 }
 0x1a5   :  { %6499 = vmatmul.mubr.msk.f32.gmra.mrb[2].mxu1 %vm70_vm0, %v8302_v44 }
 0x1a6   :  { %6501 = vmatprep.mubr.msk.f32.mxu1 %vm70_vm0, %v8308_v45  ;;  %7394 = vmatpush3.bf16.msra.mxu1 %v8287_v41 }
 0x1a7   :  { %7396 = vmatprep.subr.bf16.mxu1 %v8311_v46 }
 0x1a9   :  { %6502 = vmatmul.mubr.msk.f32.gmra.mrb[4].mxu1 %vm70_vm0, %v8320_v47 }
 0x1aa   :  { %6504 = vmatprep.mubr.msk.f32.mxu1 %vm70_vm0, %v8326_v48  ;;  %7398 = vmatpush3.bf16.msra.mxu1 %v8311_v46 }
 0x1ab   :  { %7400 = vmatprep.subr.bf16.mxu1 %v8353_v56 }
 0x1ad   :  { %6505 = vmatmul.mubr.msk.f32.gmra.mrb[6].mxu1 %vm70_vm0, %v8336_v49 }
 0x1ae   :  { %7402 = vmatpush3.bf16.msra.mxu1 %v8353_v56 }
 0x1af   :  { %7420 = vmatprep.subr.bf16.mxu1 %v8371_v62 }
 0x1fd   :  { %v403_v7 = vpop.permute.xlu0 %402 }
 0x201   :  { %v405_v63 = vpop.permute.xlu1 %404 }
 0x205   :  { %v407_v0 = vpop.permute.xlu1 %406  ;;  %v411_v30 = vpop.permute.xlu0 %410 }
 0x209   :  { %v409_v10 = vpop.permute.xlu1 %408  ;;  %v415_v61 = vpop.permute.xlu0 %414 }
 0x20d   :  { %v413_v37 = vpop.permute.xlu1 %412 }
 0x274   :  { %v6497_v6 = vpop.f32.mrb[0].mxu1 }
 0x275   :  { %v355_v8 = vpop.f32.mrb[1].mxu1  ;;  %v8398_v18 = vsel %vm216_vm1, %v6497_v6, %v405_v63  ;;  %v5593_v6 = vld [vmem:[%s10387_s3 + $0x110] sm:$0xff] }
 0x276   :  { %v8388_v11 = vsel %vm216_vm1, %v355_v8, %v403_v7  ;;  %v5594_v7 = vld [vmem:[%s10387_s3 + $0x118] sm:$0xff]  ;;  %v5611_v8 = vld [vmem:[%s10387_s3 + $0x150] sm:$0xff] }
 0x277   :  { %6523 = vmatprep.mubr.msk.f32.mxu0 %vm70_vm0, %v8388_v11  ;;  %6551 = vmatprep.mubr.msk.f32.mxu1 %vm70_vm0, %v8388_v11  ;;  %v8527_v17 = vpack.c.bf16 %v5594_v7, %v5593_v6 }
 0x278   :  { %v6500_v22 = vpop.f32.mrb[2].mxu1  ;;  %6524 = vmatmul.mubr.msk.f32.vlgmr.msra.gmra.mrb[8].mxu0 %vm70_vm0, %v8398_v18  ;;  %6552 = vmatmul.mubr.msk.f32.vlgmr.msra.gmra.mrb[8].mxu1 %vm70_vm0, %v8398_v18 }
 0x279   :  { %v365_v24 = vpop.f32.mrb[3].mxu1  ;;  %7406 = vmatpush3.bf16.msra.mxu0 %v8366_v60  ;;  %7422 = vmatpush3.bf16.msra.mxu1 %v8371_v62  ;;  %v8432_v31 = vsel %vm216_vm1, %v6500_v22, %v409_v10  ;;  %v5612_v10 = vld [vmem:[%s10387_s3 + $0x158] sm:$0xff]  ;;  %v5613_v22 = vld [vmem:[%s10387_s3 + $0x160] sm:$0xff] }
 0x27a   :  { %v8420_v26 = vsel %vm216_vm1, %v365_v24, %v407_v0  ;;  %7408 = vmatprep.subr.bf16.mxu0 %v8390_v12  ;;  %7424 = vmatprep.subr.bf16.mxu1 %v8392_v16  ;;  %v417_v0 = vpop.permute.xlu1 %416  ;;  %v8531_v19 = vpack.c.bf16 %v5612_v10, %v5611_v8  ;;  %v5614_v24 = vld [vmem:[%s10387_s3 + $0x168] sm:$0xff] }
 0x27b   :  { %6526 = vmatprep.mubr.msk.f32.mxu0 %vm70_vm0, %v8420_v26  ;;  %6554 = vmatprep.mubr.msk.f32.mxu1 %vm70_vm0, %v8420_v26 }
 0x27c   :  { %v6503_v38 = vpop.f32.mrb[4].mxu1  ;;  %6527 = vmatmul.mubr.msk.f32.gmra.mrb[10].mxu0 %vm70_vm0, %v8432_v31  ;;  %6555 = vmatmul.mubr.msk.f32.gmra.mrb[10].mxu1 %vm70_vm0, %v8432_v31 }
 0x27d   :  { %v375_v42 = vpop.f32.mrb[5].mxu1  ;;  %7410 = vmatpush3.bf16.msra.mxu0 %v8390_v12  ;;  %7426 = vmatpush3.bf16.msra.mxu1 %v8392_v16  ;;  %v8463_v53 = vsel %vm216_vm1, %v6503_v38, %v413_v37  ;;  %v5616_v37 = vld [vmem:[%s10387_s3 + $0x178] sm:$0xff]  ;;  %v8582_v38 = vpack.c.bf16 %v5598_v34, %v5597_v33 }
 0x27e   :  { %v8454_v43 = vsel %vm216_vm1, %v375_v42, %v411_v30  ;;  %7412 = vmatprep.subr.bf16.mxu0 %v8424_v27  ;;  %7428 = vmatprep.subr.bf16.mxu1 %v8426_v28  ;;  %v8559_v30 = vpack.c.bf16 %v5614_v24, %v5613_v22  ;;  %v8587_v42 = vpack.c.bf16 %v5616_v37, %v5615_v35 }
 0x27f   :  { %6529 = vmatprep.mubr.msk.f32.mxu0 %vm70_vm0, %v8454_v43  ;;  %6557 = vmatprep.mubr.msk.f32.mxu1 %vm70_vm0, %v8454_v43 }
 0x280   :  { %v6506_v55 = vpop.f32.mrb[6].mxu1  ;;  %6530 = vmatmul.mubr.msk.f32.gmra.mrb[12].mxu0 %vm70_vm0, %v8463_v53  ;;  %6558 = vmatmul.mubr.msk.f32.gmra.mrb[12].mxu1 %vm70_vm0, %v8463_v53 }
 0x281   :  { %v385_v63 = vpop.f32.mrb[7].mxu1  ;;  %7414 = vmatpush3.bf16.msra.mxu0 %v8424_v27  ;;  %7430 = vmatpush3.bf16.msra.mxu1 %v8426_v28  ;;  %v8493_v2 = vsel %vm216_vm1, %v6506_v55, %v417_v0 }
 0x282   :  { %v8488_v1 = vsel %vm216_vm1, %v385_v63, %v415_v61  ;;  %7416 = vmatprep.subr.bf16.mxu0 %v8458_v50  ;;  %7432 = vmatprep.subr.bf16.mxu1 %v8460_v51 }
 0x283   :  { %6532 = vmatprep.mubr.msk.f32.mxu0 %vm70_vm0, %v8488_v1  ;;  %6560 = vmatprep.mubr.msk.f32.mxu1 %vm70_vm0, %v8488_v1 }
 0x284   :  { %6533 = vmatmul.mubr.msk.f32.gmra.mrb[14].mxu0 %vm70_vm0, %v8493_v2  ;;  %6561 = vmatmul.mubr.msk.f32.gmra.mrb[14].mxu1 %vm70_vm0, %v8493_v2 }
 0x285   :  { %7418 = vmatpush3.bf16.msra.mxu0 %v8458_v50  ;;  %6579 = vmatprep.mubr.msk.f32.mxu0 %vm70_vm0, %v8388_v11 }
 0x286   :  { %7434 = vmatpush3.bf16.msra.mxu1 %v8460_v51  ;;  %6607 = vmatprep.mubr.msk.f32.mxu1 %vm70_vm0, %v8388_v11 }
 0x287   :  { %7436 = vmatprep.subr.bf16.mxu0 %v8499_v3  ;;  %7452 = vmatprep.subr.bf16.mxu1 %v8501_v5 }
 0x288   :  { %6580 = vmatmul.mubr.msk.f32.vlgmr.msra.gmra.mrb[16].mxu0 %vm70_vm0, %v8398_v18 }
 0x289   :  { %6608 = vmatmul.mubr.msk.f32.vlgmr.msra.gmra.mrb[16].mxu1 %vm70_vm0, %v8398_v18  ;;  %6582 = vmatprep.mubr.msk.f32.mxu0 %vm70_vm0, %v8420_v26 }
 0x28a   :  { %6610 = vmatprep.mubr.msk.f32.mxu1 %vm70_vm0, %v8420_v26  ;;  %7438 = vmatpush3.bf16.msra.mxu0 %v8499_v3 }
 0x28b   :  { %7454 = vmatpush3.bf16.msra.mxu1 %v8501_v5  ;;  %7440 = vmatprep.subr.bf16.mxu0 %v8527_v17 }
 0x28c   :  { %6583 = vmatmul.mubr.msk.f32.gmra.mrb[18].mxu0 %vm70_vm0, %v8432_v31  ;;  %7456 = vmatprep.subr.bf16.mxu1 %v8531_v19 }
 0x28d   :  { %6611 = vmatmul.mubr.msk.f32.gmra.mrb[18].mxu1 %vm70_vm0, %v8432_v31  ;;  %6585 = vmatprep.mubr.msk.f32.mxu0 %vm70_vm0, %v8454_v43 }
 0x28e   :  { %6613 = vmatprep.mubr.msk.f32.mxu1 %vm70_vm0, %v8454_v43  ;;  %7442 = vmatpush3.bf16.msra.mxu0 %v8527_v17 }
 0x28f   :  { %7458 = vmatpush3.bf16.msra.mxu1 %v8531_v19  ;;  %7444 = vmatprep.subr.bf16.mxu0 %v8554_v29 }
 0x290   :  { %6586 = vmatmul.mubr.msk.f32.gmra.mrb[20].mxu0 %vm70_vm0, %v8463_v53  ;;  %7460 = vmatprep.subr.bf16.mxu1 %v8559_v30 }
 0x291   :  { %6614 = vmatmul.mubr.msk.f32.gmra.mrb[20].mxu1 %vm70_vm0, %v8463_v53  ;;  %6588 = vmatprep.mubr.msk.f32.mxu0 %vm70_vm0, %v8488_v1 }
 0x292   :  { %6616 = vmatprep.mubr.msk.f32.mxu1 %vm70_vm0, %v8488_v1  ;;  %7446 = vmatpush3.bf16.msra.mxu0 %v8554_v29 }
 0x293   :  { %7462 = vmatpush3.bf16.msra.mxu1 %v8559_v30  ;;  %7448 = vmatprep.subr.bf16.mxu0 %v8582_v38 }
 0x294   :  { %6589 = vmatmul.mubr.msk.f32.gmra.mrb[22].mxu0 %vm70_vm0, %v8493_v2  ;;  %7464 = vmatprep.subr.bf16.mxu1 %v8587_v42 }
 0x295   :  { %6617 = vmatmul.mubr.msk.f32.gmra.mrb[22].mxu1 %vm70_vm0, %v8493_v2  ;;  %6635 = vmatprep.mubr.msk.f32.mxu0 %vm70_vm0, %v8388_v11 }
 0x296   :  { %7450 = vmatpush3.bf16.msra.mxu0 %v8582_v38  ;;  %6663 = vmatprep.mubr.msk.f32.mxu1 %vm70_vm0, %v8388_v11 }
 0x297   :  { %7466 = vmatpush3.bf16.msra.mxu1 %v8587_v42 }
 0x298   :  { %7484 = vmatprep.subr.bf16.mxu1 %v8266_v36 }
 0x299   :  { %6636 = vmatmul.mubr.msk.f32.vlgmr.msra.gmra.mrb[24].mxu0 %vm70_vm0, %v8398_v18 }
 0x29a   :  { %6664 = vmatmul.mubr.msk.f32.vlgmr.msra.gmra.mrb[24].mxu1 %vm70_vm0, %v8398_v18  ;;  %6638 = vmatprep.mubr.msk.f32.mxu0 %vm70_vm0, %v8420_v26 }
 0x29b   :  { %6666 = vmatprep.mubr.msk.f32.mxu1 %vm70_vm0, %v8420_v26  ;;  %7486 = vmatpush3.bf16.msra.mxu1 %v8266_v36  ;;  %v5528_v36 = vld [vmem:[%s10388_s4] ss:$0 sm:$0xff] }
 0x29c   :  { %7488 = vmatprep.subr.bf16.mxu1 %v8287_v41 }
 0x29d   :  { %6639 = vmatmul.mubr.msk.f32.gmra.mrb[26].mxu0 %vm70_vm0, %v8432_v31 }
 0x29e   :  { %6667 = vmatmul.mubr.msk.f32.gmra.mrb[26].mxu1 %vm70_vm0, %v8432_v31  ;;  %6641 = vmatprep.mubr.msk.f32.mxu0 %vm70_vm0, %v8454_v43 }
 0x29f   :  { %6669 = vmatprep.mubr.msk.f32.mxu1 %vm70_vm0, %v8454_v43  ;;  %7490 = vmatpush3.bf16.msra.mxu1 %v8287_v41 }
 0x2a0   :  { %7492 = vmatprep.subr.bf16.mxu1 %v8311_v46 }
 0x2a1   :  { %6642 = vmatmul.mubr.msk.f32.gmra.mrb[28].mxu0 %vm70_vm0, %v8463_v53 }
 0x2a2   :  { %6670 = vmatmul.mubr.msk.f32.gmra.mrb[28].mxu1 %vm70_vm0, %v8463_v53  ;;  %6644 = vmatprep.mubr.msk.f32.mxu0 %vm70_vm0, %v8488_v1 }
 0x2a3   :  { %6672 = vmatprep.mubr.msk.f32.mxu1 %vm70_vm0, %v8488_v1  ;;  %7494 = vmatpush3.bf16.msra.mxu1 %v8311_v46 }
 0x2a4   :  { %7496 = vmatprep.subr.bf16.mxu1 %v8353_v56 }
 0x2a5   :  { %6645 = vmatmul.mubr.msk.f32.gmra.mrb[30].mxu0 %vm70_vm0, %v8493_v2 }
 0x2a6   :  { %6673 = vmatmul.mubr.msk.f32.gmra.mrb[30].mxu1 %vm70_vm0, %v8493_v2  ;;  %6691 = vmatprep.mubr.msk.f32.mxu0 %vm70_vm0, %v8193_v52 }
 0x2a7   :  { %7498 = vmatpush3.bf16.msra.mxu1 %v8353_v56 }
 0x2a8   :  { %7516 = vmatprep.subr.bf16.mxu1 %v8366_v60 }
 0x34b   :  { %v6525_v41 = vpop.f32.mrb[8].mxu0  ;;  %v8651_v46 = vpop.f32.mrb[8].mxu1 }
 0x34c   :  { %v545_v11 = vadd.f32 %v6525_v41, %v5528_v36  ;;  %v539_v18 = vpop.f32.mrb[9].mxu0  ;;  %v8653_v26 = vpop.f32.mrb[9].mxu1 }
 0x34d   :  { %v540_v31 = vadd.f32 %v5528_v36, %v539_v18 }
 0x34e   :  { %v8655_v43 = vmax.f32 %v545_v11, 0.0 }
 0x34f   :  { %v8657_v53 = vmax.f32 %v540_v31, 0.0  ;;  %v6528_v54 = vpop.f32.mrb[10].mxu0  ;;  %v8659_v56 = vpop.f32.mrb[10].mxu1 }
 0x350   :  { %v555_v55 = vadd.f32 %v6528_v54, %v5528_v36  ;;  %v549_v57 = vpop.f32.mrb[11].mxu0  ;;  %v8661_v58 = vpop.f32.mrb[11].mxu1  ;;  %v587_v59 = vmul.f32 %v8655_v43, %v8655_v43 }
 0x351   :  { %v550_v61 = vadd.f32 %v5528_v36, %v549_v57  ;;  %v586_v63 = vmul.f32 %v8657_v53, %v8657_v53 }
 0x352   :  { %v8667_v0 = vmax.f32 %v555_v55, 0.0  ;;  %v597_v1 = vsel %vm216_vm1, %v587_v59, 0.0 }
 0x353   :  { %v8670_v2 = vmax.f32 %v550_v61, 0.0  ;;  %598 = vadd.xlane.f32.xlu1 %v597_v1  ;;  %v6531_v6 = vpop.f32.mrb[12].mxu0  ;;  %v8672_v7 = vpop.f32.mrb[12].mxu1  ;;  %v594_v8 = vsel %vm216_vm1, %v586_v63, 0.0 }
 0x354   :  { %v565_v10 = vadd.f32 %v6531_v6, %v5528_v36  ;;  %595 = vadd.xlane.f32.xlu0 %v594_v8  ;;  %v559_v20 = vpop.f32.mrb[13].mxu0  ;;  %v8675_v21 = vpop.f32.mrb[13].mxu1  ;;  %v589_v22 = vmul.f32 %v8667_v0, %v8667_v0 }
 0x355   :  { %v560_v24 = vadd.f32 %v5528_v36, %v559_v20  ;;  %v588_v11 = vmul.f32 %v8670_v2, %v8670_v2 }
 0x356   :  { %v8679_v33 = vmax.f32 %v565_v10, 0.0  ;;  %v603_v34 = vsel %vm216_vm1, %v589_v22, 0.0 }
 0x357   :  { %v8682_v35 = vmax.f32 %v560_v24, 0.0  ;;  %v6534_v37 = vpop.f32.mrb[14].mxu0  ;;  %v8684_v41 = vpop.f32.mrb[14].mxu1  ;;  %v600_v6 = vsel %vm216_vm1, %v588_v11, 0.0 }
 0x358   :  { %v575_v18 = vadd.f32 %v6534_v37, %v5528_v36  ;;  %604 = vadd.xlane.f32.xlu0 %v603_v34  ;;  %v569_v31 = vpop.f32.mrb[15].mxu0  ;;  %v8688_v54 = vpop.f32.mrb[15].mxu1  ;;  %v591_v55 = vmul.f32 %v8679_v33, %v8679_v33 }
 0x359   :  { %v570_v57 = vadd.f32 %v5528_v36, %v569_v31  ;;  %v590_v8 = vmul.f32 %v8682_v35, %v8682_v35 }
 0x35a   :  { %v8692_v59 = vmax.f32 %v575_v18, 0.0  ;;  %v609_v61 = vsel %vm216_vm1, %v591_v55, 0.0 }
 0x35b   :  { %v8695_v63 = vmax.f32 %v570_v57, 0.0  ;;  %610 = vadd.xlane.f32.xlu1 %v609_v61  ;;  %v8697_v1 = vpop.f32.mrb[16].mxu0  ;;  %v606_v37 = vsel %vm216_vm1, %v590_v8, 0.0 }
 0x35c   :  { %10415 = vst [vmem:[#allocation3_spill] sm:$0xff] %v8697_v1  ;;  %v8702_v10 = vpop.f32.mrb[16].mxu1  ;;  %601 = vadd.xlane.f32.xlu0 %v600_v6  ;;  %v8704_v20 = vpop.f32.mrb[17].mxu0  ;;  %v593_v36 = vmul.f32 %v8692_v59, %v8692_v59 }
 0x35d   :  { %10416 = vst [vmem:[#allocation4_spill] sm:$0xff] %v8702_v10  ;;  %10417 = vst [vmem:[#allocation5_spill] sm:$0xff] %v8704_v20  ;;  %v8708_v22 = vpop.f32.mrb[17].mxu1  ;;  %v592_v11 = vmul.f32 %v8695_v63, %v8695_v63 }
 0x35e   :  { %10418 = vst [vmem:[#allocation6_spill] sm:$0xff] %v8708_v22  ;;  %v615_v24 = vsel %vm216_vm1, %v593_v36, 0.0 }
 0x35f   :  { %616 = vadd.xlane.f32.xlu1 %v615_v24  ;;  %v8711_v34 = vpop.f32.mrb[18].mxu0  ;;  %v612_v61 = vsel %vm216_vm1, %v592_v11, 0.0 }
 0x360   :  { %10419 = vst [vmem:[#allocation7_spill] sm:$0xff] %v8711_v34  ;;  %v8716_v18 = vpop.f32.mrb[18].mxu1  ;;  %607 = vadd.xlane.f32.xlu0 %v606_v37  ;;  %v8718_v31 = vpop.f32.mrb[19].mxu0 }
 0x361   :  { %10420 = vst [vmem:[#allocation8_spill] sm:$0xff] %v8716_v18  ;;  %10421 = vst [vmem:[#allocation9_spill] sm:$0xff] %v8718_v31  ;;  %v8720_v55 = vpop.f32.mrb[19].mxu1 }
 0x362   :  { %10422 = vst [vmem:[#allocation10_spill] sm:$0xff] %v8720_v55 }
 0x363   :  { %v8722_v57 = vpop.f32.mrb[20].mxu0 }
 0x364   :  { %10423 = vst [vmem:[#allocation11_spill] sm:$0xff] %v8722_v57  ;;  %v8725_v6 = vpop.f32.mrb[20].mxu1  ;;  %v8727_v36 = vpop.f32.mrb[21].mxu0  ;;  %613 = vadd.xlane.f32.xlu0 %v612_v61 }
 0x365   :  { %10424 = vst [vmem:[#allocation12_spill] sm:$0xff] %v8725_v6  ;;  %10425 = vst [vmem:[#allocation13_spill] sm:$0xff] %v8727_v36  ;;  %v8729_v8 = vpop.f32.mrb[21].mxu1 }
 0x366   :  { %10426 = vst [vmem:[#allocation14_spill] sm:$0xff] %v8729_v8 }
 0x367   :  { %v8731_v24 = vpop.f32.mrb[22].mxu0 }
 0x368   :  { %10427 = vst [vmem:[#allocation15_spill] sm:$0xff] %v8731_v24  ;;  %v8733_v10 = vpop.f32.mrb[22].mxu1  ;;  %v8735_v37 = vpop.f32.mrb[23].mxu0 }
 0x369   :  { %10428 = vst [vmem:[#allocation16_spill] sm:$0xff] %v8733_v10  ;;  %10429 = vst [vmem:[#allocation17_spill] sm:$0xff] %v8735_v37  ;;  %v8737_v18 = vpop.f32.mrb[23].mxu1 }
 0x36a   :  { %10430 = vst [vmem:[#allocation18_spill] sm:$0xff] %v8737_v18 }
 0x36c   :  { %v8739_v55 = vpop.f32.mrb[24].mxu0 }
 0x36d   :  { %10431 = vst [vmem:[#allocation19_spill] sm:$0xff] %v8739_v55  ;;  %v8741_v22 = vpop.f32.mrb[24].mxu1  ;;  %v8743_v11 = vpop.f32.mrb[25].mxu0 }
 0x36e   :  { %10432 = vst [vmem:[#allocation20_spill] sm:$0xff] %v8741_v22  ;;  %10433 = vst [vmem:[#allocation21_spill] sm:$0xff] %v8743_v11  ;;  %v8745_v6 = vpop.f32.mrb[25].mxu1 }
 0x36f   :  { %10434 = vst [vmem:[#allocation22_spill] sm:$0xff] %v8745_v6 }
 0x370   :  { %v8747_v57 = vpop.f32.mrb[26].mxu0 }
 0x371   :  { %10435 = vst [vmem:[#allocation23_spill] sm:$0xff] %v8747_v57  ;;  %v8749_v61 = vpop.f32.mrb[26].mxu1  ;;  %v8751_v8 = vpop.f32.mrb[27].mxu0 }
 0x372   :  { %10436 = vst [vmem:[#allocation24_spill] sm:$0xff] %v8749_v61  ;;  %10437 = vst [vmem:[#allocation25_spill] sm:$0xff] %v8751_v8  ;;  %v8753_v24 = vpop.f32.mrb[27].mxu1 }
 0x373   :  { %10438 = vst [vmem:[#allocation26_spill] sm:$0xff] %v8753_v24 }
 0x374   :  { %v8755_v10 = vpop.f32.mrb[28].mxu0 }
 0x375   :  { %10439 = vst [vmem:[#allocation27_spill] sm:$0xff] %v8755_v10  ;;  %v8757_v37 = vpop.f32.mrb[28].mxu1  ;;  %v8759_v18 = vpop.f32.mrb[29].mxu0 }
 0x376   :  { %10440 = vst [vmem:[#allocation28_spill] sm:$0xff] %v8757_v37  ;;  %10441 = vst [vmem:[#allocation29_spill] sm:$0xff] %v8759_v18  ;;  %v8761_v55 = vpop.f32.mrb[29].mxu1 }
 0x377   :  { %10442 = vst [vmem:[#allocation30_spill] sm:$0xff] %v8761_v55 }
 0x378   :  { %v8763_v22 = vpop.f32.mrb[30].mxu0 }
 0x379   :  { %10443 = vst [vmem:[#allocation31_spill] sm:$0xff] %v8763_v22  ;;  %v8765_v11 = vpop.f32.mrb[30].mxu1  ;;  %v8767_v6 = vpop.f32.mrb[31].mxu0 }
 0x37a   :  { %10444 = vst [vmem:[#allocation32_spill] sm:$0xff] %v8765_v11  ;;  %10445 = vst [vmem:[#allocation33_spill] sm:$0xff] %v8767_v6  ;;  %v8769_v57 = vpop.f32.mrb[31].mxu1 }
 0x37b   :  { %10446 = vst [vmem:[#allocation34_spill] sm:$0xff] %v8769_v57 }
 0x3e0   :  { %v599_v61 = vpop.xlane.xlu1 %598 }
 0x3e1   :  { %v619_v8 = vmax.f32 %v599_v61, 1e-24  ;;  %v596_v36 = vpop.xlane.xlu0 %595 }
 0x3e2   :  { %v618_v24 = vmax.f32 %v596_v36, 1e-24 }
 0x3e3   :  { %7840 = vrsqrt.f32 %v619_v8 }
 0x3e4   :  { %7842 = vrsqrt.f32 %v618_v24 }
 0x3e5   :  { %v605_v10 = vpop.xlane.xlu0 %604 }
 0x3e6   :  { %v621_v37 = vmax.f32 %v605_v10, 1e-24 }
 0x3e8   :  { %v611_v34 = vpop.xlane.xlu1 %610  ;;  %7844 = vrsqrt.f32 %v621_v37 }
 0x3e9   :  { %v602_v18 = vpop.xlane.xlu0 %601  ;;  %v623_v55 = vmax.f32 %v611_v34, 1e-24 }
 0x3ea   :  { %v620_v31 = vmax.f32 %v602_v18, 1e-24 }
 0x3ec   :  { %7846 = vrsqrt.f32 %v620_v31  ;;  %v617_v22 = vpop.xlane.xlu1 %616 }
 0x3ed   :  { %v7841_v11 = vpop.eup %7840  ;;  %v608_v1 = vpop.xlane.xlu0 %607  ;;  %7848 = vrsqrt.f32 %v623_v55  ;;  %v625_v57 = vmax.f32 %v617_v22, 1e-24 }
 0x3ee   :  { %v7843_v6 = vpop.eup %7842  ;;  %v622_v20 = vmax.f32 %v608_v1, 1e-24  ;;  %v8772_v61 = vmul.f32 %v7841_v11, %v8655_v43 }
 0x3ef   :  { %v8775_v36 = vmul.f32 %v7843_v6, %v8657_v53 }
 0x3f0   :  { %10447 = vst [vmem:[#allocation35_spill] sm:$0xff] %v8772_v61  ;;  %7850 = vrsqrt.f32 %v622_v20  ;;  %1687 = vrot.lane.b32.xlu1 %v8772_v61, %s8027_s23 }
 0x3f1   :  { %10448 = vst [vmem:[#allocation36_spill] sm:$0xff] %v8775_v36  ;;  %1685 = vrot.lane.b32.xlu0 %v8775_v36, %s8027_s23  ;;  %v614_v10 = vpop.xlane.xlu0 %613  ;;  %v7467_v34 = vpack.c.bf16 %v8772_v61, %v8775_v36  ;;  %7852 = vrsqrt.f32 %v625_v57 }
 0x3f2   :  { %v624_v22 = vmax.f32 %v614_v10, 1e-24  ;;  %v7845_v1 = vpop.eup %7844 }
 0x3f3   :  { %7468 = vmatprep.subr.bf16.mxu0 %v7467_v34  ;;  %v8787_v20 = vmul.f32 %v7845_v1, %v8667_v0 }
 0x3f4   :  { %7854 = vrsqrt.f32 %v624_v22  ;;  %7470 = vmatpush3.bf16.msra.mxu0 %v7467_v34 }
 0x3f5   :  { %10450 = vst [vmem:[#allocation38_spill] sm:$0xff] %v8787_v20 }
 0x3f6   :  { %v7847_v43 = vpop.eup %7846 }
 0x3f7   :  { %v8784_v53 = vmul.f32 %v7847_v43, %v8670_v2  ;;  %v7849_v18 = vpop.eup %7848 }
 0x3f8   :  { %v8797_v6 = vmul.f32 %v7849_v18, %v8679_v33 }
 0x3f9   :  { %10449 = vst [vmem:[#allocation37_spill] sm:$0xff] %v8784_v53  ;;  %1689 = vrot.lane.b32.xlu1 %v8784_v53, %s8027_s23  ;;  %v7471_v31 = vpack.c.bf16 %v8787_v20, %v8784_v53 }
 0x3fa   :  { %v7851_v55 = vpop.eup %7850  ;;  %10452 = vst [vmem:[#allocation40_spill] sm:$0xff] %v8797_v6 }
 0x3fb   :  { %7472 = vmatprep.subr.bf16.mxu0 %v7471_v31  ;;  %v8794_v57 = vmul.f32 %v7851_v55, %v8682_v35  ;;  %v7853_v2 = vpop.eup %7852 }
 0x3fc   :  { %7474 = vmatpush3.bf16.msra.mxu0 %v7471_v31  ;;  %v8809_v35 = vmul.f32 %v7853_v2, %v8692_v59 }
 0x3fd   :  { %10451 = vst [vmem:[#allocation39_spill] sm:$0xff] %v8794_v57  ;;  %1691 = vrot.lane.b32.xlu1 %v8787_v20, %s8027_s23  ;;  %1693 = vrot.lane.b32.xlu0 %v8794_v57, %s8027_s23  ;;  %v7475_v0 = vpack.c.bf16 %v8797_v6, %v8794_v57 }
 0x3fe   :  { %v7855_v8 = vpop.eup %7854  ;;  %10454 = vst [vmem:[#allocation42_spill] sm:$0xff] %v8809_v35 }
 0x3ff   :  { %7476 = vmatprep.subr.bf16.mxu0 %v7475_v0  ;;  %v8806_v24 = vmul.f32 %v7855_v8, %v8695_v63 }
 0x400   :  { %7478 = vmatpush3.bf16.msra.mxu0 %v7475_v0 }
 0x401   :  { %10453 = vst [vmem:[#allocation41_spill] sm:$0xff] %v8806_v24  ;;  %1695 = vrot.lane.b32.xlu1 %v8797_v6, %s8027_s23  ;;  %1697 = vrot.lane.b32.xlu0 %v8806_v24, %s8027_s23  ;;  %v7479_v33 = vpack.c.bf16 %v8809_v35, %v8806_v24 }
 0x403   :  { %7480 = vmatprep.subr.bf16.mxu0 %v7479_v33 }
 0x404   :  { %7482 = vmatpush3.bf16.msra.mxu0 %v7479_v33 }
 0x405   :  { %1699 = vrot.lane.b32.xlu1 %v8809_v35, %s8027_s23 }
 0x407   :  { %6692 = vmatmul.mubr.msk.f32.vlgmr.msra.gmra.mrb[32].mxu0 %vm70_vm0, %v8277_v39 }
 0x408   :  { %6694 = vmatprep.mubr.msk.f32.mxu0 %vm70_vm0, %v8284_v40 }
 0x40b   :  { %6695 = vmatmul.mubr.msk.f32.gmra.mrb[34].mxu0 %vm70_vm0, %v8302_v44 }
 0x40c   :  { %6697 = vmatprep.mubr.msk.f32.mxu0 %vm70_vm0, %v8308_v45 }
 0x40f   :  { %6698 = vmatmul.mubr.msk.f32.gmra.mrb[36].mxu0 %vm70_vm0, %v8320_v47 }
 0x410   :  { %6700 = vmatprep.mubr.msk.f32.mxu0 %vm70_vm0, %v8326_v48 }
 0x413   :  { %6701 = vmatmul.mubr.msk.f32.gmra.mrb[38].mxu0 %vm70_vm0, %v8336_v49 }
 0x414   :  { %6747 = vmatprep.mubr.msk.f32.mxu0 %vm70_vm0, %v8193_v52 }
 0x462   :  { %v1688_v59 = vpop.permute.xlu1 %1687 }
 0x463   :  { %v1686_v11 = vpop.permute.xlu0 %1685 }
 0x46b   :  { %v1690_v63 = vpop.permute.xlu1 %1689 }
 0x46f   :  { %v1692_v34 = vpop.permute.xlu1 %1691  ;;  %v1694_v31 = vpop.permute.xlu0 %1693 }
 0x473   :  { %v1696_v2 = vpop.permute.xlu1 %1695 }
 0x4da   :  { %v6693_v37 = vpop.f32.mrb[32].mxu0 }
 0x4db   :  { %v1638_v10 = vpop.f32.mrb[33].mxu0  ;;  %v1710_v1 = vsel %vm216_vm1, %v6693_v37, %v1688_v59 }
 0x4dc   :  { %v1709_v22 = vsel %vm216_vm1, %v1638_v10, %v1686_v11  ;;  %v1700_v11 = vpop.permute.xlu1 %1699 }
 0x4dd   :  { %6719 = vmatprep.mubr.msk.f32.mxu1 %vm70_vm0, %v1709_v22 }
 0x4de   :  { %v6696_v43 = vpop.f32.mrb[34].mxu0  ;;  %6720 = vmatmul.mubr.msk.f32.vlgmr.msra.gmra.mrb[32].mxu1 %vm70_vm0, %v1710_v1 }
 0x4df   :  { %v1648_v18 = vpop.f32.mrb[35].mxu0  ;;  %7518 = vmatpush3.bf16.msra.mxu1 %v8366_v60  ;;  %v1712_v55 = vsel %vm216_vm1, %v6696_v43, %v1692_v34  ;;  %v5546_v34 = vld [vmem:[%s10388_s4 + $0x1] ss:$0 sm:$0xff] }
 0x4e0   :  { %v1711_v52 = vsel %vm216_vm1, %v1648_v18, %v1690_v63  ;;  %7520 = vmatprep.subr.bf16.mxu1 %v8390_v12  ;;  %v1698_v63 = vpop.permute.xlu0 %1697 }
 0x4e1   :  { %6722 = vmatprep.mubr.msk.f32.mxu1 %vm70_vm0, %v1711_v52 }
 0x4e2   :  { %v6699_v0 = vpop.f32.mrb[36].mxu0  ;;  %6723 = vmatmul.mubr.msk.f32.gmra.mrb[34].mxu1 %vm70_vm0, %v1712_v55 }
 0x4e3   :  { %v1658_v8 = vpop.f32.mrb[37].mxu0  ;;  %7522 = vmatpush3.bf16.msra.mxu1 %v8390_v12  ;;  %v1714_v60 = vsel %vm216_vm1, %v6699_v0, %v1696_v2 }
 0x4e4   :  { %v1713_v33 = vsel %vm216_vm1, %v1658_v8, %v1694_v31  ;;  %7524 = vmatprep.subr.bf16.mxu1 %v8424_v27 }
 0x4e5   :  { %6725 = vmatprep.mubr.msk.f32.mxu1 %vm70_vm0, %v1713_v33 }
 0x4e6   :  { %v6702_v59 = vpop.f32.mrb[38].mxu0  ;;  %6726 = vmatmul.mubr.msk.f32.gmra.mrb[36].mxu1 %vm70_vm0, %v1714_v60 }
 0x4e7   :  { %v1668_v37 = vpop.f32.mrb[39].mxu0  ;;  %7526 = vmatpush3.bf16.msra.mxu1 %v8424_v27  ;;  %v1716_v12 = vsel %vm216_vm1, %v6702_v59, %v1700_v11 }
 0x4e8   :  { %v1715_v10 = vsel %vm216_vm1, %v1668_v37, %v1698_v63  ;;  %7528 = vmatprep.subr.bf16.mxu1 %v8458_v50 }
 0x4e9   :  { %6728 = vmatprep.mubr.msk.f32.mxu1 %vm70_vm0, %v1715_v10 }
 0x4ea   :  { %6729 = vmatmul.mubr.msk.f32.gmra.mrb[38].mxu1 %vm70_vm0, %v1716_v12 }
 0x4eb   :  { %7530 = vmatpush3.bf16.msra.mxu1 %v8458_v50 }
 0x4ec   :  { %7548 = vmatprep.subr.bf16.mxu1 %v8371_v62 }
 0x5b1   :  { %v6721_v27 = vpop.f32.mrb[32].mxu1 }
 0x5b2   :  { %v1813_v22 = vadd.f32 %v6721_v27, %v5546_v34  ;;  %v1807_v1 = vpop.f32.mrb[33].mxu1 }
 0x5b3   :  { %v1808_v43 = vadd.f32 %v5546_v34, %v1807_v1 }
 0x5b4   :  { %v8862_v18 = vmax.f32 %v1813_v22, 0.0 }
 0x5b5   :  { %v8864_v52 = vmax.f32 %v1808_v43, 0.0  ;;  %v6724_v31 = vpop.f32.mrb[34].mxu1 }
 0x5b6   :  { %v1823_v55 = vadd.f32 %v6724_v31, %v5546_v34  ;;  %v1817_v2 = vpop.f32.mrb[35].mxu1  ;;  %v1855_v50 = vmul.f32 %v8862_v18, %v8862_v18 }
 0x5b7   :  { %v1818_v0 = vadd.f32 %v5546_v34, %v1817_v2  ;;  %v1854_v8 = vmul.f32 %v8864_v52, %v8864_v52 }
 0x5b8   :  { %v8870_v33 = vmax.f32 %v1823_v55, 0.0  ;;  %v1865_v60 = vsel %vm216_vm1, %v1855_v50, 0.0 }
 0x5b9   :  { %v8873_v59 = vmax.f32 %v1818_v0, 0.0  ;;  %1866 = vadd.xlane.f32.xlu1 %v1865_v60  ;;  %v6727_v63 = vpop.f32.mrb[36].mxu1  ;;  %v1862_v37 = vsel %vm216_vm1, %v1854_v8, 0.0 }
 0x5ba   :  { %v1833_v11 = vadd.f32 %v6727_v63, %v5546_v34  ;;  %1863 = vadd.xlane.f32.xlu0 %v1862_v37  ;;  %v1827_v10 = vpop.f32.mrb[37].mxu1  ;;  %v1857_v12 = vmul.f32 %v8870_v33, %v8870_v33 }
 0x5bb   :  { %v1828_v27 = vadd.f32 %v5546_v34, %v1827_v10  ;;  %v1856_v55 = vmul.f32 %v8873_v59, %v8873_v59 }
 0x5bc   :  { %v8878_v22 = vmax.f32 %v1833_v11, 0.0  ;;  %v1871_v1 = vsel %vm216_vm1, %v1857_v12, 0.0 }
 0x5bd   :  { %v8881_v43 = vmax.f32 %v1828_v27, 0.0  ;;  %v6730_v31 = vpop.f32.mrb[38].mxu1  ;;  %v1868_v11 = vsel %vm216_vm1, %v1856_v55, 0.0 }
 0x5be   :  { %v1843_v2 = vadd.f32 %v6730_v31, %v5546_v34  ;;  %1872 = vadd.xlane.f32.xlu0 %v1871_v1  ;;  %v1837_v50 = vpop.f32.mrb[39].mxu1  ;;  %v1859_v0 = vmul.f32 %v8878_v22, %v8878_v22 }
 0x5bf   :  { %v1838_v8 = vadd.f32 %v5546_v34, %v1837_v50  ;;  %v1858_v10 = vmul.f32 %v8881_v43, %v8881_v43 }
 0x5c0   :  { %v8887_v60 = vmax.f32 %v1843_v2, 0.0  ;;  %v1877_v63 = vsel %vm216_vm1, %v1859_v0, 0.0 }
 0x5c1   :  { %v8890_v37 = vmax.f32 %v1838_v8, 0.0  ;;  %1878 = vadd.xlane.f32.xlu1 %v1877_v63  ;;  %v1874_v34 = vsel %vm216_vm1, %v1858_v10, 0.0 }
 0x5c2   :  { %1869 = vadd.xlane.f32.xlu0 %v1868_v11  ;;  %v1861_v12 = vmul.f32 %v8887_v60, %v8887_v60 }
 0x5c3   :  { %v1860_v1 = vmul.f32 %v8890_v37, %v8890_v37 }
 0x5c4   :  { %v1883_v27 = vsel %vm216_vm1, %v1861_v12, 0.0 }
 0x5c5   :  { %1884 = vadd.xlane.f32.xlu1 %v1883_v27  ;;  %v1880_v31 = vsel %vm216_vm1, %v1860_v1, 0.0 }
 0x5c6   :  { %1875 = vadd.xlane.f32.xlu0 %v1874_v34 }
 0x5ca   :  { %1881 = vadd.xlane.f32.xlu0 %v1880_v31 }
 0x646   :  { %v1867_v55 = vpop.xlane.xlu1 %1866 }
 0x647   :  { %v1887_v2 = vmax.f32 %v1867_v55, 1e-24  ;;  %v1864_v50 = vpop.xlane.xlu0 %1863 }
 0x648   :  { %v1886_v0 = vmax.f32 %v1864_v50, 1e-24 }
 0x649   :  { %7856 = vrsqrt.f32 %v1887_v2 }
 0x64a   :  { %7858 = vrsqrt.f32 %v1886_v0 }
 0x64b   :  { %v1873_v8 = vpop.xlane.xlu0 %1872 }
 0x64c   :  { %v1889_v63 = vmax.f32 %v1873_v8, 1e-24 }
 0x64e   :  { %v1879_v11 = vpop.xlane.xlu1 %1878  ;;  %7860 = vrsqrt.f32 %v1889_v63 }
 0x64f   :  { %v1870_v12 = vpop.xlane.xlu0 %1869  ;;  %v1891_v27 = vmax.f32 %v1879_v11, 1e-24 }
 0x650   :  { %v1888_v10 = vmax.f32 %v1870_v12, 1e-24 }
 0x652   :  { %7862 = vrsqrt.f32 %v1888_v10  ;;  %v1885_v35 = vpop.xlane.xlu1 %1884 }
 0x653   :  { %v7857_v24 = vpop.eup %7856  ;;  %v1876_v34 = vpop.xlane.xlu0 %1875  ;;  %7864 = vrsqrt.f32 %v1891_v27  ;;  %v1893_v1 = vmax.f32 %v1885_v35, 1e-24 }
 0x654   :  { %v7859_v6 = vpop.eup %7858  ;;  %v1890_v31 = vmax.f32 %v1876_v34, 1e-24  ;;  %v1903_v55 = vmul.f32 %v7857_v24, %v8862_v18 }
 0x655   :  { %v1902_v2 = vmul.f32 %v7859_v6, %v8864_v52 }
 0x656   :  { %7866 = vrsqrt.f32 %v1890_v31  ;;  %2025 = vrot.lane.b32.xlu1 %v1903_v55, %s8027_s23 }
 0x657   :  { %2023 = vrot.lane.b32.xlu0 %v1902_v2, %s8027_s23  ;;  %v1882_v50 = vpop.xlane.xlu0 %1881  ;;  %v7499_v0 = vpack.c.bf16 %v1903_v55, %v1902_v2  ;;  %7868 = vrsqrt.f32 %v1893_v1 }
 0x658   :  { %v1892_v8 = vmax.f32 %v1882_v50, 1e-24  ;;  %v7861_v63 = vpop.eup %7860 }
 0x659   :  { %7500 = vmatprep.subr.bf16.mxu0 %v7499_v0  ;;  %v1905_v24 = vmul.f32 %v7861_v63, %v8870_v33 }
 0x65a   :  { %7870 = vrsqrt.f32 %v1892_v8  ;;  %7502 = vmatpush3.bf16.msra.mxu0 %v7499_v0 }
 0x65c   :  { %v7863_v11 = vpop.eup %7862 }
 0x65d   :  { %v1904_v35 = vmul.f32 %v7863_v11, %v8873_v59  ;;  %v7865_v18 = vpop.eup %7864 }
 0x65e   :  { %v1907_v27 = vmul.f32 %v7865_v18, %v8878_v22 }
 0x65f   :  { %2027 = vrot.lane.b32.xlu1 %v1904_v35, %s8027_s23  ;;  %v7503_v6 = vpack.c.bf16 %v1905_v24, %v1904_v35 }
 0x660   :  { %v7867_v52 = vpop.eup %7866 }
 0x661   :  { %7504 = vmatprep.subr.bf16.mxu0 %v7503_v6  ;;  %v1906_v12 = vmul.f32 %v7867_v52, %v8881_v43  ;;  %v7869_v10 = vpop.eup %7868 }
 0x662   :  { %7506 = vmatpush3.bf16.msra.mxu0 %v7503_v6  ;;  %v1909_v1 = vmul.f32 %v7869_v10, %v8887_v60 }
 0x663   :  { %2029 = vrot.lane.b32.xlu1 %v1905_v24, %s8027_s23  ;;  %2031 = vrot.lane.b32.xlu0 %v1906_v12, %s8027_s23  ;;  %v7507_v34 = vpack.c.bf16 %v1907_v27, %v1906_v12  ;;  %v5564_v12 = vld [vmem:[%s10388_s4 + $0x2] ss:$0 sm:$0xff] }
 0x664   :  { %v7871_v59 = vpop.eup %7870 }
 0x665   :  { %7508 = vmatprep.subr.bf16.mxu0 %v7507_v34  ;;  %v1908_v33 = vmul.f32 %v7871_v59, %v8890_v37 }
 0x666   :  { %7510 = vmatpush3.bf16.msra.mxu0 %v7507_v34 }
 0x667   :  { %2033 = vrot.lane.b32.xlu1 %v1907_v27, %s8027_s23  ;;  %2035 = vrot.lane.b32.xlu0 %v1908_v33, %s8027_s23  ;;  %v7511_v43 = vpack.c.bf16 %v1909_v1, %v1908_v33 }
 0x669   :  { %7512 = vmatprep.subr.bf16.mxu0 %v7511_v43 }
 0x66a   :  { %7514 = vmatpush3.bf16.msra.mxu0 %v7511_v43 }
 0x66b   :  { %2037 = vrot.lane.b32.xlu1 %v1909_v1, %s8027_s23 }
 0x66d   :  { %6748 = vmatmul.mubr.msk.f32.vlgmr.msra.gmra.mrb[40].mxu0 %vm70_vm0, %v8277_v39  ;;  %v8935_v39 = vld [vmem:[%s10386_s1] sm:$0xff] }
 0x66e   :  { %6750 = vmatprep.mubr.msk.f32.mxu0 %vm70_vm0, %v8284_v40 }
 0x671   :  { %6751 = vmatmul.mubr.msk.f32.gmra.mrb[42].mxu0 %vm70_vm0, %v8302_v44 }
 0x672   :  { %6753 = vmatprep.mubr.msk.f32.mxu0 %vm70_vm0, %v8308_v45 }
 0x675   :  { %6754 = vmatmul.mubr.msk.f32.gmra.mrb[44].mxu0 %vm70_vm0, %v8320_v47 }
 0x676   :  { %6756 = vmatprep.mubr.msk.f32.mxu0 %vm70_vm0, %v8326_v48 }
 0x679   :  { %6757 = vmatmul.mubr.msk.f32.gmra.mrb[46].mxu0 %vm70_vm0, %v8336_v49 }
 0x67a   :  { %6803 = vmatprep.mubr.msk.f32.mxu0 %vm70_vm0, %v8935_v39 }
 0x6c8   :  { %v2026_v40 = vpop.permute.xlu1 %2025 }
 0x6c9   :  { %v2024_v22 = vpop.permute.xlu0 %2023 }
 0x6d1   :  { %v2028_v44 = vpop.permute.xlu1 %2027 }
 0x6d5   :  { %v2030_v47 = vpop.permute.xlu1 %2029  ;;  %v2032_v2 = vpop.permute.xlu0 %2031 }
 0x6d9   :  { %v2034_v0 = vpop.permute.xlu1 %2033  ;;  %v2036_v24 = vpop.permute.xlu0 %2035 }
 0x6dd   :  { %v2038_v6 = vpop.permute.xlu1 %2037 }
 0x740   :  { %v6749_v45 = vpop.f32.mrb[40].mxu0 }
 0x741   :  { %v1976_v60 = vpop.f32.mrb[41].mxu0  ;;  %v2048_v48 = vsel %vm216_vm1, %v6749_v45, %v2026_v40 }
 0x742   :  { %v2047_v37 = vsel %vm216_vm1, %v1976_v60, %v2024_v22 }
 0x743   :  { %6775 = vmatprep.mubr.msk.f32.mxu1 %vm70_vm0, %v2047_v37 }
 0x744   :  { %v6752_v49 = vpop.f32.mrb[42].mxu0  ;;  %6776 = vmatmul.mubr.msk.f32.vlgmr.msra.gmra.mrb[40].mxu1 %vm70_vm0, %v2048_v48 }
 0x745   :  { %v1986_v31 = vpop.f32.mrb[43].mxu0  ;;  %7550 = vmatpush3.bf16.msra.mxu1 %v8371_v62  ;;  %v2050_v50 = vsel %vm216_vm1, %v6752_v49, %v2030_v47 }
 0x746   :  { %v2049_v55 = vsel %vm216_vm1, %v1986_v31, %v2028_v44  ;;  %7552 = vmatprep.subr.bf16.mxu1 %v8392_v16 }
 0x747   :  { %6778 = vmatprep.mubr.msk.f32.mxu1 %vm70_vm0, %v2049_v55 }
 0x748   :  { %v6755_v8 = vpop.f32.mrb[44].mxu0  ;;  %6779 = vmatmul.mubr.msk.f32.gmra.mrb[42].mxu1 %vm70_vm0, %v2050_v50 }
 0x749   :  { %v1996_v63 = vpop.f32.mrb[45].mxu0  ;;  %7554 = vmatpush3.bf16.msra.mxu1 %v8392_v16  ;;  %v2052_v62 = vsel %vm216_vm1, %v6755_v8, %v2034_v0 }
 0x74a   :  { %v2051_v11 = vsel %vm216_vm1, %v1996_v63, %v2032_v2  ;;  %7556 = vmatprep.subr.bf16.mxu1 %v8426_v28 }
 0x74b   :  { %6781 = vmatprep.mubr.msk.f32.mxu1 %vm70_vm0, %v2051_v11 }
 0x74c   :  { %v6758_v35 = vpop.f32.mrb[46].mxu0  ;;  %6782 = vmatmul.mubr.msk.f32.gmra.mrb[44].mxu1 %vm70_vm0, %v2052_v62 }
 0x74d   :  { %v2006_v18 = vpop.f32.mrb[47].mxu0  ;;  %7558 = vmatpush3.bf16.msra.mxu1 %v8426_v28  ;;  %v2054_v16 = vsel %vm216_vm1, %v6758_v35, %v2038_v6 }
 0x74e   :  { %v2053_v52 = vsel %vm216_vm1, %v2006_v18, %v2036_v24  ;;  %7560 = vmatprep.subr.bf16.mxu1 %v8460_v51 }
 0x74f   :  { %6784 = vmatprep.mubr.msk.f32.mxu1 %vm70_vm0, %v2053_v52 }
 0x750   :  { %6785 = vmatmul.mubr.msk.f32.gmra.mrb[46].mxu1 %vm70_vm0, %v2054_v16 }
 0x751   :  { %7562 = vmatpush3.bf16.msra.mxu1 %v8460_v51 }
 0x752   :  { %7580 = vmatprep.subr.bf16.mxu1 %v8499_v3 }
 0x817   :  { %v6777_v28 = vpop.f32.mrb[40].mxu1 }
 0x818   :  { %v2151_v27 = vadd.f32 %v6777_v28, %v5564_v12  ;;  %v2145_v10 = vpop.f32.mrb[41].mxu1 }
 0x819   :  { %v2146_v34 = vadd.f32 %v5564_v12, %v2145_v10 }
 0x81a   :  { %v8966_v59 = vmax.f32 %v2151_v27, 0.0 }
 0x81b   :  { %v8968_v33 = vmax.f32 %v2146_v34, 0.0  ;;  %v6780_v1 = vpop.f32.mrb[42].mxu1 }
 0x81c   :  { %v2161_v43 = vadd.f32 %v6780_v1, %v5564_v12  ;;  %v2155_v40 = vpop.f32.mrb[43].mxu1  ;;  %v2193_v51 = vmul.f32 %v8966_v59, %v8966_v59 }
 0x81d   :  { %v2156_v44 = vadd.f32 %v5564_v12, %v2155_v40  ;;  %v2192_v45 = vmul.f32 %v8968_v33, %v8968_v33 }
 0x81e   :  { %v8974_v22 = vmax.f32 %v2161_v43, 0.0  ;;  %v2203_v60 = vsel %vm216_vm1, %v2193_v51, 0.0 }
 0x81f   :  { %v8977_v47 = vmax.f32 %v2156_v44, 0.0  ;;  %2204 = vadd.xlane.f32.xlu1 %v2203_v60  ;;  %v6783_v37 = vpop.f32.mrb[44].mxu1  ;;  %v2200_v48 = vsel %vm216_vm1, %v2192_v45, 0.0 }
 0x820   :  { %v2171_v49 = vadd.f32 %v6783_v37, %v5564_v12  ;;  %2201 = vadd.xlane.f32.xlu0 %v2200_v48  ;;  %v2165_v31 = vpop.f32.mrb[45].mxu1  ;;  %v2195_v55 = vmul.f32 %v8974_v22, %v8974_v22 }
 0x821   :  { %v2166_v2 = vadd.f32 %v5564_v12, %v2165_v31  ;;  %v2194_v11 = vmul.f32 %v8977_v47, %v8977_v47 }
 0x822   :  { %v8982_v50 = vmax.f32 %v2171_v49, 0.0  ;;  %v2209_v0 = vsel %vm216_vm1, %v2195_v55, 0.0 }
 0x823   :  { %v8985_v8 = vmax.f32 %v2166_v2, 0.0  ;;  %v6786_v63 = vpop.f32.mrb[46].mxu1  ;;  %v2206_v28 = vsel %vm216_vm1, %v2194_v11, 0.0 }
 0x824   :  { %v2181_v62 = vadd.f32 %v6786_v63, %v5564_v12  ;;  %2210 = vadd.xlane.f32.xlu0 %v2209_v0  ;;  %v2175_v35 = vpop.f32.mrb[47].mxu1  ;;  %v2197_v24 = vmul.f32 %v8982_v50, %v8982_v50 }
 0x825   :  { %v2176_v18 = vadd.f32 %v5564_v12, %v2175_v35  ;;  %v2196_v27 = vmul.f32 %v8985_v8, %v8985_v8 }
 0x826   :  { %v8991_v6 = vmax.f32 %v2181_v62, 0.0  ;;  %v2215_v52 = vsel %vm216_vm1, %v2197_v24, 0.0 }
 0x827   :  { %v8994_v16 = vmax.f32 %v2176_v18, 0.0  ;;  %2216 = vadd.xlane.f32.xlu1 %v2215_v52  ;;  %v2212_v12 = vsel %vm216_vm1, %v2196_v27, 0.0 }
 0x828   :  { %2207 = vadd.xlane.f32.xlu0 %v2206_v28  ;;  %v2199_v10 = vmul.f32 %v8991_v6, %v8991_v6 }
 0x829   :  { %v2198_v1 = vmul.f32 %v8994_v16, %v8994_v16 }
 0x82a   :  { %v2221_v34 = vsel %vm216_vm1, %v2199_v10, 0.0 }
 0x82b   :  { %2222 = vadd.xlane.f32.xlu1 %v2221_v34  ;;  %v2218_v43 = vsel %vm216_vm1, %v2198_v1, 0.0 }
 0x82c   :  { %2213 = vadd.xlane.f32.xlu0 %v2212_v12 }
 0x830   :  { %2219 = vadd.xlane.f32.xlu0 %v2218_v43 }
 0x8ac   :  { %v2205_v40 = vpop.xlane.xlu1 %2204 }
 0x8ad   :  { %v2225_v51 = vmax.f32 %v2205_v40, 1e-24  ;;  %v2202_v44 = vpop.xlane.xlu0 %2201 }
 0x8ae   :  { %v2224_v45 = vmax.f32 %v2202_v44, 1e-24 }
 0x8af   :  { %7872 = vrsqrt.f32 %v2225_v51 }
 0x8b0   :  { %7874 = vrsqrt.f32 %v2224_v45 }
 0x8b1   :  { %v2211_v60 = vpop.xlane.xlu0 %2210 }
 0x8b2   :  { %v2227_v37 = vmax.f32 %v2211_v60, 1e-24 }
 0x8b4   :  { %v2217_v48 = vpop.xlane.xlu1 %2216  ;;  %7876 = vrsqrt.f32 %v2227_v37  ;;  %v9046_v37 = vld [vmem:[%s10386_s1 + $0x20] sm:$0xff] }
 0x8b5   :  { %v2208_v49 = vpop.xlane.xlu0 %2207  ;;  %v2229_v31 = vmax.f32 %v2217_v48, 1e-24  ;;  %v9053_v48 = vld [vmem:[%s10386_s1 + $0x28] sm:$0xff] }
 0x8b6   :  { %v2226_v55 = vmax.f32 %v2208_v49, 1e-24  ;;  %v9060_v49 = vld [vmem:[%s10386_s1 + $0x30] sm:$0xff] }
 0x8b8   :  { %7878 = vrsqrt.f32 %v2226_v55  ;;  %v2223_v2 = vpop.xlane.xlu1 %2222 }
 0x8b9   :  { %v7873_v0 = vpop.eup %7872  ;;  %v2214_v63 = vpop.xlane.xlu0 %2213  ;;  %7880 = vrsqrt.f32 %v2229_v31  ;;  %v2231_v62 = vmax.f32 %v2223_v2, 1e-24  ;;  %v9067_v31 = vld [vmem:[%s10386_s1 + $0x38] sm:$0xff] }
 0x8ba   :  { %v7875_v11 = vpop.eup %7874  ;;  %v2228_v35 = vmax.f32 %v2214_v63, 1e-24  ;;  %v2241_v24 = vmul.f32 %v7873_v0, %v8966_v59 }
 0x8bb   :  { %v2240_v18 = vmul.f32 %v7875_v11, %v8968_v33 }
 0x8bc   :  { %7882 = vrsqrt.f32 %v2228_v35  ;;  %2363 = vrot.lane.b32.xlu1 %v2241_v24, %s8027_s23 }
 0x8bd   :  { %2361 = vrot.lane.b32.xlu0 %v2240_v18, %s8027_s23  ;;  %v2220_v52 = vpop.xlane.xlu0 %2219  ;;  %v7531_v28 = vpack.c.bf16 %v2241_v24, %v2240_v18  ;;  %7884 = vrsqrt.f32 %v2231_v62 }
 0x8be   :  { %v2230_v27 = vmax.f32 %v2220_v52, 1e-24  ;;  %v7877_v10 = vpop.eup %7876 }
 0x8bf   :  { %7532 = vmatprep.subr.bf16.mxu0 %v7531_v28  ;;  %v2243_v59 = vmul.f32 %v7877_v10, %v8974_v22 }
 0x8c0   :  { %7886 = vrsqrt.f32 %v2230_v27  ;;  %7534 = vmatpush3.bf16.msra.mxu0 %v7531_v28 }
 0x8c2   :  { %v7879_v34 = vpop.eup %7878 }
 0x8c3   :  { %v2242_v12 = vmul.f32 %v7879_v34, %v8977_v47  ;;  %v7881_v1 = vpop.eup %7880 }
 0x8c4   :  { %v2245_v51 = vmul.f32 %v7881_v1, %v8982_v50  ;;  %v9025_v50 = vld [vmem:[%s10386_s1 + $0x8] sm:$0xff] }
 0x8c5   :  { %2365 = vrot.lane.b32.xlu1 %v2242_v12, %s8027_s23  ;;  %v7535_v33 = vpack.c.bf16 %v2243_v59, %v2242_v12 }
 0x8c6   :  { %v7883_v43 = vpop.eup %7882 }
 0x8c7   :  { %7536 = vmatprep.subr.bf16.mxu0 %v7535_v33  ;;  %v2244_v40 = vmul.f32 %v7883_v43, %v8985_v8  ;;  %v7885_v44 = vpop.eup %7884 }
 0x8c8   :  { %7538 = vmatpush3.bf16.msra.mxu0 %v7535_v33  ;;  %v2247_v60 = vmul.f32 %v7885_v44, %v8991_v6  ;;  %v9032_v6 = vld [vmem:[%s10386_s1 + $0x10] sm:$0xff] }
 0x8c9   :  { %2367 = vrot.lane.b32.xlu1 %v2243_v59, %s8027_s23  ;;  %2369 = vrot.lane.b32.xlu0 %v2244_v40, %s8027_s23  ;;  %v7539_v45 = vpack.c.bf16 %v2245_v51, %v2244_v40 }
 0x8ca   :  { %v7887_v47 = vpop.eup %7886 }
 0x8cb   :  { %7540 = vmatprep.subr.bf16.mxu0 %v7539_v45  ;;  %v2246_v22 = vmul.f32 %v7887_v47, %v8994_v16  ;;  %v9039_v16 = vld [vmem:[%s10386_s1 + $0x18] sm:$0xff] }
 0x8cc   :  { %7542 = vmatpush3.bf16.msra.mxu0 %v7539_v45  ;;  %v9100_v45 = vld [vmem:[%s10388_s4 + $0x3] ss:$0 sm:$0xff] }
 0x8cd   :  { %2371 = vrot.lane.b32.xlu1 %v2245_v51, %s8027_s23  ;;  %2373 = vrot.lane.b32.xlu0 %v2246_v22, %s8027_s23  ;;  %v7543_v8 = vpack.c.bf16 %v2247_v60, %v2246_v22 }
 0x8cf   :  { %7544 = vmatprep.subr.bf16.mxu0 %v7543_v8 }
 0x8d0   :  { %7546 = vmatpush3.bf16.msra.mxu0 %v7543_v8 }
 0x8d1   :  { %2375 = vrot.lane.b32.xlu1 %v2247_v60, %s8027_s23 }
 0x8d3   :  { %6804 = vmatmul.mubr.msk.f32.vlgmr.msra.gmra.mrb[48].mxu0 %vm70_vm0, %v9025_v50 }
 0x8d4   :  { %6806 = vmatprep.mubr.msk.f32.mxu0 %vm70_vm0, %v9032_v6 }
 0x8d7   :  { %6807 = vmatmul.mubr.msk.f32.gmra.mrb[50].mxu0 %vm70_vm0, %v9039_v16 }
 0x8d8   :  { %6809 = vmatprep.mubr.msk.f32.mxu0 %vm70_vm0, %v9046_v37 }
 0x8db   :  { %6810 = vmatmul.mubr.msk.f32.gmra.mrb[52].mxu0 %vm70_vm0, %v9053_v48 }
 0x8dc   :  { %6812 = vmatprep.mubr.msk.f32.mxu0 %vm70_vm0, %v9060_v49 }
 0x8df   :  { %6813 = vmatmul.mubr.msk.f32.gmra.mrb[54].mxu0 %vm70_vm0, %v9067_v31 }
 0x8e0   :  { %6859 = vmatprep.mubr.msk.f32.mxu0 %vm70_vm0, %v8935_v39 }
 0x92e   :  { %v2364_v55 = vpop.permute.xlu1 %2363 }
 0x92f   :  { %v2362_v63 = vpop.permute.xlu0 %2361 }
 0x937   :  { %v2366_v2 = vpop.permute.xlu1 %2365 }
 0x93b   :  { %v2368_v62 = vpop.permute.xlu1 %2367  ;;  %v2370_v27 = vpop.permute.xlu0 %2369 }
 0x93f   :  { %v2372_v34 = vpop.permute.xlu1 %2371  ;;  %v2374_v43 = vpop.permute.xlu0 %2373 }
 0x943   :  { %v2376_v51 = vpop.permute.xlu1 %2375 }
 0x9a6   :  { %v6805_v0 = vpop.f32.mrb[48].mxu0 }
 0x9a7   :  { %v2314_v11 = vpop.f32.mrb[49].mxu0  ;;  %v2386_v24 = vsel %vm216_vm1, %v6805_v0, %v2364_v55 }
 0x9a8   :  { %v2385_v35 = vsel %vm216_vm1, %v2314_v11, %v2362_v63 }
 0x9a9   :  { %6831 = vmatprep.mubr.msk.f32.mxu1 %vm70_vm0, %v2385_v35 }
 0x9aa   :  { %v6808_v18 = vpop.f32.mrb[50].mxu0  ;;  %6832 = vmatmul.mubr.msk.f32.vlgmr.msra.gmra.mrb[48].mxu1 %vm70_vm0, %v2386_v24 }
 0x9ab   :  { %v2324_v52 = vpop.f32.mrb[51].mxu0  ;;  %7582 = vmatpush3.bf16.msra.mxu1 %v8499_v3  ;;  %v2388_v10 = vsel %vm216_vm1, %v6808_v18, %v2368_v62 }
 0x9ac   :  { %v2387_v28 = vsel %vm216_vm1, %v2324_v52, %v2366_v2  ;;  %7584 = vmatprep.subr.bf16.mxu1 %v8527_v17 }
 0x9ad   :  { %6834 = vmatprep.mubr.msk.f32.mxu1 %vm70_vm0, %v2387_v28 }
 0x9ae   :  { %v6811_v12 = vpop.f32.mrb[52].mxu0  ;;  %6835 = vmatmul.mubr.msk.f32.gmra.mrb[50].mxu1 %vm70_vm0, %v2388_v10 }
 0x9af   :  { %v2334_v59 = vpop.f32.mrb[53].mxu0  ;;  %7586 = vmatpush3.bf16.msra.mxu1 %v8527_v17  ;;  %v2390_v3 = vsel %vm216_vm1, %v6811_v12, %v2372_v34 }
 0x9b0   :  { %v2389_v1 = vsel %vm216_vm1, %v2334_v59, %v2370_v27  ;;  %7588 = vmatprep.subr.bf16.mxu1 %v8554_v29 }
 0x9b1   :  { %6837 = vmatprep.mubr.msk.f32.mxu1 %vm70_vm0, %v2389_v1 }
 0x9b2   :  { %v6814_v33 = vpop.f32.mrb[54].mxu0  ;;  %6838 = vmatmul.mubr.msk.f32.gmra.mrb[52].mxu1 %vm70_vm0, %v2390_v3 }
 0x9b3   :  { %v2344_v40 = vpop.f32.mrb[55].mxu0  ;;  %7590 = vmatpush3.bf16.msra.mxu1 %v8554_v29  ;;  %v2392_v17 = vsel %vm216_vm1, %v6814_v33, %v2376_v51 }
 0x9b4   :  { %v2391_v44 = vsel %vm216_vm1, %v2344_v40, %v2374_v43  ;;  %7592 = vmatprep.subr.bf16.mxu1 %v8582_v38 }
 0x9b5   :  { %6840 = vmatprep.mubr.msk.f32.mxu1 %vm70_vm0, %v2391_v44 }
 0x9b6   :  { %6841 = vmatmul.mubr.msk.f32.gmra.mrb[54].mxu1 %vm70_vm0, %v2392_v17 }
 0x9b7   :  { %7594 = vmatpush3.bf16.msra.mxu1 %v8582_v38 }
 0x9b8   :  { %7612 = vmatprep.subr.bf16.mxu1 %v8501_v5 }
 0xa7d   :  { %v6833_v29 = vpop.f32.mrb[48].mxu1 }
 0xa7e   :  { %v2489_v47 = vadd.f32 %v6833_v29, %v9100_v45  ;;  %v2483_v22 = vpop.f32.mrb[49].mxu1 }
 0xa7f   :  { %v2484_v60 = vadd.f32 %v9100_v45, %v2483_v22 }
 0xa80   :  { %v9104_v8 = vmax.f32 %v2489_v47, 0.0 }
 0xa81   :  { %v9106_v55 = vmax.f32 %v2484_v60, 0.0  ;;  %v6836_v2 = vpop.f32.mrb[50].mxu1 }
 0xa82   :  { %v2499_v38 = vadd.f32 %v6836_v2, %v9100_v45  ;;  %v2493_v0 = vpop.f32.mrb[51].mxu1  ;;  %v2531_v63 = vmul.f32 %v9104_v8, %v9104_v8 }
 0xa83   :  { %v2494_v11 = vadd.f32 %v9100_v45, %v2493_v0  ;;  %v2530_v62 = vmul.f32 %v9106_v55, %v9106_v55 }
 0xa84   :  { %v9114_v35 = vmax.f32 %v2499_v38, 0.0  ;;  %v2541_v24 = vsel %vm216_vm1, %v2531_v63, 0.0 }
 0xa85   :  { %v9117_v18 = vmax.f32 %v2494_v11, 0.0  ;;  %2542 = vadd.xlane.f32.xlu1 %v2541_v24  ;;  %v6839_v52 = vpop.f32.mrb[52].mxu1  ;;  %v2538_v28 = vsel %vm216_vm1, %v2530_v62, 0.0 }
 0xa86   :  { %v2509_v27 = vadd.f32 %v6839_v52, %v9100_v45  ;;  %2539 = vadd.xlane.f32.xlu0 %v2538_v28  ;;  %v2503_v10 = vpop.f32.mrb[53].mxu1  ;;  %v2533_v34 = vmul.f32 %v9114_v35, %v9114_v35 }
 0xa87   :  { %v2504_v12 = vadd.f32 %v9100_v45, %v2503_v10  ;;  %v2532_v43 = vmul.f32 %v9117_v18, %v9117_v18 }
 0xa88   :  { %v9124_v59 = vmax.f32 %v2509_v27, 0.0  ;;  %v2547_v1 = vsel %vm216_vm1, %v2533_v34, 0.0 }
 0xa89   :  { %v9127_v3 = vmax.f32 %v2504_v12, 0.0  ;;  %v6842_v33 = vpop.f32.mrb[54].mxu1  ;;  %v2544_v60 = vsel %vm216_vm1, %v2532_v43, 0.0 }
 0xa8a   :  { %v2519_v40 = vadd.f32 %v6842_v33, %v9100_v45  ;;  %2548 = vadd.xlane.f32.xlu0 %v2547_v1  ;;  %v2513_v51 = vpop.f32.mrb[55].mxu1  ;;  %v2535_v44 = vmul.f32 %v9124_v59, %v9124_v59 }
 0xa8b   :  { %v2514_v17 = vadd.f32 %v9100_v45, %v2513_v51  ;;  %v2534_v2 = vmul.f32 %v9127_v3, %v9127_v3 }
 0xa8c   :  { %v9135_v29 = vmax.f32 %v2519_v40, 0.0  ;;  %v2553_v47 = vsel %vm216_vm1, %v2535_v44, 0.0 }
 0xa8d   :  { %v9138_v22 = vmax.f32 %v2514_v17, 0.0  ;;  %2554 = vadd.xlane.f32.xlu1 %v2553_v47  ;;  %v2550_v63 = vsel %vm216_vm1, %v2534_v2, 0.0 }
 0xa8e   :  { %2545 = vadd.xlane.f32.xlu0 %v2544_v60  ;;  %v2537_v38 = vmul.f32 %v9135_v29, %v9135_v29 }
 0xa8f   :  { %v2536_v11 = vmul.f32 %v9138_v22, %v9138_v22 }
 0xa90   :  { %v2559_v0 = vsel %vm216_vm1, %v2537_v38, 0.0 }
 0xa91   :  { %2560 = vadd.xlane.f32.xlu1 %v2559_v0  ;;  %v2556_v62 = vsel %vm216_vm1, %v2536_v11, 0.0 }
 0xa92   :  { %2551 = vadd.xlane.f32.xlu0 %v2550_v63 }
 0xa96   :  { %2557 = vadd.xlane.f32.xlu0 %v2556_v62 }
 0xb12   :  { %v2543_v24 = vpop.xlane.xlu1 %2542 }
 0xb13   :  { %v2563_v52 = vmax.f32 %v2543_v24, 1e-24  ;;  %v2540_v28 = vpop.xlane.xlu0 %2539 }
 0xb14   :  { %v2562_v27 = vmax.f32 %v2540_v28, 1e-24 }
 0xb15   :  { %7888 = vrsqrt.f32 %v2563_v52 }
 0xb16   :  { %7890 = vrsqrt.f32 %v2562_v27 }
 0xb17   :  { %v2549_v10 = vpop.xlane.xlu0 %2548 }
 0xb18   :  { %v2565_v34 = vmax.f32 %v2549_v10, 1e-24 }
 0xb1a   :  { %v2555_v12 = vpop.xlane.xlu1 %2554  ;;  %7892 = vrsqrt.f32 %v2565_v34 }
 0xb1b   :  { %v2546_v1 = vpop.xlane.xlu0 %2545  ;;  %v2567_v33 = vmax.f32 %v2555_v12, 1e-24 }
 0xb1c   :  { %v2564_v43 = vmax.f32 %v2546_v1, 1e-24 }
 0xb1e   :  { %7894 = vrsqrt.f32 %v2564_v43  ;;  %v2561_v40 = vpop.xlane.xlu1 %2560 }
 0xb1f   :  { %v7889_v51 = vpop.eup %7888  ;;  %v2552_v44 = vpop.xlane.xlu0 %2551  ;;  %7896 = vrsqrt.f32 %v2567_v33  ;;  %v2569_v47 = vmax.f32 %v2561_v40, 1e-24 }
 0xb20   :  { %v7891_v17 = vpop.eup %7890  ;;  %v2566_v60 = vmax.f32 %v2552_v44, 1e-24  ;;  %v2579_v2 = vmul.f32 %v7889_v51, %v9104_v8 }
 0xb21   :  { %v2578_v38 = vmul.f32 %v7891_v17, %v9106_v55 }
 0xb22   :  { %7898 = vrsqrt.f32 %v2566_v60  ;;  %2701 = vrot.lane.b32.xlu1 %v2579_v2, %s8027_s23 }
 0xb23   :  { %2699 = vrot.lane.b32.xlu0 %v2578_v38, %s8027_s23  ;;  %v2558_v0 = vpop.xlane.xlu0 %2557  ;;  %v7563_v63 = vpack.c.bf16 %v2579_v2, %v2578_v38  ;;  %7900 = vrsqrt.f32 %v2569_v47 }
 0xb24   :  { %v2568_v11 = vmax.f32 %v2558_v0, 1e-24  ;;  %v7893_v62 = vpop.eup %7892 }
 0xb25   :  { %7564 = vmatprep.subr.bf16.mxu0 %v7563_v63  ;;  %v2581_v8 = vmul.f32 %v7893_v62, %v9114_v35 }
 0xb26   :  { %7902 = vrsqrt.f32 %v2568_v11  ;;  %7566 = vmatpush3.bf16.msra.mxu0 %v7563_v63 }
 0xb28   :  { %v7895_v24 = vpop.eup %7894 }
 0xb29   :  { %v2580_v52 = vmul.f32 %v7895_v24, %v9117_v18  ;;  %v7897_v28 = vpop.eup %7896 }
 0xb2a   :  { %v2583_v34 = vmul.f32 %v7897_v28, %v9124_v59 }
 0xb2b   :  { %2703 = vrot.lane.b32.xlu1 %v2580_v52, %s8027_s23  ;;  %v7567_v55 = vpack.c.bf16 %v2581_v8, %v2580_v52 }
 0xb2c   :  { %v7899_v27 = vpop.eup %7898 }
 0xb2d   :  { %7568 = vmatprep.subr.bf16.mxu0 %v7567_v55  ;;  %v2582_v10 = vmul.f32 %v7899_v27, %v9127_v3  ;;  %v7901_v12 = vpop.eup %7900 }
 0xb2e   :  { %7570 = vmatpush3.bf16.msra.mxu0 %v7567_v55  ;;  %v2585_v33 = vmul.f32 %v7901_v12, %v9135_v29 }
 0xb2f   :  { %2705 = vrot.lane.b32.xlu1 %v2581_v8, %s8027_s23  ;;  %2707 = vrot.lane.b32.xlu0 %v2582_v10, %s8027_s23  ;;  %v7571_v1 = vpack.c.bf16 %v2583_v34, %v2582_v10  ;;  %v9208_v10 = vld [vmem:[%s10388_s4 + $0x4] ss:$0 sm:$0xff] }
 0xb30   :  { %v7903_v18 = vpop.eup %7902 }
 0xb31   :  { %7572 = vmatprep.subr.bf16.mxu0 %v7571_v1  ;;  %v2584_v35 = vmul.f32 %v7903_v18, %v9138_v22 }
 0xb32   :  { %7574 = vmatpush3.bf16.msra.mxu0 %v7571_v1 }
 0xb33   :  { %2709 = vrot.lane.b32.xlu1 %v2583_v34, %s8027_s23  ;;  %2711 = vrot.lane.b32.xlu0 %v2584_v35, %s8027_s23  ;;  %v7575_v3 = vpack.c.bf16 %v2585_v33, %v2584_v35 }
 0xb35   :  { %7576 = vmatprep.subr.bf16.mxu0 %v7575_v3 }
 0xb36   :  { %7578 = vmatpush3.bf16.msra.mxu0 %v7575_v3 }
 0xb37   :  { %2713 = vrot.lane.b32.xlu1 %v2585_v33, %s8027_s23 }
 0xb39   :  { %6860 = vmatmul.mubr.msk.f32.vlgmr.msra.gmra.mrb[56].mxu0 %vm70_vm0, %v9025_v50 }
 0xb3a   :  { %6862 = vmatprep.mubr.msk.f32.mxu0 %vm70_vm0, %v9032_v6 }
 0xb3d   :  { %6863 = vmatmul.mubr.msk.f32.gmra.mrb[58].mxu0 %vm70_vm0, %v9039_v16 }
 0xb3e   :  { %6865 = vmatprep.mubr.msk.f32.mxu0 %vm70_vm0, %v9046_v37 }
 0xb41   :  { %6866 = vmatmul.mubr.msk.f32.gmra.mrb[60].mxu0 %vm70_vm0, %v9053_v48 }
 0xb42   :  { %6868 = vmatprep.mubr.msk.f32.mxu0 %vm70_vm0, %v9060_v49 }
 0xb45   :  { %6869 = vmatmul.mubr.msk.f32.gmra.mrb[62].mxu0 %vm70_vm0, %v9067_v31 }
 0xb46   :  { %6915 = vmatprep.mubr.msk.f32.mxu0 %vm70_vm0, %v8935_v39 }
 0xb94   :  { %v2702_v59 = vpop.permute.xlu1 %2701 }
 0xb95   :  { %v2700_v43 = vpop.permute.xlu0 %2699 }
 0xb9d   :  { %v2704_v29 = vpop.permute.xlu1 %2703 }
 0xba1   :  { %v2706_v51 = vpop.permute.xlu1 %2705  ;;  %v2708_v38 = vpop.permute.xlu0 %2707 }
 0xba5   :  { %v2710_v63 = vpop.permute.xlu1 %2709  ;;  %v2712_v8 = vpop.permute.xlu0 %2711 }
 0xba9   :  { %v2714_v55 = vpop.permute.xlu1 %2713 }
 0xc0c   :  { %v6861_v22 = vpop.f32.mrb[56].mxu0 }
 0xc0d   :  { %v2652_v40 = vpop.f32.mrb[57].mxu0  ;;  %v2724_v17 = vsel %vm216_vm1, %v6861_v22, %v2702_v59 }
 0xc0e   :  { %v2723_v44 = vsel %vm216_vm1, %v2652_v40, %v2700_v43 }
 0xc0f   :  { %6887 = vmatprep.mubr.msk.f32.mxu1 %vm70_vm0, %v2723_v44 }
 0xc10   :  { %v6864_v47 = vpop.f32.mrb[58].mxu0  ;;  %6888 = vmatmul.mubr.msk.f32.vlgmr.msra.gmra.mrb[56].mxu1 %vm70_vm0, %v2724_v17 }
 0xc11   :  { %v2662_v60 = vpop.f32.mrb[59].mxu0  ;;  %7614 = vmatpush3.bf16.msra.mxu1 %v8501_v5  ;;  %v2726_v0 = vsel %vm216_vm1, %v6864_v47, %v2706_v51 }
 0xc12   :  { %v2725_v2 = vsel %vm216_vm1, %v2662_v60, %v2704_v29  ;;  %7616 = vmatprep.subr.bf16.mxu1 %v8531_v19 }
 0xc13   :  { %6890 = vmatprep.mubr.msk.f32.mxu1 %vm70_vm0, %v2725_v2 }
 0xc14   :  { %v6867_v11 = vpop.f32.mrb[60].mxu0  ;;  %6891 = vmatmul.mubr.msk.f32.gmra.mrb[58].mxu1 %vm70_vm0, %v2726_v0 }
 0xc15   :  { %v2672_v62 = vpop.f32.mrb[61].mxu0  ;;  %7618 = vmatpush3.bf16.msra.mxu1 %v8531_v19  ;;  %v2728_v5 = vsel %vm216_vm1, %v6867_v11, %v2710_v63 }
 0xc16   :  { %v2727_v24 = vsel %vm216_vm1, %v2672_v62, %v2708_v38  ;;  %7620 = vmatprep.subr.bf16.mxu1 %v8559_v30 }
 0xc17   :  { %6893 = vmatprep.mubr.msk.f32.mxu1 %vm70_vm0, %v2727_v24 }
 0xc18   :  { %v6870_v52 = vpop.f32.mrb[62].mxu0  ;;  %6894 = vmatmul.mubr.msk.f32.gmra.mrb[60].mxu1 %vm70_vm0, %v2728_v5 }
 0xc19   :  { %v2682_v28 = vpop.f32.mrb[63].mxu0  ;;  %7622 = vmatpush3.bf16.msra.mxu1 %v8559_v30  ;;  %v2730_v19 = vsel %vm216_vm1, %v6870_v52, %v2714_v55 }
 0xc1a   :  { %v2729_v27 = vsel %vm216_vm1, %v2682_v28, %v2712_v8  ;;  %7624 = vmatprep.subr.bf16.mxu1 %v8587_v42 }
 0xc1b   :  { %6896 = vmatprep.mubr.msk.f32.mxu1 %vm70_vm0, %v2729_v27 }
 0xc1c   :  { %6897 = vmatmul.mubr.msk.f32.gmra.mrb[62].mxu1 %vm70_vm0, %v2730_v19 }
 0xc1d   :  { %7626 = vmatpush3.bf16.msra.mxu1 %v8587_v42 }
 0xce3   :  { %v6889_v34 = vpop.f32.mrb[56].mxu1 }
 0xce4   :  { %v2827_v30 = vadd.f32 %v6889_v34, %v9208_v10  ;;  %v2821_v12 = vpop.f32.mrb[57].mxu1 }
 0xce5   :  { %v2822_v1 = vadd.f32 %v9208_v10, %v2821_v12 }
 0xce6   :  { %v9212_v18 = vmax.f32 %v2827_v30, 0.0 }
 0xce7   :  { %v9214_v35 = vmax.f32 %v2822_v1, 0.0  ;;  %v6892_v33 = vpop.f32.mrb[58].mxu1 }
 0xce8   :  { %v2837_v3 = vadd.f32 %v6892_v33, %v9208_v10  ;;  %v2831_v59 = vpop.f32.mrb[59].mxu1  ;;  %v2869_v42 = vmul.f32 %v9212_v18, %v9212_v18 }
 0xce9   :  { %v2832_v29 = vadd.f32 %v9208_v10, %v2831_v59  ;;  %v2868_v22 = vmul.f32 %v9214_v35, %v9214_v35 }
 0xcea   :  { %v9222_v43 = vmax.f32 %v2837_v3, 0.0  ;;  %v2879_v40 = vsel %vm216_vm1, %v2869_v42, 0.0 }
 0xceb   :  { %v9225_v51 = vmax.f32 %v2832_v29, 0.0  ;;  %2880 = vadd.xlane.f32.xlu1 %v2879_v40  ;;  %v6895_v44 = vpop.f32.mrb[60].mxu1  ;;  %v2876_v17 = vsel %vm216_vm1, %v2868_v22, 0.0 }
 0xcec   :  { %v2847_v47 = vadd.f32 %v6895_v44, %v9208_v10  ;;  %2877 = vadd.xlane.f32.xlu0 %v2876_v17  ;;  %v2841_v60 = vpop.f32.mrb[61].mxu1  ;;  %v2871_v2 = vmul.f32 %v9222_v43, %v9222_v43 }
 0xced   :  { %v2842_v38 = vadd.f32 %v9208_v10, %v2841_v60  ;;  %v2870_v24 = vmul.f32 %v9225_v51, %v9225_v51 }
 0xcee   :  { %v9232_v0 = vmax.f32 %v2847_v47, 0.0  ;;  %v2885_v63 = vsel %vm216_vm1, %v2871_v2, 0.0 }
 0xcef   :  { %v9235_v11 = vmax.f32 %v2842_v38, 0.0  ;;  %v6898_v62 = vpop.f32.mrb[62].mxu1  ;;  %v2882_v34 = vsel %vm216_vm1, %v2870_v24, 0.0 }
 0xcf0   :  { %v2857_v5 = vadd.f32 %v6898_v62, %v9208_v10  ;;  %2886 = vadd.xlane.f32.xlu0 %v2885_v63  ;;  %v2851_v52 = vpop.f32.mrb[63].mxu1  ;;  %v2873_v8 = vmul.f32 %v9232_v0, %v9232_v0 }
 0xcf1   :  { %v2852_v28 = vadd.f32 %v9208_v10, %v2851_v52  ;;  %v2872_v30 = vmul.f32 %v9235_v11, %v9235_v11 }
 0xcf2   :  { %v9243_v55 = vmax.f32 %v2857_v5, 0.0  ;;  %v2891_v27 = vsel %vm216_vm1, %v2873_v8, 0.0 }
 0xcf3   :  { %v9246_v19 = vmax.f32 %v2852_v28, 0.0  ;;  %2892 = vadd.xlane.f32.xlu1 %v2891_v27  ;;  %v2888_v33 = vsel %vm216_vm1, %v2872_v30, 0.0 }
 0xcf4   :  { %2883 = vadd.xlane.f32.xlu0 %v2882_v34  ;;  %v2875_v12 = vmul.f32 %v9243_v55, %v9243_v55 }
 0xcf5   :  { %v2874_v3 = vmul.f32 %v9246_v19, %v9246_v19 }
 0xcf6   :  { %v2897_v1 = vsel %vm216_vm1, %v2875_v12, 0.0 }
 0xcf7   :  { %2898 = vadd.xlane.f32.xlu1 %v2897_v1  ;;  %v2894_v59 = vsel %vm216_vm1, %v2874_v3, 0.0 }
 0xcf8   :  { %2889 = vadd.xlane.f32.xlu0 %v2888_v33 }
 0xcfc   :  { %2895 = vadd.xlane.f32.xlu0 %v2894_v59 }
 0xd78   :  { %v2881_v42 = vpop.xlane.xlu1 %2880 }
 0xd79   :  { %v2901_v29 = vmax.f32 %v2881_v42, 1e-24  ;;  %v2878_v22 = vpop.xlane.xlu0 %2877 }
 0xd7a   :  { %v2900_v40 = vmax.f32 %v2878_v22, 1e-24 }
 0xd7b   :  { %7904 = vrsqrt.f32 %v2901_v29 }
 0xd7c   :  { %7906 = vrsqrt.f32 %v2900_v40 }
 0xd7d   :  { %v2887_v44 = vpop.xlane.xlu0 %2886 }
 0xd7e   :  { %v2903_v17 = vmax.f32 %v2887_v44, 1e-24 }
 0xd80   :  { %v2893_v47 = vpop.xlane.xlu1 %2892  ;;  %7908 = vrsqrt.f32 %v2903_v17 }
 0xd81   :  { %v2884_v60 = vpop.xlane.xlu0 %2883  ;;  %v2905_v2 = vmax.f32 %v2893_v47, 1e-24 }
 0xd82   :  { %v2902_v38 = vmax.f32 %v2884_v60, 1e-24 }
 0xd84   :  { %7910 = vrsqrt.f32 %v2902_v38  ;;  %v2899_v63 = vpop.xlane.xlu1 %2898 }
 0xd85   :  { %v7905_v62 = vpop.eup %7904  ;;  %v2890_v24 = vpop.xlane.xlu0 %2889  ;;  %7912 = vrsqrt.f32 %v2905_v2  ;;  %v2907_v52 = vmax.f32 %v2899_v63, 1e-24 }
 0xd86   :  { %v7907_v5 = vpop.eup %7906  ;;  %v2904_v8 = vmax.f32 %v2890_v24, 1e-24  ;;  %v2917_v28 = vmul.f32 %v7905_v62, %v9212_v18 }
 0xd87   :  { %v2916_v27 = vmul.f32 %v7907_v5, %v9214_v35 }
 0xd88   :  { %7914 = vrsqrt.f32 %v2904_v8  ;;  %3039 = vrot.lane.b32.xlu1 %v2917_v28, %s8027_s23 }
 0xd89   :  { %3037 = vrot.lane.b32.xlu0 %v2916_v27, %s8027_s23  ;;  %v2896_v34 = vpop.xlane.xlu0 %2895  ;;  %v7595_v30 = vpack.c.bf16 %v2917_v28, %v2916_v27  ;;  %7916 = vrsqrt.f32 %v2907_v52 }
 0xd8a   :  { %v2906_v12 = vmax.f32 %v2896_v34, 1e-24  ;;  %v7909_v1 = vpop.eup %7908 }
 0xd8b   :  { %7596 = vmatprep.subr.bf16.mxu0 %v7595_v30  ;;  %v2919_v18 = vmul.f32 %v7909_v1, %v9222_v43 }
 0xd8c   :  { %7918 = vrsqrt.f32 %v2906_v12  ;;  %7598 = vmatpush3.bf16.msra.mxu0 %v7595_v30 }
 0xd8e   :  { %v7911_v33 = vpop.eup %7910 }
 0xd8f   :  { %v2918_v3 = vmul.f32 %v7911_v33, %v9225_v51  ;;  %v7913_v59 = vpop.eup %7912 }
 0xd90   :  { %v2921_v22 = vmul.f32 %v7913_v59, %v9232_v0 }
 0xd91   :  { %3041 = vrot.lane.b32.xlu1 %v2918_v3, %s8027_s23  ;;  %v7599_v35 = vpack.c.bf16 %v2919_v18, %v2918_v3 }
 0xd92   :  { %v7915_v42 = vpop.eup %7914 }
 0xd93   :  { %7600 = vmatprep.subr.bf16.mxu0 %v7599_v35  ;;  %v2920_v29 = vmul.f32 %v7915_v42, %v9235_v11  ;;  %v7917_v40 = vpop.eup %7916 }
 0xd94   :  { %7602 = vmatpush3.bf16.msra.mxu0 %v7599_v35  ;;  %v2923_v17 = vmul.f32 %v7917_v40, %v9243_v55  ;;  %v9309_v35 = vld [vmem:[%s10388_s4 + $0x5] ss:$0 sm:$0xff] }
 0xd95   :  { %3043 = vrot.lane.b32.xlu1 %v2919_v18, %s8027_s23  ;;  %3045 = vrot.lane.b32.xlu0 %v2920_v29, %s8027_s23  ;;  %v7603_v44 = vpack.c.bf16 %v2921_v22, %v2920_v29 }
 0xd96   :  { %v7919_v51 = vpop.eup %7918 }
 0xd97   :  { %7604 = vmatprep.subr.bf16.mxu0 %v7603_v44  ;;  %v2922_v43 = vmul.f32 %v7919_v51, %v9246_v19 }
 0xd98   :  { %7606 = vmatpush3.bf16.msra.mxu0 %v7603_v44 }
 0xd99   :  { %3047 = vrot.lane.b32.xlu1 %v2921_v22, %s8027_s23  ;;  %3049 = vrot.lane.b32.xlu0 %v2922_v43, %s8027_s23  ;;  %v7607_v11 = vpack.c.bf16 %v2923_v17, %v2922_v43 }
 0xd9b   :  { %7608 = vmatprep.subr.bf16.mxu0 %v7607_v11 }
 0xd9c   :  { %7610 = vmatpush3.bf16.msra.mxu0 %v7607_v11 }
 0xd9d   :  { %3051 = vrot.lane.b32.xlu1 %v2923_v17, %s8027_s23 }
 0xd9f   :  { %6916 = vmatmul.mubr.msk.f32.vlgmr.msra.gmra.mrb[64].mxu0 %vm70_vm0, %v9025_v50 }
 0xda0   :  { %6918 = vmatprep.mubr.msk.f32.mxu0 %vm70_vm0, %v9032_v6 }
 0xda3   :  { %6919 = vmatmul.mubr.msk.f32.gmra.mrb[66].mxu0 %vm70_vm0, %v9039_v16 }
 0xda4   :  { %6921 = vmatprep.mubr.msk.f32.mxu0 %vm70_vm0, %v9046_v37 }
 0xda7   :  { %6922 = vmatmul.mubr.msk.f32.gmra.mrb[68].mxu0 %vm70_vm0, %v9053_v48 }
 0xda8   :  { %6924 = vmatprep.mubr.msk.f32.mxu0 %vm70_vm0, %v9060_v49 }
 0xdab   :  { %6925 = vmatmul.mubr.msk.f32.gmra.mrb[70].mxu0 %vm70_vm0, %v9067_v31 }
 0xdac   :  { %6971 = vmatprep.mubr.msk.f32.mxu0 %vm70_vm0, %v8935_v39 }
 0xdfa   :  { %v3040_v0 = vpop.permute.xlu1 %3039 }
 0xdfb   :  { %v3038_v47 = vpop.permute.xlu0 %3037 }
 0xe03   :  { %v3042_v55 = vpop.permute.xlu1 %3041 }
 0xe07   :  { %v3044_v2 = vpop.permute.xlu1 %3043  ;;  %v3046_v52 = vpop.permute.xlu0 %3045 }
 0xe0b   :  { %v3048_v8 = vpop.permute.xlu1 %3047  ;;  %v3050_v1 = vpop.permute.xlu0 %3049 }
 0xe0f   :  { %v3052_v3 = vpop.permute.xlu1 %3051 }
 0xe72   :  { %v6917_v19 = vpop.f32.mrb[64].mxu0 }
 0xe73   :  { %v2990_v60 = vpop.f32.mrb[65].mxu0  ;;  %v3062_v63 = vsel %vm216_vm1, %v6917_v19, %v3040_v0 }
 0xe74   :  { %v3061_v38 = vsel %vm216_vm1, %v2990_v60, %v3038_v47 }
 0xe75   :  { %6943 = vmatprep.mubr.msk.f32.mxu1 %vm70_vm0, %v3061_v38 }
 0xe76   :  { %v6920_v62 = vpop.f32.mrb[66].mxu0  ;;  %6944 = vmatmul.mubr.msk.f32.vlgmr.msra.gmra.mrb[64].mxu1 %vm70_vm0, %v3062_v63 }
 0xe77   :  { %v3000_v24 = vpop.f32.mrb[67].mxu0  ;;  %v3064_v39 = vsel %vm216_vm1, %v6920_v62, %v3044_v2 }
 0xe78   :  { %v3063_v5 = vsel %vm216_vm1, %v3000_v24, %v3042_v55 }
 0xe79   :  { %6946 = vmatprep.mubr.msk.f32.mxu1 %vm70_vm0, %v3063_v5 }
 0xe7a   :  { %v6923_v28 = vpop.f32.mrb[68].mxu0  ;;  %6947 = vmatmul.mubr.msk.f32.gmra.mrb[66].mxu1 %vm70_vm0, %v3064_v39 }
 0xe7b   :  { %v3010_v27 = vpop.f32.mrb[69].mxu0  ;;  %v3066_v30 = vsel %vm216_vm1, %v6923_v28, %v3048_v8 }
 0xe7c   :  { %v3065_v34 = vsel %vm216_vm1, %v3010_v27, %v3046_v52 }
 0xe7d   :  { %6949 = vmatprep.mubr.msk.f32.mxu1 %vm70_vm0, %v3065_v34 }
 0xe7e   :  { %v6926_v12 = vpop.f32.mrb[70].mxu0  ;;  %6950 = vmatmul.mubr.msk.f32.gmra.mrb[68].mxu1 %vm70_vm0, %v3066_v30 }
 0xe7f   :  { %v3020_v33 = vpop.f32.mrb[71].mxu0  ;;  %v3068_v59 = vsel %vm216_vm1, %v6926_v12, %v3052_v3 }
 0xe80   :  { %v3067_v18 = vsel %vm216_vm1, %v3020_v33, %v3050_v1 }
 0xe81   :  { %6952 = vmatprep.mubr.msk.f32.mxu1 %vm70_vm0, %v3067_v18 }
 0xe82   :  { %6953 = vmatmul.mubr.msk.f32.gmra.mrb[70].mxu1 %vm70_vm0, %v3068_v59 }
 0xf49   :  { %v6945_v42 = vpop.f32.mrb[64].mxu1 }
 0xf4a   :  { %v3165_v29 = vadd.f32 %v6945_v42, %v9309_v35  ;;  %v3159_v22 = vpop.f32.mrb[65].mxu1 }
 0xf4b   :  { %v3160_v40 = vadd.f32 %v9309_v35, %v3159_v22 }
 0xf4c   :  { %v9313_v44 = vmax.f32 %v3165_v29, 0.0 }
 0xf4d   :  { %v9315_v51 = vmax.f32 %v3160_v40, 0.0  ;;  %v6948_v43 = vpop.f32.mrb[66].mxu1 }
 0xf4e   :  { %v3207_v17 = vmul.f32 %v9313_v44, %v9313_v44  ;;  %v3175_v11 = vadd.f32 %v6948_v43, %v9309_v35  ;;  %v3169_v0 = vpop.f32.mrb[67].mxu1 }
 0xf4f   :  { %v3170_v55 = vadd.f32 %v9309_v35, %v3169_v0  ;;  %v3206_v19 = vmul.f32 %v9315_v51, %v9315_v51 }
 0xf50   :  { %v9323_v47 = vmax.f32 %v3175_v11, 0.0  ;;  %v3217_v60 = vsel %vm216_vm1, %v3207_v17, 0.0 }
 0xf51   :  { %v9326_v2 = vmax.f32 %v3170_v55, 0.0  ;;  %3218 = vadd.xlane.f32.xlu1 %v3217_v60  ;;  %v6951_v38 = vpop.f32.mrb[68].mxu1  ;;  %v3214_v63 = vsel %vm216_vm1, %v3206_v19, 0.0 }
 0xf52   :  { %v3185_v62 = vadd.f32 %v6951_v38, %v9309_v35  ;;  %3215 = vadd.xlane.f32.xlu0 %v3214_v63  ;;  %v3179_v24 = vpop.f32.mrb[69].mxu1  ;;  %v3209_v5 = vmul.f32 %v9323_v47, %v9323_v47 }
 0xf53   :  { %v3180_v52 = vadd.f32 %v9309_v35, %v3179_v24  ;;  %v3208_v28 = vmul.f32 %v9326_v2, %v9326_v2 }
 0xf54   :  { %v9333_v39 = vmax.f32 %v3185_v62, 0.0  ;;  %v3223_v8 = vsel %vm216_vm1, %v3209_v5, 0.0 }
 0xf55   :  { %v9338_v27 = vmax.f32 %v3180_v52, 0.0  ;;  %v6954_v34 = vpop.f32.mrb[70].mxu1  ;;  %v3220_v29 = vsel %vm216_vm1, %v3208_v28, 0.0 }
 0xf56   :  { %v3211_v30 = vmul.f32 %v9333_v39, %v9333_v39  ;;  %v3195_v12 = vadd.f32 %v6954_v34, %v9309_v35  ;;  %3224 = vadd.xlane.f32.xlu0 %v3223_v8  ;;  %v3189_v1 = vpop.f32.mrb[71].mxu1 }
 0xf57   :  { %v3190_v33 = vadd.f32 %v9309_v35, %v3189_v1  ;;  %v3210_v59 = vmul.f32 %v9338_v27, %v9338_v27 }
 0xf58   :  { %v9344_v3 = vmax.f32 %v3195_v12, 0.0  ;;  %v3229_v18 = vsel %vm216_vm1, %v3211_v30, 0.0 }
 0xf59   :  { %v9349_v42 = vmax.f32 %v3190_v33, 0.0  ;;  %3230 = vadd.xlane.f32.xlu1 %v3229_v18  ;;  %v3226_v17 = vsel %vm216_vm1, %v3210_v59, 0.0 }
 0xf5a   :  { %v3213_v22 = vmul.f32 %v9344_v3, %v9344_v3  ;;  %3221 = vadd.xlane.f32.xlu0 %v3220_v29 }
 0xf5b   :  { %v3212_v43 = vmul.f32 %v9349_v42, %v9349_v42 }
 0xf5c   :  { %v3235_v40 = vsel %vm216_vm1, %v3213_v22, 0.0 }
 0xf5d   :  { %3236 = vadd.xlane.f32.xlu1 %v3235_v40  ;;  %v3232_v11 = vsel %vm216_vm1, %v3212_v43, 0.0 }
 0xf5e   :  { %3227 = vadd.xlane.f32.xlu0 %v3226_v17 }
 0xf62   :  { %3233 = vadd.xlane.f32.xlu0 %v3232_v11 }
 0xfde   :  { %v3219_v0 = vpop.xlane.xlu1 %3218 }
 0xfdf   :  { %v3239_v55 = vmax.f32 %v3219_v0, 1e-24  ;;  %v3216_v19 = vpop.xlane.xlu0 %3215 }
 0xfe0   :  { %v3238_v60 = vmax.f32 %v3216_v19, 1e-24 }
 0xfe1   :  { %7920 = vrsqrt.f32 %v3239_v55 }
 0xfe2   :  { %7922 = vrsqrt.f32 %v3238_v60 }
 0xfe3   :  { %v3225_v38 = vpop.xlane.xlu0 %3224 }
 0xfe4   :  { %v3241_v63 = vmax.f32 %v3225_v38, 1e-24 }
 0xfe6   :  { %v3231_v62 = vpop.xlane.xlu1 %3230  ;;  %7924 = vrsqrt.f32 %v3241_v63  ;;  %v3560_v63 = vld [vmem:[%s10389_s7 + $0x8] sm:$0xff] }
 0xfe7   :  { %v3222_v24 = vpop.xlane.xlu0 %3221  ;;  %v3243_v5 = vmax.f32 %v3231_v62, 1e-24 }
 0xfe8   :  { %v3240_v52 = vmax.f32 %v3222_v24, 1e-24 }
 0xfea   :  { %7926 = vrsqrt.f32 %v3240_v52  ;;  %v3237_v8 = vpop.xlane.xlu1 %3236  ;;  %v3562_v52 = vld [vmem:[%s10389_s7 + $0x18] sm:$0xff] }
 0xfeb   :  { %v7921_v28 = vpop.eup %7920  ;;  %v3228_v34 = vpop.xlane.xlu0 %3227  ;;  %7928 = vrsqrt.f32 %v3243_v5  ;;  %v3245_v12 = vmax.f32 %v3237_v8, 1e-24  ;;  %v3561_v5 = vld [vmem:[%s10389_s7 + $0x10] sm:$0xff] }
 0xfec   :  { %v7923_v30 = vpop.eup %7922  ;;  %v3242_v1 = vmax.f32 %v3228_v34, 1e-24  ;;  %v3255_v33 = vmul.f32 %v7921_v28, %v9313_v44 }
 0xfed   :  { %v3254_v18 = vmul.f32 %v7923_v30, %v9315_v51 }
 0xfee   :  { %7930 = vrsqrt.f32 %v3242_v1  ;;  %3377 = vrot.lane.b32.xlu1 %v3255_v33, %s8027_s23 }
 0xfef   :  { %3375 = vrot.lane.b32.xlu0 %v3254_v18, %s8027_s23  ;;  %v3234_v59 = vpop.xlane.xlu0 %3233  ;;  %v7627_v29 = vpack.c.bf16 %v3255_v33, %v3254_v18  ;;  %7932 = vrsqrt.f32 %v3245_v12 }
 0xff0   :  { %v3244_v22 = vmax.f32 %v3234_v59, 1e-24  ;;  %v7925_v40 = vpop.eup %7924 }
 0xff1   :  { %7628 = vmatprep.subr.bf16.mxu0 %v7627_v29  ;;  %v3257_v44 = vmul.f32 %v7925_v40, %v9323_v47  ;;  %v3559_v47 = vld [vmem:[%s10389_s7] sm:$0xff] }
 0xff2   :  { %7934 = vrsqrt.f32 %v3244_v22  ;;  %7630 = vmatpush3.bf16.msra.mxu0 %v7627_v29  ;;  %v9380_v24 = vpack.c.bf16 %v3560_v63, %v3559_v47  ;;  %v10465_v22 = vld [vmem:[#allocation9_spill] sm:$0xff] }
 0xff4   :  { %v7927_v43 = vpop.eup %7926 }
 0xff5   :  { %v3256_v17 = vmul.f32 %v7927_v43, %v9326_v2  ;;  %v7929_v11 = vpop.eup %7928 }
 0xff6   :  { %v3259_v19 = vmul.f32 %v7929_v11, %v9333_v39  ;;  %v10466_v11 = vld [vmem:[#allocation7_spill] sm:$0xff] }
 0xff7   :  { %3379 = vrot.lane.b32.xlu1 %v3256_v17, %s8027_s23  ;;  %v7631_v51 = vpack.c.bf16 %v3257_v44, %v3256_v17 }
 0xff8   :  { %v7931_v0 = vpop.eup %7930 }
 0xff9   :  { %7632 = vmatprep.subr.bf16.mxu0 %v7631_v51  ;;  %v3258_v55 = vmul.f32 %v7931_v0, %v9338_v27  ;;  %v7933_v60 = vpop.eup %7932 }
 0xffa   :  { %7634 = vmatpush3.bf16.msra.mxu0 %v7631_v51  ;;  %v3261_v39 = vmul.f32 %v7933_v60, %v9344_v3  ;;  %v9390_v3 = vpack.c.bf16 %v3562_v52, %v3561_v5  ;;  %v10467_v60 = vld [vmem:[#allocation13_spill] sm:$0xff] }
 0xffb   :  { %3381 = vrot.lane.b32.xlu1 %v3257_v44, %s8027_s23  ;;  %3383 = vrot.lane.b32.xlu0 %v3258_v55, %s8027_s23  ;;  %v7635_v38 = vpack.c.bf16 %v3259_v19, %v3258_v55 }
 0xffc   :  { %v7935_v2 = vpop.eup %7934 }
 0xffd   :  { %7636 = vmatprep.subr.bf16.mxu0 %v7635_v38  ;;  %v3260_v27 = vmul.f32 %v7935_v2, %v9349_v42 }
 0xffe   :  { %7638 = vmatpush3.bf16.msra.mxu0 %v7635_v38 }
 0xfff   :  { %3385 = vrot.lane.b32.xlu1 %v3259_v19, %s8027_s23  ;;  %3387 = vrot.lane.b32.xlu0 %v3260_v27, %s8027_s23  ;;  %v7639_v62 = vpack.c.bf16 %v3261_v39, %v3260_v27  ;;  %v10468_v27 = vld [vmem:[#allocation11_spill] sm:$0xff] }
0x1001   :  { %7640 = vmatprep.subr.bf16.mxu0 %v7639_v62 }
0x1002   :  { %7642 = vmatpush3.bf16.msra.mxu0 %v7639_v62 }
0x1003   :  { %3389 = vrot.lane.b32.xlu1 %v3261_v39, %s8027_s23  ;;  %7660 = vmatprep.subr.bf16.mxu0 %v9380_v24 }
0x1005   :  { %6972 = vmatmul.mubr.msk.f32.vlgmr.msra.gmra.mrb[72].mxu0 %vm70_vm0, %v9025_v50  ;;  %v8024_v50 = vld [vmem:[%s10388_s4 + $0x1] ss:$0 sm:$0xff] }
0x1006   :  { %6974 = vmatprep.mubr.msk.f32.mxu0 %vm70_vm0, %v9032_v6  ;;  %7662 = vmatpush3.bf16.msra.mxu0 %v9380_v24  ;;  %v726_v6 = vadd.f32 %v8024_v50, %v8653_v26  ;;  %v741_v26 = vadd.f32 %v8024_v50, %v8659_v56  ;;  %v761_v8 = vadd.f32 %v8024_v50, %v8684_v41  ;;  %v10464_v41 = vld [vmem:[#allocation3_spill] sm:$0xff] }
0x1007   :  { %7664 = vmatprep.subr.bf16.mxu0 %v9390_v3 }
0x1008   :  { %v9469_v1 = vmax.f32 %v761_v8, 0.0 }
0x1009   :  { %6975 = vmatmul.mubr.msk.f32.gmra.mrb[74].mxu0 %vm70_vm0, %v9039_v16  ;;  %v9415_v16 = vmax.f32 %v726_v6, 0.0 }
0x100a   :  { %6977 = vmatprep.mubr.msk.f32.mxu0 %vm70_vm0, %v9046_v37  ;;  %7666 = vmatpush3.bf16.msra.mxu0 %v9390_v3  ;;  %v736_v37 = vadd.f32 %v8024_v50, %v8661_v58  ;;  %v9432_v58 = vmax.f32 %v741_v26, 0.0  ;;  %v779_v17 = vmul.f32 %v9469_v1, %v9469_v1 }
0x100b   :  { %10455 = vst [vmem:[#allocation43_spill] sm:$0xff] %v9415_v16 }
0x100c   :  { %10457 = vst [vmem:[#allocation45_spill] sm:$0xff] %v9432_v58  ;;  %v801_v62 = vsel %vm216_vm1, %v779_v17, 0.0 }
0x100d   :  { %6978 = vmatmul.mubr.msk.f32.gmra.mrb[76].mxu0 %vm70_vm0, %v9053_v48  ;;  %v772_v48 = vmul.f32 %v9415_v16, %v9415_v16 }
0x100e   :  { %6980 = vmatprep.mubr.msk.f32.mxu0 %vm70_vm0, %v9060_v49  ;;  %v9425_v49 = vmax.f32 %v736_v37, 0.0 }
0x100f   :  { %v780_v56 = vsel %vm216_vm1, %v772_v48, 0.0 }
0x1010   :  { %10456 = vst [vmem:[#allocation44_spill] sm:$0xff] %v9425_v49 }
0x1011   :  { %6981 = vmatmul.mubr.msk.f32.gmra.mrb[78].mxu0 %vm70_vm0, %v9067_v31 }
0x1012   :  { %7019 = vmatprep.mubr.msk.f32.mxu0 %vm216_vm1, %v8197_v4  ;;  %v731_v4 = vadd.f32 %v8024_v50, %v8651_v46 }
0x1014   :  { %v9440_v31 = vmax.f32 %v731_v4, 0.0  ;;  %v10470_v4 = vld [vmem:[#allocation15_spill] sm:$0xff] }
0x1015   :  { %7020 = vmatmul.mubr.msk.f32.vlgmr.msra.gmra.mrb[80].mxu0 %vm216_vm1, %v8202_v9  ;;  %v774_v9 = vmul.f32 %v9425_v49, %v9425_v49 }
0x1016   :  { %7022 = vmatprep.mubr.msk.f32.mxu0 %vm216_vm1, %v8209_v13  ;;  %v746_v13 = vadd.f32 %v8024_v50, %v8675_v21  ;;  %10458 = vst [vmem:[#allocation46_spill] sm:$0xff] %v9440_v31  ;;  %v756_v21 = vadd.f32 %v8024_v50, %v8688_v54  ;;  %v773_v42 = vmul.f32 %v9440_v31, %v9440_v31  ;;  %v8025_v54 = vld [vmem:[%s10388_s4 + $0x2] ss:$0 sm:$0xff] }
0x1017   :  { %v917_v33 = vadd.f32 %v8025_v54, %v10464_v41  ;;  %v922_v40 = vadd.f32 %v8025_v54, %v10465_v22  ;;  %v927_v51 = vadd.f32 %v8025_v54, %v10466_v11  ;;  %v932_v38 = vadd.f32 %v8025_v54, %v10467_v60 }
0x1018   :  { %v9447_v46 = vmax.f32 %v746_v13, 0.0  ;;  %v9460_v28 = vmax.f32 %v756_v21, 0.0  ;;  %v783_v18 = vsel %vm216_vm1, %v773_v42, 0.0  ;;  %v937_v39 = vadd.f32 %v8025_v54, %v10468_v27  ;;  %v10472_v42 = vld [vmem:[#allocation4_spill] sm:$0xff] }
0x1019   :  { %7023 = vmatmul.mubr.msk.f32.gmra.mrb[82].mxu0 %vm216_vm1, %v8212_v14  ;;  %v751_v14 = vadd.f32 %v8024_v50, %v8672_v7  ;;  %v9481_v44 = vmax.f32 %v917_v33, 0.0  ;;  %v9487_v19 = vmax.f32 %v922_v40, 0.0  ;;  %v9493_v63 = vmax.f32 %v927_v51, 0.0  ;;  %v10469_v50 = vld [vmem:[#allocation17_spill] sm:$0xff]  ;;  %v10475_v51 = vld [vmem:[#allocation14_spill] sm:$0xff] }
0x101a   :  { %7025 = vmatprep.mubr.msk.f32.mxu0 %vm216_vm1, %v8215_v15  ;;  %v775_v15 = vmul.f32 %v9432_v58, %v9432_v58  ;;  %10459 = vst [vmem:[#allocation47_spill] sm:$0xff] %v9447_v46  ;;  %10461 = vst [vmem:[#allocation49_spill] sm:$0xff] %v9460_v28  ;;  %v778_v59 = vmul.f32 %v9460_v28, %v9460_v28  ;;  %v9499_v52 = vmax.f32 %v932_v38, 0.0  ;;  %v9505_v26 = vmax.f32 %v937_v39, 0.0 }
0x101b   :  { %v9455_v7 = vmax.f32 %v751_v14, 0.0  ;;  %v959_v47 = vmul.f32 %v9481_v44, %v9481_v44  ;;  %v960_v5 = vmul.f32 %v9487_v19, %v9487_v19  ;;  %v942_v6 = vadd.f32 %v8025_v54, %v10469_v50 }
0x101c   :  { %v789_v30 = vsel %vm216_vm1, %v775_v15, 0.0  ;;  %v798_v2 = vsel %vm216_vm1, %v778_v59, 0.0  ;;  %v961_v48 = vmul.f32 %v9493_v63, %v9493_v63  ;;  %v962_v15 = vmul.f32 %v9499_v52, %v9499_v52  ;;  %v10474_v59 = vld [vmem:[#allocation8_spill] sm:$0xff] }
0x101d   :  { %7026 = vmatmul.mubr.msk.f32.gmra.mrb[84].mxu0 %vm216_vm1, %v8233_v23  ;;  %v786_v23 = vsel %vm216_vm1, %v774_v9, 0.0  ;;  %10460 = vst [vmem:[#allocation48_spill] sm:$0xff] %v9455_v7  ;;  %v777_v12 = vmul.f32 %v9455_v7, %v9455_v7  ;;  %v947_v9 = vadd.f32 %v8025_v54, %v10470_v4  ;;  %v969_v13 = vsel %vm216_vm1, %v959_v47, 0.0  ;;  %v10478_v4 = vld [vmem:[#allocation16_spill] sm:$0xff] }
0x101e   :  { %781 = vadd.xlane.f32.xlu0 %v780_v56  ;;  %7028 = vmatprep.mubr.msk.f32.mxu0 %vm216_vm1, %v8239_v25  ;;  %v776_v25 = vmul.f32 %v9447_v46, %v9447_v46  ;;  %v10471_v56 = vld [vmem:[#allocation6_spill] sm:$0xff]  ;;  %v9513_v21 = vmax.f32 %v942_v6, 0.0  ;;  %v1103_v8 = vadd.f32 %v10472_v42, %v9100_v45  ;;  %v978_v33 = vsel %vm216_vm1, %v962_v15, 0.0  ;;  %v10479_v15 = vld [vmem:[#allocation21_spill] sm:$0xff] }
0x101f   :  { %v795_v0 = vsel %vm216_vm1, %v777_v12, 0.0  ;;  %v1098_v14 = vadd.f32 %v9100_v45, %v10471_v56  ;;  %v10473_v12 = vld [vmem:[#allocation10_spill] sm:$0xff] }
0x1020   :  { %v792_v43 = vsel %vm216_vm1, %v776_v25, 0.0  ;;  %v963_v25 = vmul.f32 %v9505_v26, %v9505_v26  ;;  %v964_v45 = vmul.f32 %v9513_v21, %v9513_v21 }
0x1021   :  { %7029 = vmatmul.mubr.msk.f32.gmra.mrb[86].mxu0 %vm216_vm1, %v8254_v32  ;;  %v10462_v32 = vld [vmem:[#allocation5_spill] sm:$0xff] }
0x1022   :  { %787 = vadd.xlane.f32.xlu0 %v786_v23  ;;  %v912_v34 = vadd.f32 %v8025_v54, %v10462_v32  ;;  %10463 = vst [vmem:[#allocation5_spill] sm:$0xff] %v9469_v1  ;;  %v972_v23 = vsel %vm216_vm1, %v960_v5, 0.0  ;;  %v9520_v54 = vmax.f32 %v947_v9, 0.0  ;;  %v975_v32 = vsel %vm216_vm1, %v961_v48, 0.0  ;;  %v10477_v5 = vld [vmem:[#allocation18_spill] sm:$0xff] }
0x1024   :  { %v9475_v29 = vmax.f32 %v912_v34, 0.0  ;;  %v9523_v34 = vmax.f32 %v1098_v14, 0.0  ;;  %v965_v40 = vmul.f32 %v9520_v54, %v9520_v54 }
0x1026   :  { %790 = vadd.xlane.f32.xlu0 %v789_v30  ;;  %v958_v55 = vmul.f32 %v9475_v29, %v9475_v29  ;;  %v8026_v30 = vld [vmem:[%s10388_s4 + $0x3] ss:$0 sm:$0xff]  ;;  %v1144_v17 = vmul.f32 %v9523_v34, %v9523_v34  ;;  %v987_v27 = vsel %vm216_vm1, %v965_v40, 0.0 }
0x1027   :  { %784 = vadd.xlane.f32.xlu1 %v783_v18  ;;  %v1108_v41 = vadd.f32 %v8026_v30, %v10473_v12  ;;  %v9532_v18 = vmax.f32 %v1103_v8, 0.0  ;;  %v1113_v22 = vadd.f32 %v8026_v30, %v10474_v59  ;;  %v1128_v50 = vadd.f32 %v8026_v30, %v10477_v5 }
0x1028   :  { %v966_v37 = vsel %vm216_vm1, %v958_v55, 0.0  ;;  %v984_v55 = vsel %vm216_vm1, %v964_v45, 0.0  ;;  %v1152_v6 = vsel %vm216_vm1, %v1144_v17, 0.0  ;;  %v1133_v9 = vadd.f32 %v8026_v30, %v10478_v4  ;;  %v10482_v17 = vld [vmem:[#allocation23_spill] sm:$0xff] }
0x1029   :  { %v9540_v11 = vmax.f32 %v1108_v41, 0.0  ;;  %v1145_v60 = vmul.f32 %v9532_v18, %v9532_v18  ;;  %v9546_v38 = vmax.f32 %v1113_v22, 0.0  ;;  %v9564_v14 = vmax.f32 %v1128_v50, 0.0  ;;  %v10484_v4 = vld [vmem:[#allocation27_spill] sm:$0xff] }
0x102a   :  { %793 = vadd.xlane.f32.xlu0 %v792_v43  ;;  %v981_v43 = vsel %vm216_vm1, %v963_v25, 0.0  ;;  %v9571_v25 = vmax.f32 %v1133_v9, 0.0  ;;  %v1309_v9 = vadd.f32 %v10484_v4, %v9208_v10 }
0x102b   :  { %796 = vadd.xlane.f32.xlu1 %v795_v0  ;;  %v1118_v0 = vadd.f32 %v8026_v30, %v10475_v51  ;;  %v1146_v39 = vmul.f32 %v9540_v11, %v9540_v11  ;;  %v1150_v41 = vmul.f32 %v9564_v14, %v9564_v14  ;;  %v1299_v51 = vadd.f32 %v10482_v17, %v9208_v10  ;;  %v3411_v17 = vld [vmem:[%s10390_s5 + $0x20] sm:$0xff] }
0x102c   :  { %v1151_v40 = vmul.f32 %v9571_v25, %v9571_v25 }
0x102d   :  { %v1158_v42 = vsel %vm216_vm1, %v1146_v39, 0.0  ;;  %v10483_v39 = vld [vmem:[#allocation29_spill] sm:$0xff]  ;;  %v1170_v50 = vsel %vm216_vm1, %v1150_v41, 0.0 }
0x102e   :  { %799 = vadd.xlane.f32.xlu0 %v798_v2  ;;  %v10476_v2 = vld [vmem:[#allocation12_spill] sm:$0xff]  ;;  %v1304_v5 = vadd.f32 %v9208_v10, %v10483_v39 }
0x102f   :  { %802 = vadd.xlane.f32.xlu1 %v801_v62  ;;  %v1123_v47 = vadd.f32 %v8026_v30, %v10476_v2  ;;  %v9552_v62 = vmax.f32 %v1118_v0, 0.0  ;;  %v10488_v39 = vld [vmem:[#allocation20_spill] sm:$0xff] }
0x1031   :  { %v9558_v48 = vmax.f32 %v1123_v47, 0.0  ;;  %v1148_v56 = vmul.f32 %v9552_v62, %v9552_v62 }
0x1032   :  { %967 = vadd.xlane.f32.xlu0 %v966_v37  ;;  %v1147_v37 = vmul.f32 %v9546_v38, %v9546_v38 }
0x1033   :  { %970 = vadd.xlane.f32.xlu1 %v969_v13  ;;  %v1155_v13 = vsel %vm216_vm1, %v1145_v60, 0.0  ;;  %v1149_v8 = vmul.f32 %v9558_v48, %v9558_v48  ;;  %v1164_v22 = vsel %vm216_vm1, %v1148_v56, 0.0  ;;  %v3408_v60 = vld [vmem:[%s10390_s5 + $0x8] sm:$0xff]  ;;  %v3409_v56 = vld [vmem:[%s10390_s5 + $0x10] sm:$0xff] }
0x1034   :  { %v1161_v12 = vsel %vm216_vm1, %v1147_v37, 0.0  ;;  %v9605_v37 = vmax.f32 %v1299_v51, 0.0  ;;  %v3412_v51 = vld [vmem:[%s10390_s5 + $0x28] sm:$0xff] }
0x1035   :  { %v1167_v0 = vsel %vm216_vm1, %v1149_v8, 0.0  ;;  %v9618_v8 = vmax.f32 %v1304_v5, 0.0  ;;  %v1475_v5 = vadd.f32 %v10488_v39, %v9309_v35  ;;  %v10492_v39 = vld [vmem:[#allocation28_spill] sm:$0xff] }
0x1036   :  { %973 = vadd.xlane.f32.xlu0 %v972_v23  ;;  %v1284_v23 = vadd.f32 %v9208_v10, %v10479_v15  ;;  %v3410_v15 = vld [vmem:[%s10390_s5 + $0x18] sm:$0xff]  ;;  %v1333_v41 = vmul.f32 %v9605_v37, %v9605_v37 }
0x1037   :  { %976 = vadd.xlane.f32.xlu1 %v975_v32  ;;  %v10480_v32 = vld [vmem:[#allocation19_spill] sm:$0xff] }
0x1038   :  { %v1289_v30 = vadd.f32 %v10480_v32, %v9208_v10  ;;  %v9578_v45 = vmax.f32 %v1284_v23, 0.0  ;;  %v7647_v23 = vpack.c.bf16 %v3410_v15, %v3409_v56  ;;  %v10485_v32 = vld [vmem:[#allocation33_spill] sm:$0xff]  ;;  %v1347_v4 = vsel %vm216_vm1, %v1333_v41, 0.0  ;;  %v10490_v41 = vld [vmem:[#allocation24_spill] sm:$0xff] }
0x103a   :  { %979 = vadd.xlane.f32.xlu0 %v978_v33  ;;  %v10481_v33 = vld [vmem:[#allocation25_spill] sm:$0xff]  ;;  %v1330_v47 = vmul.f32 %v9578_v45, %v9578_v45 }
0x103b   :  { %982 = vadd.xlane.f32.xlu1 %v981_v43  ;;  %v1294_v59 = vadd.f32 %v9208_v10, %v10481_v33  ;;  %v9585_v43 = vmax.f32 %v1289_v30, 0.0  ;;  %v1314_v30 = vadd.f32 %v9208_v10, %v10485_v32  ;;  %v9625_v33 = vmax.f32 %v1309_v9, 0.0  ;;  %v3413_v9 = vld [vmem:[%s10390_s5 + $0x30] sm:$0xff] }
0x103e   :  { %985 = vadd.xlane.f32.xlu0 %v984_v55  ;;  %v3407_v55 = vld [vmem:[%s10390_s5] sm:$0xff] }
0x103f   :  { %988 = vadd.xlane.f32.xlu1 %v987_v27  ;;  %v7643_v2 = vpack.c.bf16 %v3408_v60, %v3407_v55  ;;  %v9598_v27 = vmax.f32 %v1294_v59, 0.0  ;;  %v10486_v59 = vld [vmem:[#allocation31_spill] sm:$0xff]  ;;  %v10487_v55 = vld [vmem:[#allocation22_spill] sm:$0xff] }
0x1040   :  { %v1470_v60 = vadd.f32 %v9309_v35, %v10487_v55 }
0x1041   :  { %7644 = vmatprep.subr.bf16.mxu1 %v7643_v2 }
0x1042   :  { %1153 = vadd.xlane.f32.xlu0 %v1152_v6  ;;  %v1331_v6 = vmul.f32 %v9585_v43, %v9585_v43  ;;  %7646 = vmatpush3.bf16.msra.mxu1 %v7643_v2  ;;  %v9640_v2 = vmax.f32 %v1314_v30, 0.0  ;;  %v9656_v15 = vmax.f32 %v1470_v60, 0.0 }
0x1043   :  { %1156 = vadd.xlane.f32.xlu1 %v1155_v13  ;;  %v1173_v13 = vsel %vm216_vm1, %v1151_v40, 0.0  ;;  %7648 = vmatprep.subr.bf16.mxu1 %v7647_v23 }
0x1044   :  { %v1341_v40 = vsel %vm216_vm1, %v1331_v6, 0.0  ;;  %v1336_v32 = vmul.f32 %v9640_v2, %v9640_v2 }
0x1046   :  { %1159 = vadd.xlane.f32.xlu0 %v1158_v42  ;;  %v1332_v42 = vmul.f32 %v9598_v27, %v9598_v27  ;;  %7650 = vmatpush3.bf16.msra.mxu1 %v7647_v23  ;;  %v10489_v23 = vld [vmem:[#allocation26_spill] sm:$0xff]  ;;  %v1356_v60 = vsel %vm216_vm1, %v1336_v32, 0.0 }
0x1047   :  { %1162 = vadd.xlane.f32.xlu1 %v1161_v12  ;;  %v1338_v12 = vsel %vm216_vm1, %v1330_v47, 0.0 }
0x1048   :  { %v1344_v47 = vsel %vm216_vm1, %v1332_v42, 0.0  ;;  %v1480_v42 = vadd.f32 %v9309_v35, %v10489_v23 }
0x104a   :  { %1165 = vadd.xlane.f32.xlu0 %v1164_v22  ;;  %v1319_v22 = vadd.f32 %v10486_v59, %v9208_v10  ;;  %v1334_v10 = vmul.f32 %v9618_v8, %v9618_v8  ;;  %v1485_v59 = vadd.f32 %v10490_v41, %v9309_v35 }
0x104b   :  { %1168 = vadd.xlane.f32.xlu1 %v1167_v0  ;;  %v7651_v0 = vpack.c.bf16 %v3412_v51, %v3411_v17  ;;  %v1516_v17 = vmul.f32 %v9656_v15, %v9656_v15  ;;  %v9673_v51 = vmax.f32 %v1480_v42, 0.0 }
0x104c   :  { %v9647_v6 = vmax.f32 %v1319_v22, 0.0  ;;  %v1350_v30 = vsel %vm216_vm1, %v1334_v10, 0.0 }
0x104d   :  { %7652 = vmatprep.subr.bf16.mxu1 %v7651_v0  ;;  %v1524_v23 = vsel %vm216_vm1, %v1516_v17, 0.0 }
0x104e   :  { %1171 = vadd.xlane.f32.xlu0 %v1170_v50  ;;  %v1335_v50 = vmul.f32 %v9625_v33, %v9625_v33  ;;  %7654 = vmatpush3.bf16.msra.mxu1 %v7651_v0  ;;  %v1337_v22 = vmul.f32 %v9647_v6, %v9647_v6  ;;  %v10491_v0 = vld [vmem:[#allocation30_spill] sm:$0xff] }
0x104f   :  { %1174 = vadd.xlane.f32.xlu1 %v1173_v13  ;;  %v3414_v13 = vld [vmem:[%s10390_s5 + $0x38] sm:$0xff]  ;;  %v1490_v55 = vadd.f32 %v9309_v35, %v10491_v0 }
0x1050   :  { %v7655_v56 = vpack.c.bf16 %v3414_v13, %v3413_v9  ;;  %v10493_v13 = vld [vmem:[#allocation34_spill] sm:$0xff] }
0x1051   :  { %v9687_v9 = vmax.f32 %v1490_v55, 0.0 }
0x1052   :  { %1339 = vadd.xlane.f32.xlu0 %v1338_v12  ;;  %v9663_v12 = vmax.f32 %v1475_v5, 0.0  ;;  %7656 = vmatprep.subr.bf16.mxu1 %v7655_v56  ;;  %v1495_v5 = vadd.f32 %v10492_v39, %v9309_v35 }
0x1053   :  { %1342 = vadd.xlane.f32.xlu1 %v1341_v40  ;;  %v1353_v40 = vsel %vm216_vm1, %v1335_v50, 0.0  ;;  %7658 = vmatpush3.bf16.msra.mxu1 %v7655_v56  ;;  %v1359_v50 = vsel %vm216_vm1, %v1337_v22, 0.0  ;;  %v1500_v56 = vadd.f32 %v9309_v35, %v10493_v13  ;;  %v1520_v22 = vmul.f32 %v9687_v9, %v9687_v9 }
0x1054   :  { %7699 = vmatprep.subr.bf16.mxu1 %v9380_v24  ;;  %v1517_v10 = vmul.f32 %v9663_v12, %v9663_v12  ;;  %v9694_v32 = vmax.f32 %v1495_v5, 0.0 }
0x1056   :  { %1345 = vadd.xlane.f32.xlu0 %v1344_v47  ;;  %v9680_v47 = vmax.f32 %v1485_v59, 0.0  ;;  %v1527_v59 = vsel %vm216_vm1, %v1517_v10, 0.0  ;;  %v1521_v17 = vmul.f32 %v9694_v32, %v9694_v32  ;;  %v1536_v10 = vsel %vm216_vm1, %v1520_v22, 0.0 }
0x1057   :  { %1348 = vadd.xlane.f32.xlu1 %v1347_v4  ;;  %v1518_v4 = vmul.f32 %v9673_v51, %v9673_v51 }
0x1058   :  { %v1519_v42 = vmul.f32 %v9680_v47, %v9680_v47  ;;  %v1539_v5 = vsel %vm216_vm1, %v1521_v17, 0.0 }
0x1059   :  { %v1530_v0 = vsel %vm216_vm1, %v1518_v4, 0.0 }
0x105a   :  { %1351 = vadd.xlane.f32.xlu0 %v1350_v30  ;;  %v10494_v30 = vld [vmem:[#allocation32_spill] sm:$0xff] }
0x105b   :  { %1354 = vadd.xlane.f32.xlu1 %v1353_v40  ;;  %v1505_v41 = vadd.f32 %v10494_v30, %v9309_v35  ;;  %v9701_v40 = vmax.f32 %v1500_v56, 0.0 }
0x105d   :  { %v9706_v55 = vmax.f32 %v1505_v41, 0.0  ;;  %v1522_v35 = vmul.f32 %v9701_v40, %v9701_v40 }
0x105e   :  { %1357 = vadd.xlane.f32.xlu0 %v1356_v60  ;;  %v1533_v60 = vsel %vm216_vm1, %v1519_v42, 0.0 }
0x105f   :  { %1360 = vadd.xlane.f32.xlu1 %v1359_v50  ;;  %10495 = vst [vmem:[#allocation3_spill] sm:$0xff] %v9706_v55  ;;  %v1523_v39 = vmul.f32 %v9706_v55, %v9706_v55  ;;  %v1542_v50 = vsel %vm216_vm1, %v1522_v35, 0.0 }
0x1060   :  { %v3378_v13 = vpop.permute.xlu1 %3377 }
0x1061   :  { %v1545_v4 = vsel %vm216_vm1, %v1523_v39, 0.0  ;;  %v3376_v56 = vpop.permute.xlu0 %3375 }
0x1062   :  { %1525 = vadd.xlane.f32.xlu0 %v1524_v23 }
0x1063   :  { %1528 = vadd.xlane.f32.xlu1 %v1527_v59 }
0x1066   :  { %1531 = vadd.xlane.f32.xlu0 %v1530_v0 }
0x1067   :  { %1534 = vadd.xlane.f32.xlu1 %v1533_v60 }
0x1069   :  { %v3380_v23 = vpop.permute.xlu1 %3379 }
0x106a   :  { %1537 = vadd.xlane.f32.xlu0 %v1536_v10 }
0x106b   :  { %1540 = vadd.xlane.f32.xlu1 %v1539_v5 }
0x106d   :  { %v9717_v42 = vpop.permute.xlu0 %3383  ;;  %v3382_v30 = vpop.permute.xlu1 %3381 }
0x106e   :  { %1543 = vadd.xlane.f32.xlu0 %v1542_v50 }
0x106f   :  { %1546 = vadd.xlane.f32.xlu1 %v1545_v4 }
0x1071   :  { %v9719_v41 = vpop.permute.xlu0 %3387  ;;  %v3386_v59 = vpop.permute.xlu1 %3385 }
0x1075   :  { %v9725_v17 = vpop.permute.xlu1 %3389 }
0x10ab   :  { %v9721_v22 = vpop.xlane.xlu0 %781 }
0x10ac   :  { %10496 = vst [vmem:[#allocation9_spill] sm:$0xff] %v9721_v22 }
0x10af   :  { %v9723_v0 = vpop.xlane.xlu0 %787 }
0x10b0   :  { %10497 = vst [vmem:[#allocation7_spill] sm:$0xff] %v9723_v0 }
0x10b3   :  { %v9727_v60 = vpop.xlane.xlu0 %790 }
0x10b4   :  { %10498 = vst [vmem:[#allocation13_spill] sm:$0xff] %v9727_v60  ;;  %v9729_v35 = vpop.xlane.xlu1 %784 }
0x10b5   :  { %10499 = vst [vmem:[#allocation11_spill] sm:$0xff] %v9729_v35  ;;  %v4195_v35 = vld [vmem:[%s10391_s9] sm:$0xff] }
0x10b7   :  { %v9731_v10 = vpop.xlane.xlu0 %793 }
0x10b8   :  { %10500 = vst [vmem:[#allocation17_spill] sm:$0xff] %v9731_v10  ;;  %v9733_v39 = vpop.xlane.xlu1 %796 }
0x10b9   :  { %10501 = vst [vmem:[#allocation15_spill] sm:$0xff] %v9733_v39 }
0x10bb   :  { %v9735_v5 = vpop.xlane.xlu0 %799 }
0x10bc   :  { %10502 = vst [vmem:[#allocation6_spill] sm:$0xff] %v9735_v5  ;;  %v9737_v50 = vpop.xlane.xlu1 %802 }
0x10bd   :  { %10503 = vst [vmem:[#allocation4_spill] sm:$0xff] %v9737_v50 }
0x10bf   :  { %v968_v4 = vpop.xlane.xlu0 %967 }
0x10c0   :  { %v971_v1 = vpop.xlane.xlu1 %970  ;;  %v990_v39 = vmax.f32 %v968_v4, 1e-24  ;;  %v4196_v4 = vld [vmem:[%s10391_s9 + $0x8] sm:$0xff] }
0x10c1   :  { %v991_v50 = vmax.f32 %v971_v1, 1e-24 }
0x10c2   :  { %7936 = vrsqrt.f32 %v990_v39 }
0x10c3   :  { %v974_v28 = vpop.xlane.xlu0 %973  ;;  %7938 = vrsqrt.f32 %v991_v50 }
0x10c4   :  { %v977_v7 = vpop.xlane.xlu1 %976  ;;  %v992_v61 = vmax.f32 %v974_v28, 1e-24 }
0x10c5   :  { %v993_v28 = vmax.f32 %v977_v7, 1e-24 }
0x10c6   :  { %7940 = vrsqrt.f32 %v992_v61 }
0x10c7   :  { %v980_v46 = vpop.xlane.xlu0 %979  ;;  %7942 = vrsqrt.f32 %v993_v28 }
0x10c8   :  { %v983_v58 = vpop.xlane.xlu1 %982 }
0x10cb   :  { %v986_v49 = vpop.xlane.xlu0 %985 }
0x10cc   :  { %v9739_v31 = vpop.xlane.xlu1 %988  ;;  %v996_v61 = vmax.f32 %v986_v49, 1e-24 }
0x10cf   :  { %v9741_v16 = vpop.xlane.xlu0 %1153 }
0x10d0   :  { %v9743_v57 = vpop.xlane.xlu1 %1156 }
0x10d3   :  { %v9745_v20 = vpop.xlane.xlu0 %1159 }
0x10d4   :  { %v9747_v10 = vpop.xlane.xlu1 %1162 }
0x10d7   :  { %v9749_v53 = vpop.xlane.xlu0 %1165 }
0x10d8   :  { %v6973_v5 = vpop.f32.mrb[72].mxu0  ;;  %v9760_v1 = vpop.xlane.xlu1 %1168 }
0x10d9   :  { %v3328_v60 = vpop.f32.mrb[73].mxu0  ;;  %v3400_v36 = vsel %vm216_vm1, %v6973_v5, %v3378_v13  ;;  %v994_v13 = vmax.f32 %v980_v46, 1e-24 }
0x10da   :  { %v3399_v0 = vsel %vm216_vm1, %v3328_v60, %v3376_v56  ;;  %v7667_v60 = vpack.c.bf16 %v4196_v4, %v4195_v35  ;;  %v1176_v35 = vmax.f32 %v9741_v16, 1e-24  ;;  %v4198_v4 = vld [vmem:[%s10391_s9 + $0x18] sm:$0xff] }
0x10db   :  { %6999 = vmatprep.mubr.msk.f32.mxu1 %vm70_vm0, %v3399_v0  ;;  %v9766_v39 = vpop.xlane.xlu0 %1171  ;;  %7944 = vrsqrt.f32 %v994_v13  ;;  %v1178_v13 = vmax.f32 %v9745_v20, 1e-24  ;;  %v1179_v20 = vmax.f32 %v9747_v10, 1e-24  ;;  %v4201_v10 = vld [vmem:[%s10391_s9 + $0x30] sm:$0xff] }
0x10dc   :  { %v6976_v22 = vpop.f32.mrb[74].mxu0  ;;  %7000 = vmatmul.mubr.msk.f32.vlgmr.msra.gmra.mrb[72].mxu1 %vm70_vm0, %v3400_v36  ;;  %v995_v36 = vmax.f32 %v983_v58, 1e-24  ;;  %v997_v58 = vmax.f32 %v9739_v31, 1e-24  ;;  %v4197_v31 = vld [vmem:[%s10391_s9 + $0x10] sm:$0xff] }
0x10dd   :  { %v3338_v56 = vpop.f32.mrb[75].mxu0  ;;  %7701 = vmatpush3.bf16.msra.mxu1 %v9380_v24  ;;  %v3402_v5 = vsel %vm216_vm1, %v6976_v22, %v3382_v30  ;;  %v9772_v24 = vpop.xlane.xlu1 %1174 }
0x10de   :  { %v3401_v0 = vsel %vm216_vm1, %v3338_v56, %v3380_v23  ;;  %7700 = vmatprep.subr.bf16.mxu1 %v9390_v3  ;;  %v7937_v30 = vpop.eup %7936  ;;  %7946 = vrsqrt.f32 %v995_v36 }
0x10df   :  { %7002 = vmatprep.mubr.msk.f32.mxu1 %vm70_vm0, %v3401_v0  ;;  %7948 = vrsqrt.f32 %v996_v61  ;;  %v7939_v50 = vpop.eup %7938  ;;  %v7671_v0 = vpack.c.bf16 %v4198_v4, %v4197_v31  ;;  %v4199_v61 = vld [vmem:[%s10391_s9 + $0x20] sm:$0xff] }
0x10e0   :  { %v6979_v55 = vpop.f32.mrb[76].mxu0  ;;  %7003 = vmatmul.mubr.msk.f32.gmra.mrb[74].mxu1 %vm70_vm0, %v3402_v5  ;;  %v7941_v16 = vpop.eup %7940  ;;  %7950 = vrsqrt.f32 %v997_v58 }
0x10e1   :  { %v3348_v7 = vpop.f32.mrb[77].mxu0  ;;  %7702 = vmatpush3.bf16.msra.mxu1 %v9390_v3  ;;  %v3404_v23 = vsel %vm216_vm1, %v6979_v55, %v3386_v59  ;;  %v9780_v3 = vpop.xlane.xlu0 %1339  ;;  %v1006_v59 = vmul.f32 %v7937_v30, %v9475_v29  ;;  %v1007_v29 = vmul.f32 %v7939_v50, %v9481_v44  ;;  %7952 = vrsqrt.f32 %v1176_v35 }
0x10e2   :  { %v3403_v46 = vsel %vm216_vm1, %v3348_v7, %v9717_v42  ;;  %7668 = vmatprep.subr.bf16.mxu1 %v7667_v60  ;;  %v9795_v28 = vpop.xlane.xlu1 %1342  ;;  %v7943_v5 = vpop.eup %7942  ;;  %v1008_v7 = vmul.f32 %v7941_v16, %v9487_v19  ;;  %v1180_v19 = vmax.f32 %v9749_v53, 1e-24  ;;  %v1181_v53 = vmax.f32 %v9760_v1, 1e-24 }
0x10e3   :  { %7005 = vmatprep.mubr.msk.f32.mxu1 %vm70_vm0, %v3403_v46  ;;  %v1183_v1 = vmax.f32 %v9772_v24, 1e-24  ;;  %v1363_v24 = vmax.f32 %v9795_v28, 1e-24 }
0x10e4   :  { %v6982_v22 = vpop.f32.mrb[78].mxu0  ;;  %7006 = vmatmul.mubr.msk.f32.gmra.mrb[76].mxu1 %vm70_vm0, %v3404_v23 }
0x10e5   :  { %v3358_v49 = vpop.f32.mrb[79].mxu0  ;;  %v3406_v55 = vsel %vm216_vm1, %v6982_v22, %v9725_v17  ;;  %v1177_v17 = vmax.f32 %v9743_v57, 1e-24  ;;  %v9806_v36 = vpop.xlane.xlu0 %1345  ;;  %v4200_v57 = vld [vmem:[%s10391_s9 + $0x28] sm:$0xff]  ;;  %v1009_v22 = vmul.f32 %v7943_v5, %v9493_v63 }
0x10e6   :  { %v3405_v42 = vsel %vm216_vm1, %v3358_v49, %v9719_v41  ;;  %v7945_v46 = vpop.eup %7944  ;;  %v9823_v30 = vpop.xlane.xlu1 %1348  ;;  %v7675_v58 = vpack.c.bf16 %v4200_v57, %v4199_v61  ;;  %v1364_v57 = vmax.f32 %v9806_v36, 1e-24 }
0x10e7   :  { %7008 = vmatprep.mubr.msk.f32.mxu1 %vm70_vm0, %v3405_v42  ;;  %7954 = vrsqrt.f32 %v1177_v17  ;;  %v1010_v35 = vmul.f32 %v7945_v46, %v9499_v52  ;;  %v1182_v52 = vmax.f32 %v9766_v39, 1e-24 }
0x10e8   :  { %7009 = vmatmul.mubr.msk.f32.gmra.mrb[78].mxu1 %vm70_vm0, %v3406_v55  ;;  %v9798_v41 = vpop.f32.mrb[80].mxu0  ;;  %7956 = vrsqrt.f32 %v1178_v13  ;;  %v7947_v49 = vpop.eup %7946 }
0x10e9   :  { %v9801_v56 = vpop.f32.mrb[81].mxu0  ;;  %7067 = vmatprep.mubr.msk.f32.mxu1 %vm216_vm1, %v1006_v59  ;;  %v7949_v42 = vpop.eup %7948  ;;  %7958 = vrsqrt.f32 %v1179_v20  ;;  %v1011_v59 = vmul.f32 %v7947_v49, %v9505_v26  ;;  %v1362_v26 = vmax.f32 %v9780_v3, 1e-24 }
0x10ea   :  { %v1352_v63 = vpop.xlane.xlu0 %1351  ;;  %7960 = vrsqrt.f32 %v1180_v19  ;;  %v7951_v4 = vpop.eup %7950  ;;  %v1012_v16 = vmul.f32 %v7949_v42, %v9513_v21 }
0x10eb   :  { %v7953_v17 = vpop.eup %7952  ;;  %7962 = vrsqrt.f32 %v1181_v53  ;;  %v1013_v39 = vmul.f32 %v7951_v4, %v9520_v54  ;;  %v1366_v28 = vmax.f32 %v1352_v63, 1e-24 }
0x10ec   :  { %v9815_v23 = vpop.f32.mrb[82].mxu0  ;;  %7068 = vmatmul.mubr.msk.f32.vlgmr.msra.gmra.mrb[80].mxu1 %vm216_vm1, %v1007_v29  ;;  %v1355_v29 = vpop.xlane.xlu1 %1354  ;;  %7964 = vrsqrt.f32 %v1182_v52 }
0x10ed   :  { %v9819_v44 = vpop.f32.mrb[83].mxu0  ;;  %7070 = vmatprep.mubr.msk.f32.mxu1 %vm216_vm1, %v1008_v7  ;;  %7670 = vmatpush3.bf16.msra.mxu1 %v7667_v60  ;;  %v4202_v60 = vld [vmem:[%s10391_s9 + $0x38] sm:$0xff]  ;;  %v1192_v7 = vmul.f32 %v7953_v17, %v9523_v34  ;;  %7966 = vrsqrt.f32 %v1183_v1  ;;  %v1365_v34 = vmax.f32 %v9823_v30, 1e-24 }
0x10ee   :  { %7672 = vmatprep.subr.bf16.mxu1 %v7671_v0  ;;  %v7679_v31 = vpack.c.bf16 %v4202_v60, %v4201_v10  ;;  %v1358_v5 = vpop.xlane.xlu0 %1357  ;;  %7968 = vrsqrt.f32 %v1362_v26 }
0x10ef   :  { %7970 = vrsqrt.f32 %v1363_v24  ;;  %v1368_v30 = vmax.f32 %v1358_v5, 1e-24 }
0x10f0   :  { %v9833_v50 = vpop.f32.mrb[84].mxu0  ;;  %7071 = vmatmul.mubr.msk.f32.gmra.mrb[82].mxu1 %vm216_vm1, %v1009_v22  ;;  %v1361_v3 = vpop.xlane.xlu1 %1360  ;;  %7972 = vrsqrt.f32 %v1364_v57 }
0x10f1   :  { %v9837_v55 = vpop.f32.mrb[85].mxu0  ;;  %7073 = vmatprep.mubr.msk.f32.mxu1 %vm216_vm1, %v1010_v35  ;;  %7674 = vmatpush3.bf16.msra.mxu1 %v7671_v0  ;;  %v7955_v21 = vpop.eup %7954  ;;  %7974 = vrsqrt.f32 %v1365_v34 }
0x10f2   :  { %7676 = vmatprep.subr.bf16.mxu1 %v7675_v58  ;;  %v7957_v61 = vpop.eup %7956  ;;  %v1193_v54 = vmul.f32 %v7955_v21, %v9532_v18  ;;  %v1526_v22 = vpop.xlane.xlu0 %1525  ;;  %7976 = vrsqrt.f32 %v1366_v28 }
0x10f3   :  { %v7959_v46 = vpop.eup %7958  ;;  %v1194_v20 = vmul.f32 %v7957_v61, %v9540_v11  ;;  %v1367_v11 = vmax.f32 %v1355_v29, 1e-24  ;;  %v1548_v63 = vmax.f32 %v1526_v22, 1e-24 }
0x10f4   :  { %v9843_v13 = vpop.f32.mrb[86].mxu0  ;;  %7074 = vmatmul.mubr.msk.f32.gmra.mrb[84].mxu1 %vm216_vm1, %v1011_v59  ;;  %v7961_v19 = vpop.eup %7960 }
0x10f5   :  { %v9847_v0 = vpop.f32.mrb[87].mxu0  ;;  %7076 = vmatprep.mubr.msk.f32.mxu1 %vm216_vm1, %v1012_v16  ;;  %7678 = vmatpush3.bf16.msra.mxu1 %v7675_v58  ;;  %v1195_v58 = vmul.f32 %v7959_v46, %v9546_v38  ;;  %v7963_v36 = vpop.eup %7962  ;;  %v1196_v49 = vmul.f32 %v7961_v19, %v9552_v62  ;;  %7978 = vrsqrt.f32 %v1367_v11  ;;  %v1369_v62 = vmax.f32 %v1361_v3, 1e-24 }
0x10f6   :  { %7680 = vmatprep.subr.bf16.mxu1 %v7679_v31  ;;  %v7965_v18 = vpop.eup %7964  ;;  %v1529_v35 = vpop.xlane.xlu1 %1528  ;;  %v1197_v10 = vmul.f32 %v7963_v36, %v9558_v48  ;;  %7980 = vrsqrt.f32 %v1368_v30  ;;  %v10504_v30 = vld [vmem:[#allocation3_spill] sm:$0xff] }
0x10f7   :  { %v7967_v60 = vpop.eup %7966  ;;  %v1532_v42 = vpop.xlane.xlu0 %1531  ;;  %v1198_v53 = vmul.f32 %v7965_v18, %v9564_v14  ;;  %7982 = vrsqrt.f32 %v1369_v62  ;;  %v1549_v14 = vmax.f32 %v1529_v35, 1e-24  ;;  %v9899_v35 = vld [vmem:[%s10392_s8] ss:$0 sm:$0xff] }
0x10f8   :  { %7077 = vmatmul.mubr.msk.f32.gmra.mrb[86].mxu1 %vm216_vm1, %v1013_v39  ;;  %v7969_v38 = vpop.eup %7968  ;;  %v1199_v59 = vmul.f32 %v7967_v60, %v9571_v25  ;;  %7984 = vrsqrt.f32 %v1548_v63  ;;  %v1550_v17 = vmax.f32 %v1532_v42, 1e-24  ;;  %v3813_v11 = vadd.f32 %v9899_v35, %v9801_v56 }
0x10f9   :  { %7079 = vmatprep.mubr.msk.f32.mxu1 %vm216_vm1, %v1192_v7  ;;  %7682 = vmatpush3.bf16.msra.mxu1 %v7679_v31  ;;  %v7971_v31 = vpop.eup %7970  ;;  %v1378_v4 = vmul.f32 %v7969_v38, %v9578_v45  ;;  %7986 = vrsqrt.f32 %v1549_v14  ;;  %v3823_v42 = vadd.f32 %v9899_v35, %v9819_v44  ;;  %v3838_v44 = vadd.f32 %v9833_v50, %v9899_v35  ;;  %v4851_v50 = vld [vmem:[%s10393_s11] sm:$0xff]  ;;  %v4856_v14 = vld [vmem:[%s10393_s11 + $0x28] sm:$0xff] }
0x10fa   :  { %v1535_v52 = vpop.xlane.xlu1 %1534  ;;  %v7973_v48 = vpop.eup %7972  ;;  %v1379_v29 = vmul.f32 %v7971_v31, %v9585_v43  ;;  %7988 = vrsqrt.f32 %v1550_v17  ;;  %v4131_v60 = vmax.f32 %v3813_v11, 0.0  ;;  %v3843_v62 = vadd.f32 %v9899_v35, %v9847_v0  ;;  %v4852_v0 = vld [vmem:[%s10393_s11 + $0x8] sm:$0xff]  ;;  %v4854_v31 = vld [vmem:[%s10393_s11 + $0x18] sm:$0xff]  ;;  %v4857_v17 = vld [vmem:[%s10393_s11 + $0x30] sm:$0xff] }
0x10fb   :  { %v1538_v16 = vpop.xlane.xlu0 %1537  ;;  %v7975_v1 = vpop.eup %7974  ;;  %v1380_v26 = vmul.f32 %v7973_v48, %v9598_v27  ;;  %v1551_v45 = vmax.f32 %v1535_v52, 1e-24  ;;  %v4133_v56 = vmax.f32 %v3823_v42, 0.0  ;;  %v4855_v48 = vld [vmem:[%s10393_s11 + $0x20] sm:$0xff] }
0x10fc   :  { %7080 = vmatmul.mubr.msk.f32.gmra.mrb[88].mxu1 %vm216_vm1, %v1193_v54  ;;  %v7977_v39 = vpop.eup %7976  ;;  %v1552_v21 = vmax.f32 %v1538_v16, 1e-24  ;;  %v1381_v5 = vmul.f32 %v7975_v1, %v9605_v37  ;;  %v4137_v63 = vmax.f32 %v3843_v62, 0.0  ;;  %v7691_v16 = vpack.c.bf16 %v4856_v14, %v4855_v48 }
0x10fd   :  { %7082 = vmatprep.mubr.msk.f32.mxu1 %vm216_vm1, %v1194_v20  ;;  %v1382_v24 = vmul.f32 %v7977_v39, %v9618_v8  ;;  %7990 = vrsqrt.f32 %v1551_v45 }
0x10fe   :  { %v1541_v25 = vpop.xlane.xlu1 %1540  ;;  %7992 = vrsqrt.f32 %v1552_v21 }
0x10ff   :  { %v7979_v7 = vpop.eup %7978  ;;  %v1544_v61 = vpop.xlane.xlu0 %1543  ;;  %v1553_v27 = vmax.f32 %v1541_v25, 1e-24 }
0x1100   :  { %7083 = vmatmul.mubr.msk.f32.gmra.mrb[90].mxu1 %vm216_vm1, %v1195_v58  ;;  %v7981_v43 = vpop.eup %7980  ;;  %v1554_v57 = vmax.f32 %v1544_v61, 1e-24  ;;  %v1383_v54 = vmul.f32 %v7979_v7, %v9625_v33 }
0x1101   :  { %7085 = vmatprep.mubr.msk.f32.mxu1 %vm216_vm1, %v1196_v49  ;;  %v7983_v46 = vpop.eup %7982  ;;  %v1384_v20 = vmul.f32 %v7981_v43, %v9640_v2  ;;  %7994 = vrsqrt.f32 %v1553_v27 }
0x1102   :  { %v1547_v3 = vpop.xlane.xlu1 %1546  ;;  %v7985_v37 = vpop.eup %7984  ;;  %7996 = vrsqrt.f32 %v1554_v57  ;;  %v1385_v19 = vmul.f32 %v7983_v46, %v9647_v6 }
0x1103   :  { %v1555_v8 = vmax.f32 %v1547_v3, 1e-24  ;;  %v7987_v34 = vpop.eup %7986  ;;  %v1564_v22 = vmul.f32 %v7985_v37, %v9656_v15 }
0x1104   :  { %7086 = vmatmul.mubr.msk.f32.gmra.mrb[92].mxu1 %vm216_vm1, %v1197_v10  ;;  %v7989_v28 = vpop.eup %7988  ;;  %v1565_v33 = vmul.f32 %v7987_v34, %v9663_v12 }
0x1105   :  { %7088 = vmatprep.mubr.msk.f32.mxu1 %vm216_vm1, %v1198_v53  ;;  %7998 = vrsqrt.f32 %v1555_v8  ;;  %v1566_v58 = vmul.f32 %v7989_v28, %v9673_v51  ;;  %v3833_v53 = vadd.f32 %v9899_v35, %v9837_v55  ;;  %v3848_v55 = vadd.f32 %v9843_v13, %v9899_v35  ;;  %v4853_v13 = vld [vmem:[%s10393_s11 + $0x10] sm:$0xff] }
0x1107   :  { %v7991_v2 = vpop.eup %7990  ;;  %v4135_v38 = vmax.f32 %v3833_v53, 0.0  ;;  %v4138_v52 = vmax.f32 %v3848_v55, 0.0 }
0x1108   :  { %7089 = vmatmul.mubr.msk.f32.gmra.mrb[94].mxu1 %vm216_vm1, %v1199_v59  ;;  %v7993_v36 = vpop.eup %7992  ;;  %v1567_v6 = vmul.f32 %v7991_v2, %v9680_v47  ;;  %v7683_v59 = vpack.c.bf16 %v4852_v0, %v4851_v50 }
0x1109   :  { %7091 = vmatprep.mubr.msk.f32.mxu1 %vm216_vm1, %v1378_v4  ;;  %v1568_v15 = vmul.f32 %v7993_v36, %v9687_v9  ;;  %v3818_v9 = vadd.f32 %v9798_v41, %v9899_v35  ;;  %v7687_v4 = vpack.c.bf16 %v4854_v31, %v4853_v13  ;;  %v10505_v36 = vld [vmem:[#allocation9_spill] sm:$0xff]  ;;  %v10518_v13 = vld [vmem:[#allocation4_spill] sm:$0xff] }
0x110a   :  { %7684 = vmatprep.subr.bf16.mxu0 %v7683_v59  ;;  %v811_v31 = vmax.f32 %v10518_v13, 1e-24 }
0x110b   :  { %v7995_v49 = vpop.eup %7994  ;;  %7686 = vmatpush3.bf16.msra.mxu0 %v7683_v59  ;;  %v10517_v59 = vld [vmem:[#allocation40_spill] sm:$0xff] }
0x110c   :  { %7092 = vmatmul.mubr.msk.f32.gmra.mrb[96].mxu1 %vm216_vm1, %v1379_v29  ;;  %v7997_v18 = vpop.eup %7996  ;;  %v1569_v12 = vmul.f32 %v7995_v49, %v9694_v32  ;;  %v4132_v32 = vmax.f32 %v3818_v9, 0.0  ;;  %7688 = vmatprep.subr.bf16.mxu0 %v7687_v4  ;;  %v4858_v29 = vld [vmem:[%s10393_s11 + $0x38] sm:$0xff] }
0x110d   :  { %7094 = vmatprep.mubr.msk.f32.mxu1 %vm216_vm1, %v1380_v26  ;;  %v1570_v47 = vmul.f32 %v7997_v18, %v9701_v40  ;;  %v3828_v40 = vadd.f32 %v9815_v23, %v9899_v35  ;;  %v4136_v23 = vmax.f32 %v3838_v44, 0.0  ;;  %v7695_v1 = vpack.c.bf16 %v4858_v29, %v4857_v17  ;;  %v5715_v26 = vld [vmem:[%s10394_s6] ss:$0 sm:$0xff]  ;;  %v10506_v18 = vld [vmem:[#allocation11_spill] sm:$0xff] }
0x110e   :  { %v10513_v44 = vld [vmem:[#allocation38_spill] sm:$0xff]  ;;  %v10520_v17 = vld [vmem:[#allocation43_spill] sm:$0xff] }
0x110f   :  { %v7999_v51 = vpop.eup %7998  ;;  %v4134_v41 = vmax.f32 %v3828_v40, 0.0  ;;  %7690 = vmatpush3.bf16.msra.mxu0 %v7687_v4  ;;  %v10519_v4 = vld [vmem:[#allocation41_spill] sm:$0xff] }
0x1110   :  { %7095 = vmatmul.mubr.msk.f32.gmra.mrb[98].mxu1 %vm216_vm1, %v1381_v5  ;;  %v1571_v10 = vmul.f32 %v7999_v51, %v10504_v30  ;;  %7692 = vmatprep.subr.bf16.mxu0 %v7691_v16  ;;  %v10507_v51 = vld [vmem:[#allocation36_spill] sm:$0xff] }
0x1111   :  { %7097 = vmatprep.mubr.msk.f32.mxu1 %vm216_vm1, %v1382_v24 }
0x1113   :  { %7694 = vmatpush3.bf16.msra.mxu0 %v7691_v16 }
0x1114   :  { %7098 = vmatmul.mubr.msk.f32.gmra.mrb[100].mxu1 %vm216_vm1, %v1383_v54  ;;  %7696 = vmatprep.subr.bf16.mxu0 %v7695_v1 }
0x1115   :  { %7100 = vmatprep.mubr.msk.f32.mxu1 %vm216_vm1, %v1384_v20 }
0x1117   :  { %7698 = vmatpush3.bf16.msra.mxu0 %v7695_v1 }
0x1118   :  { %7101 = vmatmul.mubr.msk.f32.gmra.mrb[102].mxu1 %vm216_vm1, %v1385_v19 }
0x1119   :  { %7103 = vmatprep.mubr.msk.f32.mxu1 %vm216_vm1, %v1564_v22 }
0x111c   :  { %7104 = vmatmul.mubr.msk.f32.gmra.mrb[104].mxu1 %vm216_vm1, %v1565_v33 }
0x111d   :  { %7106 = vmatprep.mubr.msk.f32.mxu1 %vm216_vm1, %v1566_v58 }
0x1120   :  { %7107 = vmatmul.mubr.msk.f32.gmra.mrb[106].mxu1 %vm216_vm1, %v1567_v6  ;;  %v804_v6 = vmax.f32 %v10505_v36, 1e-24 }
0x1121   :  { %7109 = vmatprep.mubr.msk.f32.mxu1 %vm216_vm1, %v1568_v15 }
0x1122   :  { %8000 = vrsqrt.f32 %v804_v6 }
0x1124   :  { %7110 = vmatmul.mubr.msk.f32.gmra.mrb[108].mxu1 %vm216_vm1, %v1569_v12  ;;  %v805_v12 = vmax.f32 %v10506_v18, 1e-24 }
0x1125   :  { %7112 = vmatprep.mubr.msk.f32.mxu1 %vm216_vm1, %v1570_v47  ;;  %v10508_v47 = vld [vmem:[#allocation7_spill] sm:$0xff] }
0x1126   :  { %v806_v9 = vmax.f32 %v10508_v47, 1e-24  ;;  %8002 = vrsqrt.f32 %v805_v12 }
0x1128   :  { %7113 = vmatmul.mubr.msk.f32.gmra.mrb[110].mxu1 %vm216_vm1, %v1571_v10  ;;  %v10509_v10 = vld [vmem:[#allocation35_spill] sm:$0xff]  ;;  %8004 = vrsqrt.f32 %v806_v9 }
0x1129   :  { %7131 = vmatprep.mubr.msk.f32.mxu1 %vm70_vm0, %v4131_v60  ;;  %v10510_v60 = vld [vmem:[#allocation13_spill] sm:$0xff] }
0x112a   :  { %v807_v42 = vmax.f32 %v10510_v60, 1e-24 }
0x112c   :  { %7132 = vmatmul.mubr.msk.f32.vlgmr.msra.gmra.mrb[112].mxu1 %vm70_vm0, %v4132_v32  ;;  %v10511_v32 = vld [vmem:[#allocation37_spill] sm:$0xff]  ;;  %8006 = vrsqrt.f32 %v807_v42  ;;  %v8001_v0 = vpop.eup %8000 }
0x112d   :  { %7134 = vmatprep.mubr.msk.f32.mxu1 %vm70_vm0, %v4133_v56  ;;  %v10512_v56 = vld [vmem:[#allocation17_spill] sm:$0xff]  ;;  %v820_v29 = vmul.f32 %v8001_v0, %v10520_v17 }
0x112e   :  { %v808_v53 = vmax.f32 %v10512_v56, 1e-24 }
0x1130   :  { %7135 = vmatmul.mubr.msk.f32.gmra.mrb[114].mxu1 %vm70_vm0, %v4134_v41  ;;  %8008 = vrsqrt.f32 %v808_v53  ;;  %v8003_v16 = vpop.eup %8002 }
0x1131   :  { %7137 = vmatprep.mubr.msk.f32.mxu1 %vm70_vm0, %v4135_v38  ;;  %v10514_v38 = vld [vmem:[#allocation15_spill] sm:$0xff] }
0x1132   :  { %v809_v62 = vmax.f32 %v10514_v38, 1e-24  ;;  %v8005_v1 = vpop.eup %8004 }
0x1134   :  { %7138 = vmatmul.mubr.msk.f32.gmra.mrb[116].mxu1 %vm70_vm0, %v4136_v23  ;;  %v10515_v23 = vld [vmem:[#allocation39_spill] sm:$0xff]  ;;  %8010 = vrsqrt.f32 %v809_v62 }
0x1135   :  { %7140 = vmatprep.mubr.msk.f32.mxu1 %vm70_vm0, %v4137_v63  ;;  %v10516_v63 = vld [vmem:[#allocation6_spill] sm:$0xff] }
0x1138   :  { %7141 = vmatmul.mubr.msk.f32.gmra.mrb[118].mxu1 %vm70_vm0, %v4138_v52  ;;  %v810_v52 = vmax.f32 %v10516_v63, 1e-24  ;;  %v10075_v63 = vld [vmem:[%s10395_s10] ss:$0 sm:$0xff] }
0x113a   :  { %8012 = vrsqrt.f32 %v810_v52 }
0x113b   :  { %8014 = vrsqrt.f32 %v811_v31 }
0x11af   :  { %v7001_v39 = vpop.f32.mrb[72].mxu1 }
0x11b0   :  { %v3518_v25 = vadd.f32 %v7001_v39, %v5715_v26  ;;  %v3512_v45 = vpop.f32.mrb[73].mxu1 }
0x11b1   :  { %v3513_v21 = vadd.f32 %v5715_v26, %v3512_v45  ;;  %v10522_v45 = vld [vmem:[#allocation46_spill] sm:$0xff] }
0x11b2   :  { %v3552_v61 = vmax.f32 %v3518_v25, 0.0 }
0x11b3   :  { %v3551_v5 = vmax.f32 %v3513_v21, 0.0  ;;  %v7004_v7 = vpop.f32.mrb[74].mxu1  ;;  %v821_v21 = vmul.f32 %v8003_v16, %v10522_v45 }
0x11b4   :  { %v3528_v24 = vadd.f32 %v7004_v7, %v5715_v26  ;;  %v3522_v43 = vpop.f32.mrb[75].mxu1  ;;  %v10523_v7 = vld [vmem:[#allocation44_spill] sm:$0xff] }
0x11b5   :  { %v3523_v27 = vadd.f32 %v5715_v26, %v3522_v43  ;;  %7031 = vmatprep.mubr.msk.f32.mxu0 %vm216_vm1, %v3551_v5  ;;  %v8007_v5 = vpop.eup %8006 }
0x11b6   :  { %7032 = vmatmul.mubr.msk.f32.gmra.mrb[88].mxu0 %vm216_vm1, %v3552_v61  ;;  %v3554_v54 = vmax.f32 %v3528_v24, 0.0  ;;  %v822_v61 = vmul.f32 %v8005_v1, %v10523_v7  ;;  %v8009_v24 = vpop.eup %8008 }
0x11b7   :  { %v3553_v57 = vmax.f32 %v3523_v27, 0.0  ;;  %v7007_v3 = vpop.f32.mrb[76].mxu1 }
0x11b8   :  { %v3538_v46 = vadd.f32 %v7007_v3, %v5715_v26  ;;  %v3532_v20 = vpop.f32.mrb[77].mxu1 }
0x11b9   :  { %v3533_v37 = vadd.f32 %v5715_v26, %v3532_v20  ;;  %7034 = vmatprep.mubr.msk.f32.mxu0 %vm216_vm1, %v3553_v57  ;;  %v10524_v57 = vld [vmem:[#allocation45_spill] sm:$0xff] }
0x11ba   :  { %7035 = vmatmul.mubr.msk.f32.gmra.mrb[90].mxu0 %vm216_vm1, %v3554_v54  ;;  %v3556_v34 = vmax.f32 %v3538_v46, 0.0  ;;  %v823_v3 = vmul.f32 %v8007_v5, %v10524_v57  ;;  %v8011_v54 = vpop.eup %8010  ;;  %v10525_v46 = vld [vmem:[#allocation47_spill] sm:$0xff] }
0x11bb   :  { %v3555_v8 = vmax.f32 %v3533_v37, 0.0  ;;  %v7010_v19 = vpop.f32.mrb[78].mxu1  ;;  %v824_v20 = vmul.f32 %v8009_v24, %v10525_v46  ;;  %v8013_v37 = vpop.eup %8012 }
0x11bc   :  { %v3548_v22 = vadd.f32 %v7010_v19, %v5715_v26  ;;  %v3542_v28 = vpop.f32.mrb[79].mxu1 }
0x11bd   :  { %v3543_v33 = vadd.f32 %v5715_v26, %v3542_v28  ;;  %7037 = vmatprep.mubr.msk.f32.mxu0 %vm216_vm1, %v3555_v8  ;;  %v10521_v26 = vld [vmem:[#allocation42_spill] sm:$0xff]  ;;  %v8015_v28 = vpop.eup %8014 }
0x11be   :  { %7038 = vmatmul.mubr.msk.f32.gmra.mrb[92].mxu0 %vm216_vm1, %v3556_v34  ;;  %v3558_v49 = vmax.f32 %v3548_v22, 0.0  ;;  %v10526_v34 = vld [vmem:[#allocation48_spill] sm:$0xff] }
0x11bf   :  { %v3557_v2 = vmax.f32 %v3543_v33, 0.0  ;;  %v9966_v58 = vpop.f32.mrb[80].mxu1  ;;  %v825_v22 = vmul.f32 %v8011_v54, %v10526_v34  ;;  %v10527_v33 = vld [vmem:[#allocation49_spill] sm:$0xff] }
0x11c0   :  { %v9969_v15 = vpop.f32.mrb[81].mxu1 }
0x11c1   :  { %7040 = vmatprep.mubr.msk.f32.mxu0 %vm216_vm1, %v3557_v2  ;;  %v826_v2 = vmul.f32 %v8013_v37, %v10527_v33 }
0x11c2   :  { %7041 = vmatmul.mubr.msk.f32.gmra.mrb[94].mxu0 %vm216_vm1, %v3558_v49  ;;  %v10528_v49 = vld [vmem:[#allocation5_spill] sm:$0xff] }
0x11c3   :  { %7043 = vmatprep.mubr.msk.f32.mxu0 %vm216_vm1, %v10507_v51  ;;  %v9976_v11 = vpop.f32.mrb[82].mxu1  ;;  %v827_v18 = vmul.f32 %v8015_v28, %v10528_v49 }
0x11c4   :  { %v9979_v30 = vpop.f32.mrb[83].mxu1 }
0x11c6   :  { %7044 = vmatmul.mubr.msk.f32.gmra.mrb[96].mxu0 %vm216_vm1, %v10509_v10 }
0x11c7   :  { %7046 = vmatprep.mubr.msk.f32.mxu0 %vm216_vm1, %v10511_v32  ;;  %v9986_v40 = vpop.f32.mrb[84].mxu1 }
0x11c8   :  { %v9989_v41 = vpop.f32.mrb[85].mxu1 }
0x11ca   :  { %7047 = vmatmul.mubr.msk.f32.gmra.mrb[98].mxu0 %vm216_vm1, %v10513_v44 }
0x11cb   :  { %7049 = vmatprep.mubr.msk.f32.mxu0 %vm216_vm1, %v10515_v23  ;;  %v9996_v55 = vpop.f32.mrb[86].mxu1 }
0x11cc   :  { %v9999_v50 = vpop.f32.mrb[87].mxu1 }
0x11ce   :  { %7050 = vmatmul.mubr.msk.f32.gmra.mrb[100].mxu0 %vm216_vm1, %v10517_v59 }
0x11cf   :  { %7052 = vmatprep.mubr.msk.f32.mxu0 %vm216_vm1, %v10519_v4  ;;  %v10006_v48 = vpop.f32.mrb[88].mxu1 }
0x11d0   :  { %v10008_v14 = vpop.f32.mrb[89].mxu1 }
0x11d2   :  { %7053 = vmatmul.mubr.msk.f32.gmra.mrb[102].mxu0 %vm216_vm1, %v10521_v26 }
0x11d3   :  { %7055 = vmatprep.mubr.msk.f32.mxu0 %vm216_vm1, %v820_v29  ;;  %v10014_v39 = vpop.f32.mrb[90].mxu1 }
0x11d4   :  { %v10016_v25 = vpop.f32.mrb[91].mxu1 }
0x11d6   :  { %7056 = vmatmul.mubr.msk.f32.gmra.mrb[104].mxu0 %vm216_vm1, %v821_v21 }
0x11d7   :  { %7058 = vmatprep.mubr.msk.f32.mxu0 %vm216_vm1, %v822_v61  ;;  %v10022_v43 = vpop.f32.mrb[92].mxu1 }
0x11d8   :  { %v10024_v27 = vpop.f32.mrb[93].mxu1 }
0x11da   :  { %7059 = vmatmul.mubr.msk.f32.gmra.mrb[106].mxu0 %vm216_vm1, %v823_v3 }
0x11db   :  { %7061 = vmatprep.mubr.msk.f32.mxu0 %vm216_vm1, %v824_v20  ;;  %v10030_v8 = vpop.f32.mrb[94].mxu1 }
0x11dc   :  { %v10032_v19 = vpop.f32.mrb[95].mxu1 }
0x11de   :  { %7062 = vmatmul.mubr.msk.f32.gmra.mrb[108].mxu0 %vm216_vm1, %v825_v22 }
0x11df   :  { %7064 = vmatprep.mubr.msk.f32.mxu0 %vm216_vm1, %v826_v2  ;;  %v10038_v36 = vpop.f32.mrb[96].mxu1 }
0x11e0   :  { %v10040_v6 = vpop.f32.mrb[97].mxu1 }
0x11e2   :  { %7065 = vmatmul.mubr.msk.f32.gmra.mrb[110].mxu0 %vm216_vm1, %v827_v18 }
0x11e3   :  { %v10044_v12 = vpop.f32.mrb[98].mxu1 }
0x11e4   :  { %v10046_v51 = vpop.f32.mrb[99].mxu1 }
0x11e7   :  { %v10048_v47 = vpop.f32.mrb[100].mxu1 }
0x11e8   :  { %v10050_v9 = vpop.f32.mrb[101].mxu1 }
0x11eb   :  { %v10052_v10 = vpop.f32.mrb[102].mxu1 }
0x11ec   :  { %v10054_v60 = vpop.f32.mrb[103].mxu1 }
0x11ef   :  { %v10056_v42 = vpop.f32.mrb[104].mxu1 }
0x11f0   :  { %v10058_v32 = vpop.f32.mrb[105].mxu1 }
0x11f3   :  { %v10060_v56 = vpop.f32.mrb[106].mxu1 }
0x11f4   :  { %v10062_v53 = vpop.f32.mrb[107].mxu1 }
0x11f7   :  { %v10064_v44 = vpop.f32.mrb[108].mxu1 }
0x11f8   :  { %v10066_v38 = vpop.f32.mrb[109].mxu1 }
0x11fb   :  { %v10068_v62 = vpop.f32.mrb[110].mxu1 }
0x11fc   :  { %v10070_v23 = vpop.f32.mrb[111].mxu1 }
0x11ff   :  { %v7133_v52 = vpop.f32.mrb[112].mxu1 }
0x1200   :  { %v4474_v0 = vadd.f32 %v7133_v52, %v10075_v63  ;;  %v4468_v59 = vpop.f32.mrb[113].mxu1 }
0x1201   :  { %v4469_v13 = vadd.f32 %v10075_v63, %v4468_v59 }
0x1202   :  { %v4788_v16 = vmax.f32 %v4474_v0, 0.0 }
0x1203   :  { %v4787_v31 = vmax.f32 %v4469_v13, 0.0  ;;  %v7136_v4 = vpop.f32.mrb[114].mxu1 }
0x1204   :  { %v4484_v17 = vadd.f32 %v7136_v4, %v10075_v63  ;;  %v4478_v29 = vpop.f32.mrb[115].mxu1 }
0x1205   :  { %v4479_v1 = vadd.f32 %v10075_v63, %v4478_v29  ;;  %7243 = vmatprep.mubr.msk.f32.mxu0 %vm70_vm0, %v4787_v31 }
0x1206   :  { %7244 = vmatmul.mubr.msk.f32.vlgmr.msra.gmra.mrb[112].mxu0 %vm70_vm0, %v4788_v16  ;;  %v4790_v21 = vmax.f32 %v4484_v17, 0.0 }
0x1207   :  { %v4789_v26 = vmax.f32 %v4479_v1, 0.0  ;;  %v7139_v45 = vpop.f32.mrb[116].mxu1 }
0x1208   :  { %v4494_v5 = vadd.f32 %v7139_v45, %v10075_v63  ;;  %v4488_v7 = vpop.f32.mrb[117].mxu1 }
0x1209   :  { %v4489_v61 = vadd.f32 %v10075_v63, %v4488_v7  ;;  %7246 = vmatprep.mubr.msk.f32.mxu0 %vm70_vm0, %v4789_v26 }
0x120a   :  { %7247 = vmatmul.mubr.msk.f32.gmra.mrb[114].mxu0 %vm70_vm0, %v4790_v21  ;;  %v4792_v3 = vmax.f32 %v4494_v5, 0.0 }
0x120b   :  { %v4791_v24 = vmax.f32 %v4489_v61, 0.0  ;;  %v7142_v57 = vpop.f32.mrb[118].mxu1 }
0x120c   :  { %v4504_v54 = vadd.f32 %v7142_v57, %v10075_v63  ;;  %v4498_v46 = vpop.f32.mrb[119].mxu1 }
0x120d   :  { %v4499_v20 = vadd.f32 %v10075_v63, %v4498_v46  ;;  %7249 = vmatprep.mubr.msk.f32.mxu0 %vm70_vm0, %v4791_v24 }
0x120e   :  { %7250 = vmatmul.mubr.msk.f32.gmra.mrb[116].mxu0 %vm70_vm0, %v4792_v3  ;;  %v4794_v34 = vmax.f32 %v4504_v54, 0.0 }
0x120f   :  { %v4793_v37 = vmax.f32 %v4499_v20, 0.0 }
0x1211   :  { %7252 = vmatprep.mubr.msk.f32.mxu0 %vm70_vm0, %v4793_v37 }
0x1212   :  { %7253 = vmatmul.mubr.msk.f32.gmra.mrb[118].mxu0 %vm70_vm0, %v4794_v34 }
0x1289   :  { %v7033_v22 = vpop.f32.mrb[88].mxu0 }
0x128a   :  { %v3858_v28 = vadd.f32 %v7033_v22, %v9899_v35  ;;  %v3852_v33 = vpop.f32.mrb[89].mxu0 }
0x128b   :  { %v3853_v2 = vadd.f32 %v9899_v35, %v3852_v33 }
0x128c   :  { %v4140_v52 = vmax.f32 %v3858_v28, 0.0 }
0x128d   :  { %v4139_v49 = vmax.f32 %v3853_v2, 0.0  ;;  %v7036_v18 = vpop.f32.mrb[90].mxu0 }
0x128e   :  { %v3868_v0 = vadd.f32 %v7036_v18, %v9899_v35  ;;  %v3862_v59 = vpop.f32.mrb[91].mxu0 }
0x128f   :  { %v3863_v13 = vadd.f32 %v9899_v35, %v3862_v59  ;;  %7143 = vmatprep.mubr.msk.f32.mxu1 %vm70_vm0, %v4139_v49 }
0x1290   :  { %7144 = vmatmul.mubr.msk.f32.gmra.mrb[120].mxu1 %vm70_vm0, %v4140_v52  ;;  %v4142_v16 = vmax.f32 %v3868_v0, 0.0 }
0x1291   :  { %v4141_v31 = vmax.f32 %v3863_v13, 0.0  ;;  %v7039_v4 = vpop.f32.mrb[92].mxu0 }
0x1292   :  { %v3878_v17 = vadd.f32 %v7039_v4, %v9899_v35  ;;  %v3872_v29 = vpop.f32.mrb[93].mxu0 }
0x1293   :  { %v3873_v1 = vadd.f32 %v9899_v35, %v3872_v29  ;;  %7146 = vmatprep.mubr.msk.f32.mxu1 %vm70_vm0, %v4141_v31 }
0x1294   :  { %7147 = vmatmul.mubr.msk.f32.gmra.mrb[122].mxu1 %vm70_vm0, %v4142_v16  ;;  %v4144_v21 = vmax.f32 %v3878_v17, 0.0 }
0x1295   :  { %v4143_v26 = vmax.f32 %v3873_v1, 0.0  ;;  %v7042_v45 = vpop.f32.mrb[94].mxu0 }
0x1296   :  { %v3888_v5 = vadd.f32 %v7042_v45, %v9899_v35  ;;  %v3882_v7 = vpop.f32.mrb[95].mxu0 }
0x1297   :  { %v3883_v61 = vadd.f32 %v9899_v35, %v3882_v7  ;;  %7149 = vmatprep.mubr.msk.f32.mxu1 %vm70_vm0, %v4143_v26 }
0x1298   :  { %7150 = vmatmul.mubr.msk.f32.gmra.mrb[124].mxu1 %vm70_vm0, %v4144_v21  ;;  %v4146_v3 = vmax.f32 %v3888_v5, 0.0 }
0x1299   :  { %v4145_v24 = vmax.f32 %v3883_v61, 0.0  ;;  %v7045_v57 = vpop.f32.mrb[96].mxu0 }
0x129a   :  { %v3898_v54 = vadd.f32 %v7045_v57, %v9899_v35  ;;  %v3892_v46 = vpop.f32.mrb[97].mxu0 }
0x129b   :  { %v3893_v20 = vadd.f32 %v9899_v35, %v3892_v46  ;;  %7152 = vmatprep.mubr.msk.f32.mxu1 %vm70_vm0, %v4145_v24 }
0x129c   :  { %7153 = vmatmul.mubr.msk.f32.gmra.mrb[126].mxu1 %vm70_vm0, %v4146_v3  ;;  %v4148_v22 = vmax.f32 %v3898_v54, 0.0 }
0x129d   :  { %v4147_v37 = vmax.f32 %v3893_v20, 0.0  ;;  %v7048_v34 = vpop.f32.mrb[98].mxu0 }
0x129e   :  { %v3908_v28 = vadd.f32 %v7048_v34, %v9899_v35  ;;  %v3902_v33 = vpop.f32.mrb[99].mxu0 }
0x129f   :  { %v3903_v2 = vadd.f32 %v9899_v35, %v3902_v33  ;;  %7155 = vmatprep.mubr.msk.f32.mxu1 %vm70_vm0, %v4147_v37 }
0x12a0   :  { %7156 = vmatmul.mubr.msk.f32.gmra.mrb[128].mxu1 %vm70_vm0, %v4148_v22  ;;  %v4150_v52 = vmax.f32 %v3908_v28, 0.0 }
0x12a1   :  { %v4149_v49 = vmax.f32 %v3903_v2, 0.0  ;;  %v7051_v18 = vpop.f32.mrb[100].mxu0 }
0x12a2   :  { %v3918_v0 = vadd.f32 %v7051_v18, %v9899_v35  ;;  %v3912_v59 = vpop.f32.mrb[101].mxu0 }
0x12a3   :  { %v3913_v13 = vadd.f32 %v9899_v35, %v3912_v59  ;;  %7158 = vmatprep.mubr.msk.f32.mxu1 %vm70_vm0, %v4149_v49 }
0x12a4   :  { %7159 = vmatmul.mubr.msk.f32.gmra.mrb[130].mxu1 %vm70_vm0, %v4150_v52  ;;  %v4152_v16 = vmax.f32 %v3918_v0, 0.0 }
0x12a5   :  { %v4151_v31 = vmax.f32 %v3913_v13, 0.0  ;;  %v7054_v4 = vpop.f32.mrb[102].mxu0  ;;  %v3973_v13 = vadd.f32 %v9899_v35, %v9969_v15 }
0x12a6   :  { %v3928_v17 = vadd.f32 %v7054_v4, %v9899_v35  ;;  %v3922_v29 = vpop.f32.mrb[103].mxu0 }
0x12a7   :  { %v3923_v1 = vadd.f32 %v9899_v35, %v3922_v29  ;;  %7161 = vmatprep.mubr.msk.f32.mxu1 %vm70_vm0, %v4151_v31  ;;  %v4163_v29 = vmax.f32 %v3973_v13, 0.0 }
0x12a8   :  { %7162 = vmatmul.mubr.msk.f32.gmra.mrb[132].mxu1 %vm70_vm0, %v4152_v16  ;;  %v4154_v21 = vmax.f32 %v3928_v17, 0.0  ;;  %v3978_v16 = vadd.f32 %v9966_v58, %v9899_v35 }
0x12a9   :  { %v4153_v26 = vmax.f32 %v3923_v1, 0.0  ;;  %v7057_v45 = vpop.f32.mrb[104].mxu0  ;;  %v3983_v1 = vadd.f32 %v9899_v35, %v9979_v30  ;;  %v3998_v30 = vadd.f32 %v9986_v40, %v9899_v35 }
0x12aa   :  { %v3938_v5 = vadd.f32 %v7057_v45, %v9899_v35  ;;  %v3932_v7 = vpop.f32.mrb[105].mxu0  ;;  %v4164_v15 = vmax.f32 %v3978_v16, 0.0  ;;  %v4113_v16 = vadd.f32 %v9899_v35, %v10066_v38  ;;  %v4128_v38 = vadd.f32 %v10068_v62, %v9899_v35 }
0x12ab   :  { %v3933_v61 = vadd.f32 %v9899_v35, %v3932_v7  ;;  %7164 = vmatprep.mubr.msk.f32.mxu1 %vm70_vm0, %v4153_v26  ;;  %v3988_v26 = vadd.f32 %v9976_v11, %v9899_v35  ;;  %v4165_v45 = vmax.f32 %v3983_v1, 0.0  ;;  %v4003_v7 = vadd.f32 %v9899_v35, %v9999_v50 }
0x12ac   :  { %7165 = vmatmul.mubr.msk.f32.gmra.mrb[134].mxu1 %vm70_vm0, %v4154_v21  ;;  %v4156_v3 = vmax.f32 %v3938_v5, 0.0  ;;  %v3993_v21 = vadd.f32 %v9899_v35, %v9989_v41  ;;  %v4168_v11 = vmax.f32 %v3998_v30, 0.0  ;;  %v4008_v41 = vadd.f32 %v9996_v55, %v9899_v35 }
0x12ad   :  { %v4155_v24 = vmax.f32 %v3933_v61, 0.0  ;;  %v7060_v57 = vpop.f32.mrb[106].mxu0  ;;  %v4166_v58 = vmax.f32 %v3988_v26, 0.0  ;;  %v4169_v61 = vmax.f32 %v4003_v7, 0.0  ;;  %v4018_v50 = vadd.f32 %v10006_v48, %v9899_v35 }
0x12ae   :  { %v3948_v54 = vadd.f32 %v7060_v57, %v9899_v35  ;;  %v3942_v46 = vpop.f32.mrb[107].mxu0  ;;  %v4167_v5 = vmax.f32 %v3993_v21, 0.0  ;;  %v4170_v40 = vmax.f32 %v4008_v41, 0.0 }
0x12af   :  { %v3943_v20 = vadd.f32 %v9899_v35, %v3942_v46  ;;  %7167 = vmatprep.mubr.msk.f32.mxu1 %vm70_vm0, %v4155_v24  ;;  %v4013_v24 = vadd.f32 %v9899_v35, %v10008_v14  ;;  %v4172_v55 = vmax.f32 %v4018_v50, 0.0  ;;  %v4028_v14 = vadd.f32 %v10014_v39, %v9899_v35 }
0x12b0   :  { %7168 = vmatmul.mubr.msk.f32.gmra.mrb[136].mxu1 %vm70_vm0, %v4156_v3  ;;  %v4158_v22 = vmax.f32 %v3948_v54, 0.0  ;;  %v4023_v3 = vadd.f32 %v9899_v35, %v10016_v25  ;;  %v4033_v46 = vadd.f32 %v9899_v35, %v10024_v27  ;;  %v4038_v25 = vadd.f32 %v10022_v43, %v9899_v35 }
0x12b1   :  { %v4157_v37 = vmax.f32 %v3943_v20, 0.0  ;;  %v7063_v34 = vpop.f32.mrb[108].mxu0  ;;  %v4171_v57 = vmax.f32 %v4013_v24, 0.0  ;;  %v4174_v48 = vmax.f32 %v4028_v14, 0.0  ;;  %v4048_v27 = vadd.f32 %v10030_v8, %v9899_v35 }
0x12b2   :  { %v3958_v28 = vadd.f32 %v7063_v34, %v9899_v35  ;;  %v3952_v33 = vpop.f32.mrb[109].mxu0  ;;  %v4173_v54 = vmax.f32 %v4023_v3, 0.0  ;;  %v4175_v20 = vmax.f32 %v4033_v46, 0.0  ;;  %v4176_v39 = vmax.f32 %v4038_v25, 0.0 }
0x12b3   :  { %v3953_v2 = vadd.f32 %v9899_v35, %v3952_v33  ;;  %7170 = vmatprep.mubr.msk.f32.mxu1 %vm70_vm0, %v4157_v37  ;;  %v4043_v37 = vadd.f32 %v9899_v35, %v10032_v19  ;;  %v4178_v43 = vmax.f32 %v4048_v27, 0.0  ;;  %v4058_v19 = vadd.f32 %v10038_v36, %v9899_v35 }
0x12b4   :  { %7171 = vmatmul.mubr.msk.f32.gmra.mrb[138].mxu1 %vm70_vm0, %v4158_v22  ;;  %v4160_v52 = vmax.f32 %v3958_v28, 0.0  ;;  %v4053_v22 = vadd.f32 %v9899_v35, %v10040_v6  ;;  %v4063_v33 = vadd.f32 %v9899_v35, %v10046_v51  ;;  %v4068_v6 = vadd.f32 %v10044_v12, %v9899_v35 }
0x12b5   :  { %v4159_v49 = vmax.f32 %v3953_v2, 0.0  ;;  %v7066_v18 = vpop.f32.mrb[110].mxu0  ;;  %v4177_v34 = vmax.f32 %v4043_v37, 0.0  ;;  %v4180_v8 = vmax.f32 %v4058_v19, 0.0  ;;  %v4078_v51 = vadd.f32 %v10048_v47, %v9899_v35 }
0x12b6   :  { %v3968_v0 = vadd.f32 %v7066_v18, %v9899_v35  ;;  %v3962_v59 = vpop.f32.mrb[111].mxu0  ;;  %v4179_v28 = vmax.f32 %v4053_v22, 0.0  ;;  %v4181_v2 = vmax.f32 %v4063_v33, 0.0  ;;  %v4182_v36 = vmax.f32 %v4068_v6, 0.0 }
0x12b7   :  { %v3963_v31 = vadd.f32 %v9899_v35, %v3962_v59  ;;  %7173 = vmatprep.mubr.msk.f32.mxu1 %vm70_vm0, %v4159_v49  ;;  %v4073_v49 = vadd.f32 %v9899_v35, %v10050_v9  ;;  %v4184_v12 = vmax.f32 %v4078_v51, 0.0  ;;  %v4088_v9 = vadd.f32 %v10052_v10, %v9899_v35 }
0x12b8   :  { %7174 = vmatmul.mubr.msk.f32.gmra.mrb[140].mxu1 %vm70_vm0, %v4160_v52  ;;  %v4162_v17 = vmax.f32 %v3968_v0, 0.0  ;;  %v4083_v52 = vadd.f32 %v9899_v35, %v10054_v60  ;;  %v4093_v59 = vadd.f32 %v9899_v35, %v10058_v32  ;;  %v4098_v60 = vadd.f32 %v10056_v42, %v9899_v35 }
0x12b9   :  { %v4161_v4 = vmax.f32 %v3963_v31, 0.0  ;;  %v4183_v18 = vmax.f32 %v4073_v49, 0.0  ;;  %v4186_v47 = vmax.f32 %v4088_v9, 0.0  ;;  %v4103_v31 = vadd.f32 %v9899_v35, %v10062_v53 }
0x12ba   :  { %v4185_v0 = vmax.f32 %v4083_v52, 0.0  ;;  %v4187_v13 = vmax.f32 %v4093_v59, 0.0  ;;  %v4188_v10 = vmax.f32 %v4098_v60, 0.0  ;;  %v4108_v32 = vadd.f32 %v10060_v56, %v9899_v35 }
0x12bb   :  { %7176 = vmatprep.mubr.msk.f32.mxu1 %vm70_vm0, %v4161_v4  ;;  %v4189_v4 = vmax.f32 %v4103_v31, 0.0  ;;  %v4118_v53 = vadd.f32 %v10064_v44, %v9899_v35  ;;  %v18_v44 = vstv %s10396_s12 }
0x12bc   :  { %7177 = vmatmul.mubr.msk.f32.gmra.mrb[142].mxu1 %vm70_vm0, %v4162_v17  ;;  %v4190_v42 = vmax.f32 %v4108_v32, 0.0  ;;  %v4191_v17 = vmax.f32 %v4113_v16, 0.0  ;;  %19 = vst [vmem:[#allocation2] sm:$0x1] %v18_v44 }
0x12bd   :  { %7179 = vmatprep.mubr.msk.f32.mxu1 %vm70_vm0, %v4163_v29  ;;  %v4123_v29 = vadd.f32 %v9899_v35, %v10070_v23  ;;  %v4192_v56 = vmax.f32 %v4118_v53, 0.0 }
0x12bf   :  { %v4193_v1 = vmax.f32 %v4123_v29, 0.0 }
0x12c0   :  { %7180 = vmatmul.mubr.msk.f32.gmra.mrb[144].mxu1 %vm70_vm0, %v4164_v15  ;;  %v4194_v15 = vmax.f32 %v4128_v38, 0.0 }
0x12c1   :  { %7182 = vmatprep.mubr.msk.f32.mxu1 %vm70_vm0, %v4165_v45 }
0x12c4   :  { %7183 = vmatmul.mubr.msk.f32.gmra.mrb[146].mxu1 %vm70_vm0, %v4166_v58 }
0x12c5   :  { %7185 = vmatprep.mubr.msk.f32.mxu1 %vm70_vm0, %v4167_v5 }
0x12c8   :  { %7186 = vmatmul.mubr.msk.f32.gmra.mrb[148].mxu1 %vm70_vm0, %v4168_v11 }
0x12c9   :  { %7188 = vmatprep.mubr.msk.f32.mxu1 %vm70_vm0, %v4169_v61 }
0x12cc   :  { %7189 = vmatmul.mubr.msk.f32.gmra.mrb[150].mxu1 %vm70_vm0, %v4170_v40 }
0x12cd   :  { %7191 = vmatprep.mubr.msk.f32.mxu1 %vm70_vm0, %v4171_v57 }
0x12d0   :  { %7192 = vmatmul.mubr.msk.f32.gmra.mrb[152].mxu1 %vm70_vm0, %v4172_v55 }
0x12d1   :  { %7194 = vmatprep.mubr.msk.f32.mxu1 %vm70_vm0, %v4173_v54 }
0x12d4   :  { %7195 = vmatmul.mubr.msk.f32.gmra.mrb[154].mxu1 %vm70_vm0, %v4174_v48 }
0x12d5   :  { %7197 = vmatprep.mubr.msk.f32.mxu1 %vm70_vm0, %v4175_v20 }
0x12d8   :  { %7198 = vmatmul.mubr.msk.f32.gmra.mrb[156].mxu1 %vm70_vm0, %v4176_v39 }
0x12d9   :  { %7200 = vmatprep.mubr.msk.f32.mxu1 %vm70_vm0, %v4177_v34 }
0x12dc   :  { %7201 = vmatmul.mubr.msk.f32.gmra.mrb[158].mxu1 %vm70_vm0, %v4178_v43 }
0x12dd   :  { %7203 = vmatprep.mubr.msk.f32.mxu1 %vm70_vm0, %v4179_v28 }
0x12e0   :  { %7204 = vmatmul.mubr.msk.f32.gmra.mrb[160].mxu1 %vm70_vm0, %v4180_v8 }
0x12e1   :  { %7206 = vmatprep.mubr.msk.f32.mxu1 %vm70_vm0, %v4181_v2 }
0x12e4   :  { %7207 = vmatmul.mubr.msk.f32.gmra.mrb[162].mxu1 %vm70_vm0, %v4182_v36 }
0x12e5   :  { %7209 = vmatprep.mubr.msk.f32.mxu1 %vm70_vm0, %v4183_v18 }
0x12e8   :  { %7210 = vmatmul.mubr.msk.f32.gmra.mrb[164].mxu1 %vm70_vm0, %v4184_v12 }
0x12e9   :  { %7212 = vmatprep.mubr.msk.f32.mxu1 %vm70_vm0, %v4185_v0 }
0x12ec   :  { %7213 = vmatmul.mubr.msk.f32.gmra.mrb[166].mxu1 %vm70_vm0, %v4186_v47 }
0x12ed   :  { %7215 = vmatprep.mubr.msk.f32.mxu1 %vm70_vm0, %v4187_v13 }
0x12f0   :  { %7216 = vmatmul.mubr.msk.f32.gmra.mrb[168].mxu1 %vm70_vm0, %v4188_v10 }
0x12f1   :  { %7218 = vmatprep.mubr.msk.f32.mxu1 %vm70_vm0, %v4189_v4 }
0x12f4   :  { %7219 = vmatmul.mubr.msk.f32.gmra.mrb[170].mxu1 %vm70_vm0, %v4190_v42 }
0x12f5   :  { %7221 = vmatprep.mubr.msk.f32.mxu1 %vm70_vm0, %v4191_v17 }
0x12f8   :  { %7222 = vmatmul.mubr.msk.f32.gmra.mrb[172].mxu1 %vm70_vm0, %v4192_v56 }
0x12f9   :  { %7224 = vmatprep.mubr.msk.f32.mxu1 %vm70_vm0, %v4193_v1 }
0x12fc   :  { %7225 = vmatmul.mubr.msk.f32.gmra.mrb[174].mxu1 %vm70_vm0, %v4194_v15 }
0x1363   :  { %v7145_v23 = vpop.f32.mrb[120].mxu1 }
0x1364   :  { %v4514_v26 = vadd.f32 %v7145_v23, %v10075_v63  ;;  %v4508_v45 = vpop.f32.mrb[121].mxu1 }
0x1365   :  { %v4509_v21 = vadd.f32 %v10075_v63, %v4508_v45 }
0x1366   :  { %v4796_v58 = vmax.f32 %v4514_v26, 0.0 }
0x1367   :  { %v4795_v35 = vmax.f32 %v4509_v21, 0.0  ;;  %v7148_v62 = vpop.f32.mrb[122].mxu1 }
0x1368   :  { %v4524_v30 = vadd.f32 %v7148_v62, %v10075_v63  ;;  %v4518_v5 = vpop.f32.mrb[123].mxu1 }
0x1369   :  { %v4519_v7 = vadd.f32 %v10075_v63, %v4518_v5  ;;  %7255 = vmatprep.mubr.msk.f32.mxu0 %vm70_vm0, %v4795_v35 }
0x136a   :  { %7256 = vmatmul.mubr.msk.f32.gmra.mrb[112].mxu0 %vm70_vm0, %v4796_v58  ;;  %v4798_v61 = vmax.f32 %v4524_v30, 0.0 }
0x136b   :  { %v4797_v11 = vmax.f32 %v4519_v7, 0.0  ;;  %v7151_v41 = vpop.f32.mrb[124].mxu1 }
0x136c   :  { %v4534_v24 = vadd.f32 %v7151_v41, %v10075_v63  ;;  %v4528_v40 = vpop.f32.mrb[125].mxu1 }
0x136d   :  { %v4529_v50 = vadd.f32 %v10075_v63, %v4528_v40  ;;  %7258 = vmatprep.mubr.msk.f32.mxu0 %vm70_vm0, %v4797_v11 }
0x136e   :  { %7259 = vmatmul.mubr.msk.f32.gmra.mrb[114].mxu0 %vm70_vm0, %v4798_v61  ;;  %v4800_v55 = vmax.f32 %v4534_v24, 0.0 }
0x136f   :  { %v4799_v57 = vmax.f32 %v4529_v50, 0.0  ;;  %v7154_v3 = vpop.f32.mrb[126].mxu1 }
0x1370   :  { %v4544_v14 = vadd.f32 %v7154_v3, %v10075_v63  ;;  %v4538_v54 = vpop.f32.mrb[127].mxu1 }
0x1371   :  { %v4539_v46 = vadd.f32 %v10075_v63, %v4538_v54  ;;  %7261 = vmatprep.mubr.msk.f32.mxu0 %vm70_vm0, %v4799_v57 }
0x1372   :  { %7262 = vmatmul.mubr.msk.f32.gmra.mrb[116].mxu0 %vm70_vm0, %v4800_v55  ;;  %v4802_v20 = vmax.f32 %v4544_v14, 0.0 }
0x1373   :  { %v4801_v48 = vmax.f32 %v4539_v46, 0.0  ;;  %v7157_v25 = vpop.f32.mrb[128].mxu1 }
0x1374   :  { %v4554_v37 = vadd.f32 %v7157_v25, %v10075_v63  ;;  %v4548_v39 = vpop.f32.mrb[129].mxu1 }
0x1375   :  { %v4549_v27 = vadd.f32 %v10075_v63, %v4548_v39  ;;  %7264 = vmatprep.mubr.msk.f32.mxu0 %vm70_vm0, %v4801_v48 }
0x1376   :  { %7265 = vmatmul.mubr.msk.f32.gmra.mrb[118].mxu0 %vm70_vm0, %v4802_v20  ;;  %v4804_v43 = vmax.f32 %v4554_v37, 0.0 }
0x1377   :  { %v4803_v34 = vmax.f32 %v4549_v27, 0.0  ;;  %v7160_v22 = vpop.f32.mrb[130].mxu1 }
0x1378   :  { %v4564_v19 = vadd.f32 %v7160_v22, %v10075_v63  ;;  %v4558_v28 = vpop.f32.mrb[131].mxu1 }
0x1379   :  { %v4559_v33 = vadd.f32 %v10075_v63, %v4558_v28  ;;  %7267 = vmatprep.mubr.msk.f32.mxu0 %vm70_vm0, %v4803_v34 }
0x137a   :  { %7268 = vmatmul.mubr.msk.f32.gmra.mrb[112].mxu0 %vm70_vm0, %v4804_v43  ;;  %v4806_v2 = vmax.f32 %v4564_v19, 0.0 }
0x137b   :  { %v4805_v8 = vmax.f32 %v4559_v33, 0.0  ;;  %v7163_v6 = vpop.f32.mrb[132].mxu1 }
0x137c   :  { %v4574_v49 = vadd.f32 %v7163_v6, %v10075_v63  ;;  %v4568_v36 = vpop.f32.mrb[133].mxu1 }
0x137d   :  { %v4569_v51 = vadd.f32 %v10075_v63, %v4568_v36  ;;  %7270 = vmatprep.mubr.msk.f32.mxu0 %vm70_vm0, %v4805_v8 }
0x137e   :  { %7271 = vmatmul.mubr.msk.f32.gmra.mrb[114].mxu0 %vm70_vm0, %v4806_v2  ;;  %v4808_v12 = vmax.f32 %v4574_v49, 0.0 }
0x137f   :  { %v4807_v18 = vmax.f32 %v4569_v51, 0.0  ;;  %v7166_v52 = vpop.f32.mrb[134].mxu1 }
0x1380   :  { %v4584_v9 = vadd.f32 %v7166_v52, %v10075_v63  ;;  %v4578_v0 = vpop.f32.mrb[135].mxu1 }
0x1381   :  { %v4579_v59 = vadd.f32 %v10075_v63, %v4578_v0  ;;  %7273 = vmatprep.mubr.msk.f32.mxu0 %vm70_vm0, %v4807_v18 }
0x1382   :  { %7274 = vmatmul.mubr.msk.f32.gmra.mrb[116].mxu0 %vm70_vm0, %v4808_v12  ;;  %v4810_v13 = vmax.f32 %v4584_v9, 0.0 }
0x1383   :  { %v4809_v47 = vmax.f32 %v4579_v59, 0.0  ;;  %v7169_v60 = vpop.f32.mrb[136].mxu1 }
0x1384   :  { %v4594_v31 = vadd.f32 %v7169_v60, %v10075_v63  ;;  %v4588_v10 = vpop.f32.mrb[137].mxu1 }
0x1385   :  { %v4589_v32 = vadd.f32 %v10075_v63, %v4588_v10  ;;  %7276 = vmatprep.mubr.msk.f32.mxu0 %vm70_vm0, %v4809_v47 }
0x1386   :  { %7277 = vmatmul.mubr.msk.f32.gmra.mrb[118].mxu0 %vm70_vm0, %v4810_v13  ;;  %v4812_v42 = vmax.f32 %v4594_v31, 0.0 }
0x1387   :  { %v4811_v4 = vmax.f32 %v4589_v32, 0.0  ;;  %v7172_v16 = vpop.f32.mrb[138].mxu1 }
0x1388   :  { %v4604_v53 = vadd.f32 %v7172_v16, %v10075_v63  ;;  %v4598_v17 = vpop.f32.mrb[139].mxu1 }
0x1389   :  { %v4599_v29 = vadd.f32 %v10075_v63, %v4598_v17  ;;  %7279 = vmatprep.mubr.msk.f32.mxu0 %vm70_vm0, %v4811_v4 }
0x138a   :  { %7280 = vmatmul.mubr.msk.f32.gmra.mrb[112].mxu0 %vm70_vm0, %v4812_v42  ;;  %v4814_v1 = vmax.f32 %v4604_v53, 0.0 }
0x138b   :  { %v4813_v56 = vmax.f32 %v4599_v29, 0.0  ;;  %v7175_v38 = vpop.f32.mrb[140].mxu1 }
0x138c   :  { %v4614_v15 = vadd.f32 %v7175_v38, %v10075_v63  ;;  %v4608_v44 = vpop.f32.mrb[141].mxu1 }
0x138d   :  { %v4609_v23 = vadd.f32 %v10075_v63, %v4608_v44  ;;  %7282 = vmatprep.mubr.msk.f32.mxu0 %vm70_vm0, %v4813_v56 }
0x138e   :  { %7283 = vmatmul.mubr.msk.f32.gmra.mrb[114].mxu0 %vm70_vm0, %v4814_v1  ;;  %v4816_v21 = vmax.f32 %v4614_v15, 0.0 }
0x138f   :  { %v4815_v26 = vmax.f32 %v4609_v23, 0.0  ;;  %v7178_v45 = vpop.f32.mrb[142].mxu1 }
0x1390   :  { %v4624_v35 = vadd.f32 %v7178_v45, %v10075_v63  ;;  %v4618_v62 = vpop.f32.mrb[143].mxu1 }
0x1391   :  { %v4619_v58 = vadd.f32 %v10075_v63, %v4618_v62  ;;  %7285 = vmatprep.mubr.msk.f32.mxu0 %vm70_vm0, %v4815_v26 }
0x1392   :  { %7286 = vmatmul.mubr.msk.f32.gmra.mrb[116].mxu0 %vm70_vm0, %v4816_v21  ;;  %v4818_v7 = vmax.f32 %v4624_v35, 0.0 }
0x1393   :  { %v4817_v30 = vmax.f32 %v4619_v58, 0.0  ;;  %v7181_v5 = vpop.f32.mrb[144].mxu1 }
0x1394   :  { %v4634_v11 = vadd.f32 %v7181_v5, %v10075_v63  ;;  %v4628_v41 = vpop.f32.mrb[145].mxu1 }
0x1395   :  { %v4629_v61 = vadd.f32 %v10075_v63, %v4628_v41  ;;  %7288 = vmatprep.mubr.msk.f32.mxu0 %vm70_vm0, %v4817_v30 }
0x1396   :  { %7289 = vmatmul.mubr.msk.f32.gmra.mrb[118].mxu0 %vm70_vm0, %v4818_v7  ;;  %v4820_v50 = vmax.f32 %v4634_v11, 0.0 }
0x1397   :  { %v4819_v24 = vmax.f32 %v4629_v61, 0.0  ;;  %v7184_v40 = vpop.f32.mrb[146].mxu1 }
0x1398   :  { %v4644_v57 = vadd.f32 %v7184_v40, %v10075_v63  ;;  %v4638_v3 = vpop.f32.mrb[147].mxu1 }
0x1399   :  { %v4639_v55 = vadd.f32 %v10075_v63, %v4638_v3  ;;  %7291 = vmatprep.mubr.msk.f32.mxu0 %vm70_vm0, %v4819_v24 }
0x139a   :  { %7292 = vmatmul.mubr.msk.f32.gmra.mrb[112].mxu0 %vm70_vm0, %v4820_v50  ;;  %v4822_v46 = vmax.f32 %v4644_v57, 0.0 }
0x139b   :  { %v4821_v14 = vmax.f32 %v4639_v55, 0.0  ;;  %v7187_v54 = vpop.f32.mrb[148].mxu1 }
0x139c   :  { %v4654_v48 = vadd.f32 %v7187_v54, %v10075_v63  ;;  %v4648_v25 = vpop.f32.mrb[149].mxu1 }
0x139d   :  { %v4649_v20 = vadd.f32 %v10075_v63, %v4648_v25  ;;  %7294 = vmatprep.mubr.msk.f32.mxu0 %vm70_vm0, %v4821_v14 }
0x139e   :  { %7295 = vmatmul.mubr.msk.f32.gmra.mrb[114].mxu0 %vm70_vm0, %v4822_v46  ;;  %v4824_v27 = vmax.f32 %v4654_v48, 0.0 }
0x139f   :  { %v4823_v37 = vmax.f32 %v4649_v20, 0.0  ;;  %v7190_v39 = vpop.f32.mrb[150].mxu1 }
0x13a0   :  { %v4664_v34 = vadd.f32 %v7190_v39, %v10075_v63  ;;  %v4658_v22 = vpop.f32.mrb[151].mxu1 }
0x13a1   :  { %v4659_v43 = vadd.f32 %v10075_v63, %v4658_v22  ;;  %7297 = vmatprep.mubr.msk.f32.mxu0 %vm70_vm0, %v4823_v37 }
0x13a2   :  { %7298 = vmatmul.mubr.msk.f32.gmra.mrb[116].mxu0 %vm70_vm0, %v4824_v27  ;;  %v4826_v33 = vmax.f32 %v4664_v34, 0.0 }
0x13a3   :  { %v4825_v19 = vmax.f32 %v4659_v43, 0.0  ;;  %v7193_v28 = vpop.f32.mrb[152].mxu1 }
0x13a4   :  { %v4674_v8 = vadd.f32 %v7193_v28, %v10075_v63  ;;  %v4668_v6 = vpop.f32.mrb[153].mxu1 }
0x13a5   :  { %v4669_v2 = vadd.f32 %v10075_v63, %v4668_v6  ;;  %7300 = vmatprep.mubr.msk.f32.mxu0 %vm70_vm0, %v4825_v19 }
0x13a6   :  { %7301 = vmatmul.mubr.msk.f32.gmra.mrb[118].mxu0 %vm70_vm0, %v4826_v33  ;;  %v4828_v51 = vmax.f32 %v4674_v8, 0.0 }
0x13a7   :  { %v4827_v49 = vmax.f32 %v4669_v2, 0.0  ;;  %v7196_v36 = vpop.f32.mrb[154].mxu1 }
0x13a8   :  { %v4684_v18 = vadd.f32 %v7196_v36, %v10075_v63  ;;  %v4678_v52 = vpop.f32.mrb[155].mxu1 }
0x13a9   :  { %v4679_v12 = vadd.f32 %v10075_v63, %v4678_v52  ;;  %7303 = vmatprep.mubr.msk.f32.mxu0 %vm70_vm0, %v4827_v49 }
0x13aa   :  { %7304 = vmatmul.mubr.msk.f32.gmra.mrb[112].mxu0 %vm70_vm0, %v4828_v51  ;;  %v4830_v59 = vmax.f32 %v4684_v18, 0.0 }
0x13ab   :  { %v4829_v9 = vmax.f32 %v4679_v12, 0.0  ;;  %v7199_v0 = vpop.f32.mrb[156].mxu1  ;;  %v5854_v12 = vld [vmem:[#allocation2] ss:$0 sm:$0xff] }
0x13ac   :  { %v4694_v47 = vadd.f32 %v7199_v0, %v10075_v63  ;;  %v4688_v60 = vpop.f32.mrb[157].mxu1 }
0x13ad   :  { %v4689_v13 = vadd.f32 %v10075_v63, %v4688_v60  ;;  %7306 = vmatprep.mubr.msk.f32.mxu0 %vm70_vm0, %v4829_v9  ;;  %v7711_v9 = vadd.f32 %v5854_v12, %v5854_v12 }
0x13ae   :  { %7307 = vmatmul.mubr.msk.f32.gmra.mrb[114].mxu0 %vm70_vm0, %v4830_v59  ;;  %v4832_v32 = vmax.f32 %v4694_v47, 0.0 }
0x13af   :  { %v4831_v31 = vmax.f32 %v4689_v13, 0.0  ;;  %v7202_v10 = vpop.f32.mrb[158].mxu1  ;;  %v7712_v0 = vadd.f32 %v7711_v9, %v5854_v12 }
0x13b0   :  { %v4704_v4 = vadd.f32 %v7202_v10, %v10075_v63  ;;  %v4698_v16 = vpop.f32.mrb[159].mxu1 }
0x13b1   :  { %v4699_v42 = vadd.f32 %v10075_v63, %v4698_v16  ;;  %7309 = vmatprep.mubr.msk.f32.mxu0 %vm70_vm0, %v4831_v31  ;;  %v7713_v59 = vadd.f32 %v7712_v0, %v5854_v12 }
0x13b2   :  { %7310 = vmatmul.mubr.msk.f32.gmra.mrb[116].mxu0 %vm70_vm0, %v4832_v32  ;;  %v4834_v29 = vmax.f32 %v4704_v4, 0.0 }
0x13b3   :  { %v4833_v53 = vmax.f32 %v4699_v42, 0.0  ;;  %v7205_v17 = vpop.f32.mrb[160].mxu1  ;;  %v7714_v47 = vadd.f32 %v7713_v59, %v5854_v12 }
0x13b4   :  { %v4714_v56 = vadd.f32 %v7205_v17, %v10075_v63  ;;  %v4708_v38 = vpop.f32.mrb[161].mxu1 }
0x13b5   :  { %v4709_v1 = vadd.f32 %v10075_v63, %v4708_v38  ;;  %7312 = vmatprep.mubr.msk.f32.mxu0 %vm70_vm0, %v4833_v53  ;;  %v7715_v60 = vadd.f32 %v7714_v47, %v5854_v12 }
0x13b6   :  { %7313 = vmatmul.mubr.msk.f32.gmra.mrb[118].mxu0 %vm70_vm0, %v4834_v29  ;;  %v4836_v23 = vmax.f32 %v4714_v56, 0.0 }
0x13b7   :  { %v4835_v15 = vmax.f32 %v4709_v1, 0.0  ;;  %v7208_v44 = vpop.f32.mrb[162].mxu1  ;;  %v7716_v13 = vadd.f32 %v7715_v60, %v5854_v12 }
0x13b8   :  { %v4724_v26 = vadd.f32 %v7208_v44, %v10075_v63  ;;  %v4718_v45 = vpop.f32.mrb[163].mxu1 }
0x13b9   :  { %v4719_v21 = vadd.f32 %v10075_v63, %v4718_v45  ;;  %7315 = vmatprep.mubr.msk.f32.mxu0 %vm70_vm0, %v4835_v15  ;;  %v7717_v31 = vadd.f32 %v7716_v13, %v5854_v12 }
0x13ba   :  { %7316 = vmatmul.mubr.msk.f32.gmra.mrb[112].mxu0 %vm70_vm0, %v4836_v23  ;;  %v4838_v58 = vmax.f32 %v4724_v26, 0.0 }
0x13bb   :  { %v4837_v35 = vmax.f32 %v4719_v21, 0.0  ;;  %v7211_v62 = vpop.f32.mrb[164].mxu1 }
0x13bc   :  { %v4734_v30 = vadd.f32 %v7211_v62, %v10075_v63  ;;  %v4728_v5 = vpop.f32.mrb[165].mxu1 }
0x13bd   :  { %v4729_v7 = vadd.f32 %v10075_v63, %v4728_v5  ;;  %7318 = vmatprep.mubr.msk.f32.mxu0 %vm70_vm0, %v4837_v35 }
0x13be   :  { %7319 = vmatmul.mubr.msk.f32.gmra.mrb[114].mxu0 %vm70_vm0, %v4838_v58  ;;  %v4840_v61 = vmax.f32 %v4734_v30, 0.0 }
0x13bf   :  { %v4839_v11 = vmax.f32 %v4729_v7, 0.0  ;;  %v7214_v41 = vpop.f32.mrb[166].mxu1 }
0x13c0   :  { %v4744_v24 = vadd.f32 %v7214_v41, %v10075_v63  ;;  %v4738_v40 = vpop.f32.mrb[167].mxu1 }
0x13c1   :  { %v4739_v50 = vadd.f32 %v10075_v63, %v4738_v40  ;;  %7321 = vmatprep.mubr.msk.f32.mxu0 %vm70_vm0, %v4839_v11 }
0x13c2   :  { %7322 = vmatmul.mubr.msk.f32.gmra.mrb[116].mxu0 %vm70_vm0, %v4840_v61  ;;  %v4842_v55 = vmax.f32 %v4744_v24, 0.0 }
0x13c3   :  { %v4841_v57 = vmax.f32 %v4739_v50, 0.0  ;;  %v7217_v3 = vpop.f32.mrb[168].mxu1 }
0x13c4   :  { %v4754_v14 = vadd.f32 %v7217_v3, %v10075_v63  ;;  %v4748_v54 = vpop.f32.mrb[169].mxu1 }
0x13c5   :  { %v4749_v46 = vadd.f32 %v10075_v63, %v4748_v54  ;;  %7324 = vmatprep.mubr.msk.f32.mxu0 %vm70_vm0, %v4841_v57 }
0x13c6   :  { %7325 = vmatmul.mubr.msk.f32.gmra.mrb[118].mxu0 %vm70_vm0, %v4842_v55  ;;  %v4844_v20 = vmax.f32 %v4754_v14, 0.0 }
0x13c7   :  { %v4843_v48 = vmax.f32 %v4749_v46, 0.0  ;;  %v7220_v25 = vpop.f32.mrb[170].mxu1 }
0x13c8   :  { %v4764_v37 = vadd.f32 %v7220_v25, %v10075_v63  ;;  %v4758_v39 = vpop.f32.mrb[171].mxu1 }
0x13c9   :  { %v4759_v27 = vadd.f32 %v10075_v63, %v4758_v39  ;;  %7327 = vmatprep.mubr.msk.f32.mxu0 %vm70_vm0, %v4843_v48 }
0x13ca   :  { %7328 = vmatmul.mubr.msk.f32.gmra.mrb[112].mxu0 %vm70_vm0, %v4844_v20  ;;  %v4846_v43 = vmax.f32 %v4764_v37, 0.0 }
0x13cb   :  { %v4845_v34 = vmax.f32 %v4759_v27, 0.0  ;;  %v7223_v22 = vpop.f32.mrb[172].mxu1 }
0x13cc   :  { %v4774_v19 = vadd.f32 %v7223_v22, %v10075_v63  ;;  %v4768_v28 = vpop.f32.mrb[173].mxu1 }
0x13cd   :  { %v4769_v33 = vadd.f32 %v10075_v63, %v4768_v28  ;;  %7330 = vmatprep.mubr.msk.f32.mxu0 %vm70_vm0, %v4845_v34 }
0x13ce   :  { %7331 = vmatmul.mubr.msk.f32.gmra.mrb[114].mxu0 %vm70_vm0, %v4846_v43  ;;  %v4848_v2 = vmax.f32 %v4774_v19, 0.0 }
0x13cf   :  { %v4847_v8 = vmax.f32 %v4769_v33, 0.0  ;;  %v7226_v6 = vpop.f32.mrb[174].mxu1 }
0x13d0   :  { %v4784_v49 = vadd.f32 %v7226_v6, %v10075_v63  ;;  %v4778_v36 = vpop.f32.mrb[175].mxu1 }
0x13d1   :  { %v4779_v51 = vadd.f32 %v10075_v63, %v4778_v36  ;;  %7333 = vmatprep.mubr.msk.f32.mxu0 %vm70_vm0, %v4847_v8 }
0x13d2   :  { %7334 = vmatmul.mubr.msk.f32.gmra.mrb[116].mxu0 %vm70_vm0, %v4848_v2  ;;  %v4850_v52 = vmax.f32 %v4784_v49, 0.0 }
0x13d3   :  { %v4849_v18 = vmax.f32 %v4779_v51, 0.0 }
0x13d5   :  { %7336 = vmatprep.mubr.msk.f32.mxu0 %vm70_vm0, %v4849_v18 }
0x13d6   :  { %7337 = vmatmul.mubr.msk.f32.gmra.mrb[118].mxu0 %vm70_vm0, %v4850_v52 }
0x149d   :  { %v7329_v10 = vpop.f32.mrb[112].mxu0 }
0x149e   :  { %v7710_v63 = vadd.f32 %v7717_v31, %v7329_v10  ;;  %v5404_v32 = vpop.f32.mrb[113].mxu0 }
0x149f   :  { %v7718_v4 = vadd.f32 %v7717_v31, %v5404_v32 }
0x14a0   :  { %5501 = vst.msk [vmem:[%s10397_s13 + $0x8] sm:$0xff] %vm5499_vm2, %v7710_v63 }
0x14a1   :  { %5500 = vst.msk [vmem:[%s10397_s13] sm:$0xff] %vm5499_vm2, %v7718_v4  ;;  %v7332_v16 = vpop.f32.mrb[114].mxu0 }
0x14a2   :  { %v7726_v42 = vadd.f32 %v7717_v31, %v7332_v16  ;;  %v5414_v53 = vpop.f32.mrb[115].mxu0 }
0x14a3   :  { %v7734_v17 = vadd.f32 %v7717_v31, %v5414_v53 }
0x14a4   :  { %5503 = vst.msk [vmem:[%s10397_s13 + $0x18] sm:$0xff] %vm5499_vm2, %v7726_v42 }
0x14a5   :  { %5502 = vst.msk [vmem:[%s10397_s13 + $0x10] sm:$0xff] %vm5499_vm2, %v7734_v17  ;;  %v7335_v29 = vpop.f32.mrb[116].mxu0 }
0x14a6   :  { %v7742_v56 = vadd.f32 %v7717_v31, %v7335_v29  ;;  %v5424_v38 = vpop.f32.mrb[117].mxu0 }
0x14a7   :  { %v7750_v1 = vadd.f32 %v7717_v31, %v5424_v38 }
0x14a8   :  { %5505 = vst.msk [vmem:[%s10397_s13 + $0x28] sm:$0xff] %vm5499_vm2, %v7742_v56 }
0x14a9   :  { %5504 = vst.msk [vmem:[%s10397_s13 + $0x20] sm:$0xff] %vm5499_vm2, %v7750_v1  ;;  %v7338_v15 = vpop.f32.mrb[118].mxu0 }
0x14aa   :  { %v7758_v44 = vadd.f32 %v7717_v31, %v7338_v15  ;;  %v5434_v23 = vpop.f32.mrb[119].mxu0 }
0x14ab   :  { %v7766_v26 = vadd.f32 %v7717_v31, %v5434_v23 }
0x14ac   :  { %5507 = vst.msk [vmem:[%s10397_s13 + $0x38] sm:$0xff] %vm5499_vm2, %v7758_v44 }
0x14ad   :  { %5506 = vst.msk [vmem:[%s10397_s13 + $0x30] sm:$0xff] %vm5499_vm2, %v7766_v26 }

</bundles_post_ra>
